<compile_context>
chip_gen: v5e
topology: v5e:2x2
jax: 0.10.0
libtpu: 0.0.40
codegen_flags: <defaults>
</compile_context>

<pallas_src>
import functools
import math

import jax
import jax.numpy as jnp
from jax.experimental import pallas as pl
from jax.experimental.pallas import tpu as pltpu


def _round_up(x, m):
    return ((x + m - 1) // m) * m


def _gru_forecaster_kernel(num_layers, seq_len, b_pad, h_pad, *refs):
    """Whole forward pass: stacked GRU + fc1 + relu + fc2.

    refs = [x_flat,
            (w_ih_fused, w_hh_fused, b_ih_fused, b_hn) * num_layers,
            w_fc1, b_fc1, w_fc2, b_fc2,
            out_ref,
            proj_scratch (T*Bp, Gp)]

    x_flat is time-major, batch-padded: row index = t * Bp + b.
    Fused gate layout along lanes: [r slot | z slot | n slot], each slot Hp=128
    lanes wide with real values in lanes [0:H] and zeros elsewhere.
    """
    T, Bp, Hp = seq_len, b_pad, h_pad
    Gp = 3 * Hp

    idx = 0
    x_ref = refs[idx]; idx += 1
    layer_refs = []
    for _ in range(num_layers):
        layer_refs.append(refs[idx:idx + 4]); idx += 4
    w1_ref, b1_ref, w2_ref, b2_ref = refs[idx:idx + 4]; idx += 4
    out_ref = refs[idx]; idx += 1
    proj_ref = refs[idx]                                      # (T*Bp, Gp)

    inp_seq = x_ref[...]                                      # (T*Bp, Dp) layer-0 input
    h = jnp.zeros((Bp, Hp), jnp.float32)

    for l in range(num_layers):
        w_ih_ref, w_hh_ref, b_ih_ref, b_hn_ref = layer_refs[l]

        # ---- Bulk input projection for ALL timesteps (outside the recurrence),
        # with the i-side bias AND the folded r/z h-side biases added once.
        proj_ref[...] = (
            jnp.dot(inp_seq, w_ih_ref[...], preferred_element_type=jnp.float32)
            + b_ih_ref[...])

        # Hoist weight load + n-slot bias broadcast out of the unrolled loop
        # (JAX does not CSE broadcast_in_dim).
        w_hh = w_hh_ref[...]                                  # (Hp, Gp)
        b_hn = jnp.broadcast_to(b_hn_ref[...], (Bp, Hp))      # n-slot bias only
        write_seq = l < num_layers - 1                        # static

        # ---- Serial recurrence: only h @ W_hh + gate math on the critical path.
        h = jnp.zeros((Bp, Hp), jnp.float32)                  # h0 = zeros
        h_seq = []
        for t in range(T):
            gi = proj_ref[pl.ds(t * Bp, Bp), :]               # (Bp, Gp), full-tile load
            gh = jnp.dot(h, w_hh, preferred_element_type=jnp.float32)
            # One fused sigmoid over the contiguous [r|z] lanes (vreg-aligned).
            rz = jax.nn.sigmoid(gi[:, 0:2 * Hp] + gh[:, 0:2 * Hp])
            r = rz[:, 0:Hp]
            z = rz[:, Hp:2 * Hp]
            # n = tanh(W_in x + b_in + r * (W_hn h + b_hn)); b_in lives in gi,
            # b_hn must stay inside the r-scaling -> added here, n slot only.
            n = jnp.tanh(gi[:, 2 * Hp:3 * Hp] + r * (gh[:, 2 * Hp:3 * Hp] + b_hn))
            h = (1.0 - z) * n + z * h
            if write_seq:
                h_seq.append(h)
        if write_seq:
            # Hidden sequence stays vreg-resident; feeds next layer's bulk matmul.
            inp_seq = jnp.concatenate(h_seq, axis=0)          # (T*Bp, Hp)

    # last_output = gru_out[:, -1, :] == final hidden state of the top layer.
    hid = jnp.maximum(
        jnp.dot(h, w1_ref[...], preferred_element_type=jnp.float32) + b1_ref[...],
        0.0)                                                  # relu(fc1), lane-padded
    # TODO(synk): nn.Dropout is identity in inference mode; no RNG masking applied.
    out = jnp.dot(hid, w2_ref[...], preferred_element_type=jnp.float32) + b2_ref[...]
    out_ref[...] = out.astype(out_ref.dtype)


def _pack_params(params, input_size):
    """Pack PyTorch-layout GRU/fc params into gate-per-128-lane padded layouts."""
    H = params["hidden_size"]
    L = params["num_layers"]
    Hp = _round_up(H, 128)
    Gp = 3 * Hp
    out_size = params["w_fc2"].shape[1]
    f32 = jnp.float32

    packed = {"Hp": Hp, "Gp": Gp, "layers": []}
    for l in range(L):
        in_dim = input_size if l == 0 else H
        in_p = _round_up(in_dim, 128)
        w_ih = params["w_ih"][l]      # (3, in_dim, H), gate order [r, z, n]
        w_hh = params["w_hh"][l]      # (3, H, H)
        b_ih = params["b_ih"][l]      # (3, 1, H)
        b_hh = params["b_hh"][l]      # (3, 1, H)

        w_ih_f = jnp.zeros((in_p, Gp), f32)
        w_hh_f = jnp.zeros((Hp, Gp), f32)
        for g in range(3):
            s = g * Hp
            w_ih_f = w_ih_f.at[0:in_dim, s:s + H].set(w_ih[g])
            w_hh_f = w_hh_f.at[0:H, s:s + H].set(w_hh[g])
        # Fold r/z h-side biases into the bulk-projection bias (legal for GRU);
        # keep b_in in the n slot.  b_hn must NOT be folded (stays inside r*()).
        b_ih_f = jnp.zeros((1, Gp), f32)
        b_ih_f = b_ih_f.at[:, 0:H].set(b_ih[0] + b_hh[0])
        b_ih_f = b_ih_f.at[:, Hp:Hp + H].set(b_ih[1] + b_hh[1])
        b_ih_f = b_ih_f.at[:, 2 * Hp:2 * Hp + H].set(b_ih[2])
        b_hn_f = jnp.zeros((1, Hp), f32).at[:, 0:H].set(b_hh[2])
        packed["layers"].append((w_ih_f, w_hh_f, b_ih_f, b_hn_f))

    F1 = H // 2
    F1p = _round_up(F1, 128)
    Op = _round_up(out_size, 128)
    packed["w_fc1"] = jnp.zeros((Hp, F1p), f32).at[0:H, 0:F1].set(params["w_fc1"])
    packed["b_fc1"] = jnp.zeros((1, F1p), f32).at[:, 0:F1].set(params["b_fc1"])
    packed["w_fc2"] = jnp.zeros((F1p, Op), f32).at[0:F1, 0:out_size].set(params["w_fc2"])
    packed["b_fc2"] = jnp.zeros((1, Op), f32).at[:, 0:out_size].set(params["b_fc2"])
    packed["Op"] = Op
    return packed


def gru_forecaster_forward(x, params):
    """x: (B, T, input_size) float32, batch-first like the PyTorch module."""
    B, T, D = x.shape
    out_size = params["w_fc2"].shape[1]
    L = params["num_layers"]

    packed = _pack_params(params, D)
    Hp, Gp, Op = packed["Hp"], packed["Gp"], packed["Op"]
    Bp = _round_up(B, 8)          # 8-sublane tile
    Dp = _round_up(D, 128)        # lane-pad the feature dim

    # Time-major, zero-padded to (T*Bp, Dp): row index = t*Bp + b.  Padded rows
    # stay finite and are sliced away at the end; padded lanes never leak
    # (matching weight rows/cols are zero).
    x_tm = jnp.transpose(x, (1, 0, 2)).astype(jnp.float32)            # (T, B, D)
    x_flat = jnp.zeros((T, Bp, Dp), jnp.float32).at[:, 0:B, 0:D].set(x_tm)
    x_flat = x_flat.reshape(T * Bp, Dp)

    inputs = [x_flat]
    for l in range(L):
        inputs += list(packed["layers"][l])
    inputs += [packed["w_fc1"], packed["b_fc1"], packed["w_fc2"], packed["b_fc2"]]

    kernel = functools.partial(_gru_forecaster_kernel, L, T, Bp, Hp)

    out_padded = pl.pallas_call(
        kernel,
        out_shape=jax.ShapeDtypeStruct((Bp, Op), jnp.float32),
        in_specs=[pl.BlockSpec(memory_space=pltpu.MemorySpace.VMEM)] * len(inputs),
        out_specs=pl.BlockSpec(memory_space=pltpu.MemorySpace.VMEM),
        scratch_shapes=[
            # Bulk gate projections for all timesteps of the current layer.
            # NOTE(v7x): scales as T*Bp*Gp*4 bytes; chunk over T (emit_pipeline
            # or a T grid axis) before this approaches v7x's 64 MiB VMEM at
            # production shapes.  ~96 KiB here.
            pltpu.VMEM((T * Bp, Gp), jnp.float32),
        ],
    )(*inputs)
    return out_padded[:B, :out_size]


def init_params(key, input_size, hidden_size, num_layers, output_size):
    """Deterministic PyTorch-style init: uniform(-1/sqrt(H), 1/sqrt(H))."""
    k = 1.0 / math.sqrt(hidden_size)
    params = {"hidden_size": hidden_size, "num_layers": num_layers,
              "w_ih": [], "w_hh": [], "b_ih": [], "b_hh": []}
    for l in range(num_layers):
        in_dim = input_size if l == 0 else hidden_size
        key, k1, k2, k3, k4 = jax.random.split(key, 5)
        params["w_ih"].append(jax.random.uniform(k1, (3, in_dim, hidden_size), jnp.float32, -k, k))
        params["w_hh"].append(jax.random.uniform(k2, (3, hidden_size, hidden_size), jnp.float32, -k, k))
        params["b_ih"].append(jax.random.uniform(k3, (3, 1, hidden_size), jnp.float32, -k, k))
        params["b_hh"].append(jax.random.uniform(k4, (3, 1, hidden_size), jnp.float32, -k, k))
    half = hidden_size // 2
    key, k1, k2, k3, k4 = jax.random.split(key, 5)
    kf1 = 1.0 / math.sqrt(hidden_size)
    kf2 = 1.0 / math.sqrt(half)
    params["w_fc1"] = jax.random.uniform(k1, (hidden_size, half), jnp.float32, -kf1, kf1)
    params["b_fc1"] = jax.random.uniform(k2, (1, half), jnp.float32, -kf1, kf1)
    params["w_fc2"] = jax.random.uniform(k3, (half, output_size), jnp.float32, -kf2, kf2)
    params["b_fc2"] = jax.random.uniform(k4, (1, output_size), jnp.float32, -kf2, kf2)
    return params


def reference_forward(x, params):
    """Pure-JAX reference replicating torch.nn.GRU + fc head semantics."""
    B, T, D = x.shape
    H = params["hidden_size"]
    L = params["num_layers"]
    hs = [jnp.zeros((B, H), jnp.float32) for _ in range(L)]
    for t in range(T):
        inp = x[:, t, :]
        for l in range(L):
            w_ih, w_hh = params["w_ih"][l], params["w_hh"][l]
            b_ih, b_hh = params["b_ih"][l], params["b_hh"][l]
            h_prev = hs[l]
            r = jax.nn.sigmoid(inp @ w_ih[0] + b_ih[0] + h_prev @ w_hh[0] + b_hh[0])
            z = jax.nn.sigmoid(inp @ w_ih[1] + b_ih[1] + h_prev @ w_hh[1] + b_hh[1])
            n = jnp.tanh(inp @ w_ih[2] + b_ih[2] + r * (h_prev @ w_hh[2] + b_hh[2]))
            hs[l] = (1.0 - z) * n + z * h_prev
            inp = hs[l]
    last = hs[-1]
    hid = jnp.maximum(last @ params["w_fc1"] + params["b_fc1"], 0.0)
    return hid @ params["w_fc2"] + params["b_fc2"]


if __name__ == "__main__":
    # Small shapes consistent with the module: batch=2, seq=8, features=4,
    # hidden=32, num_layers=2, output=1.
    B, T, INPUT, HIDDEN, LAYERS, OUTPUT = 2, 8, 4, 32, 2, 1

    key = jax.random.PRNGKey(0)
    key, xkey, pkey = jax.random.split(key, 3)
    x = jax.random.normal(xkey, (B, T, INPUT), jnp.float32)
    params = init_params(pkey, INPUT, HIDDEN, LAYERS, OUTPUT)

    out = gru_forecaster_forward(x, params)
    out = jax.block_until_ready(out)

    ref = reference_forward(x, params)
    assert out.shape == (B, OUTPUT)
    assert jnp.allclose(out, ref, atol=1e-5, rtol=1e-5), (out, ref)

    print("KERNEL_OK")
</pallas_src>

<mosaic_0001>
module attributes {stable_mosaic.version = 11 : i64} {
  func.func @_gru_forecaster_kernel(%arg0: memref<64x128xf32, #tpu.memory_space<vmem>>, %arg1: memref<128x384xf32, #tpu.memory_space<vmem>>, %arg2: memref<128x384xf32, #tpu.memory_space<vmem>>, %arg3: memref<1x384xf32, #tpu.memory_space<vmem>>, %arg4: memref<1x128xf32, #tpu.memory_space<vmem>>, %arg5: memref<128x384xf32, #tpu.memory_space<vmem>>, %arg6: memref<128x384xf32, #tpu.memory_space<vmem>>, %arg7: memref<1x384xf32, #tpu.memory_space<vmem>>, %arg8: memref<1x128xf32, #tpu.memory_space<vmem>>, %arg9: memref<128x128xf32, #tpu.memory_space<vmem>>, %arg10: memref<1x128xf32, #tpu.memory_space<vmem>>, %arg11: memref<128x128xf32, #tpu.memory_space<vmem>>, %arg12: memref<1x128xf32, #tpu.memory_space<vmem>>, %arg13: memref<8x128xf32, #tpu.memory_space<vmem>>, %arg14: memref<64x384xf32, #tpu.memory_space<vmem>>) attributes {dimension_semantics = [], scalar_prefetch = 0 : i64, scratch_operands = 1 : i64, tpu.core_type = #tpu.core_type<tc>} {
    %c0 = arith.constant 0 : index
    %c0_0 = arith.constant 0 : index
    %0 = vector.load %arg0[%c0, %c0_0] : memref<64x128xf32, #tpu.memory_space<vmem>>, vector<64x128xf32>
    %c0_1 = arith.constant 0 : index
    %c0_2 = arith.constant 0 : index
    %1 = vector.load %arg1[%c0_1, %c0_2] : memref<128x384xf32, #tpu.memory_space<vmem>>, vector<128x384xf32>
    %cst = arith.constant dense<0.000000e+00> : vector<64x384xf32>
    %2 = tpu.matmul %0, %1, %cst {dimension_numbers = #tpu.dot_dimension_numbers<[1], [0], [0], [1], [0, 0, 1, 1], [], []>} : vector<64x128xf32>, vector<128x384xf32>, vector<64x384xf32> -> vector<64x384xf32>
    %c0_3 = arith.constant 0 : index
    %c0_4 = arith.constant 0 : index
    %3 = vector.load %arg3[%c0_3, %c0_4] : memref<1x384xf32, #tpu.memory_space<vmem>>, vector<1x384xf32>
    %4 = vector.broadcast %3 : vector<1x384xf32> to vector<64x384xf32>
    %5 = arith.addf %2, %4 : vector<64x384xf32>
    %c0_5 = arith.constant 0 : index
    %c0_6 = arith.constant 0 : index
    %6 = vector.load %arg14[%c0_5, %c0_6] : memref<64x384xf32, #tpu.memory_space<vmem>>, vector<64x384xf32>
    tpu.vector_store %arg14[%c0_5, %c0_6], %5 {strides = array<i32>} : memref<64x384xf32, #tpu.memory_space<vmem>>, vector<64x384xf32>,
    %c0_7 = arith.constant 0 : index
    %c0_8 = arith.constant 0 : index
    %7 = vector.load %arg2[%c0_7, %c0_8] : memref<128x384xf32, #tpu.memory_space<vmem>>, vector<128x384xf32>
    %c0_9 = arith.constant 0 : index
    %c0_10 = arith.constant 0 : index
    %8 = vector.load %arg4[%c0_9, %c0_10] : memref<1x128xf32, #tpu.memory_space<vmem>>, vector<1x128xf32>
    %9 = vector.shape_cast %8 : vector<1x128xf32> to vector<1x128xf32>
    %10 = vector.broadcast %9 : vector<1x128xf32> to vector<8x128xf32>
    %cst_11 = arith.constant 0.000000e+00 : f32
    %11 = vector.broadcast %cst_11 : f32 to vector<8x128xf32>
    %c0_12 = arith.constant 0 : index
    %c0_13 = arith.constant 0 : index
    %12 = vector.load %arg14[%c0_12, %c0_13] : memref<64x384xf32, #tpu.memory_space<vmem>>, vector<8x384xf32>
    %cst_14 = arith.constant dense<0.000000e+00> : vector<8x384xf32>
    %13 = tpu.matmul %11, %7, %cst_14 {dimension_numbers = #tpu.dot_dimension_numbers<[1], [0], [0], [1], [0, 0, 1, 1], [], []>} : vector<8x128xf32>, vector<128x384xf32>, vector<8x384xf32> -> vector<8x384xf32>
    %14 = vector.extract_strided_slice %12 {offsets = [0, 0], sizes = [8, 256], strides = [1, 1]} : vector<8x384xf32> to vector<8x256xf32>
    %15 = vector.extract_strided_slice %13 {offsets = [0, 0], sizes = [8, 256], strides = [1, 1]} : vector<8x384xf32> to vector<8x256xf32>
    %16 = arith.addf %14, %15 : vector<8x256xf32>
    %17 = arith.negf %16 : vector<8x256xf32>
    %18 = math.exp %17 : vector<8x256xf32>
    %cst_15 = arith.constant 1.000000e+00 : f32
    %19 = vector.broadcast %cst_15 : f32 to vector<8x256xf32>
    %20 = arith.addf %19, %18 : vector<8x256xf32>
    %21 = arith.divf %19, %20 : vector<8x256xf32>
    %22 = vector.extract_strided_slice %21 {offsets = [0, 0], sizes = [8, 128], strides = [1, 1]} : vector<8x256xf32> to vector<8x128xf32>
    %23 = vector.extract_strided_slice %21 {offsets = [0, 128], sizes = [8, 128], strides = [1, 1]} : vector<8x256xf32> to vector<8x128xf32>
    %24 = vector.extract_strided_slice %12 {offsets = [0, 256], sizes = [8, 128], strides = [1, 1]} : vector<8x384xf32> to vector<8x128xf32>
    %25 = vector.extract_strided_slice %13 {offsets = [0, 256], sizes = [8, 128], strides = [1, 1]} : vector<8x384xf32> to vector<8x128xf32>
    %26 = arith.addf %25, %10 : vector<8x128xf32>
    %27 = arith.mulf %22, %26 : vector<8x128xf32>
    %28 = arith.addf %24, %27 : vector<8x128xf32>
    %29 = math.tanh %28 : vector<8x128xf32>
    %cst_16 = arith.constant 1.000000e+00 : f32
    %30 = vector.broadcast %cst_16 : f32 to vector<8x128xf32>
    %31 = arith.subf %30, %23 : vector<8x128xf32>
    %32 = arith.mulf %31, %29 : vector<8x128xf32>
    %33 = arith.mulf %23, %11 : vector<8x128xf32>
    %34 = arith.addf %32, %33 : vector<8x128xf32>
    %c8 = arith.constant 8 : index
    %c0_17 = arith.constant 0 : index
    %35 = vector.load %arg14[%c8, %c0_17] : memref<64x384xf32, #tpu.memory_space<vmem>>, vector<8x384xf32>
    %cst_18 = arith.constant dense<0.000000e+00> : vector<8x384xf32>
    %36 = tpu.matmul %34, %7, %cst_18 {dimension_numbers = #tpu.dot_dimension_numbers<[1], [0], [0], [1], [0, 0, 1, 1], [], []>} : vector<8x128xf32>, vector<128x384xf32>, vector<8x384xf32> -> vector<8x384xf32>
    %37 = vector.extract_strided_slice %35 {offsets = [0, 0], sizes = [8, 256], strides = [1, 1]} : vector<8x384xf32> to vector<8x256xf32>
    %38 = vector.extract_strided_slice %36 {offsets = [0, 0], sizes = [8, 256], strides = [1, 1]} : vector<8x384xf32> to vector<8x256xf32>
    %39 = arith.addf %37, %38 : vector<8x256xf32>
    %40 = arith.negf %39 : vector<8x256xf32>
    %41 = math.exp %40 : vector<8x256xf32>
    %cst_19 = arith.constant 1.000000e+00 : f32
    %42 = vector.broadcast %cst_19 : f32 to vector<8x256xf32>
    %43 = arith.addf %42, %41 : vector<8x256xf32>
    %44 = arith.divf %42, %43 : vector<8x256xf32>
    %45 = vector.extract_strided_slice %44 {offsets = [0, 0], sizes = [8, 128], strides = [1, 1]} : vector<8x256xf32> to vector<8x128xf32>
    %46 = vector.extract_strided_slice %44 {offsets = [0, 128], sizes = [8, 128], strides = [1, 1]} : vector<8x256xf32> to vector<8x128xf32>
    %47 = vector.extract_strided_slice %35 {offsets = [0, 256], sizes = [8, 128], strides = [1, 1]} : vector<8x384xf32> to vector<8x128xf32>
    %48 = vector.extract_strided_slice %36 {offsets = [0, 256], sizes = [8, 128], strides = [1, 1]} : vector<8x384xf32> to vector<8x128xf32>
    %49 = arith.addf %48, %10 : vector<8x128xf32>
    %50 = arith.mulf %45, %49 : vector<8x128xf32>
    %51 = arith.addf %47, %50 : vector<8x128xf32>
    %52 = math.tanh %51 : vector<8x128xf32>
    %cst_20 = arith.constant 1.000000e+00 : f32
    %53 = vector.broadcast %cst_20 : f32 to vector<8x128xf32>
    %54 = arith.subf %53, %46 : vector<8x128xf32>
    %55 = arith.mulf %54, %52 : vector<8x128xf32>
    %56 = arith.mulf %46, %34 : vector<8x128xf32>
    %57 = arith.addf %55, %56 : vector<8x128xf32>
    %c16 = arith.constant 16 : index
    %c0_21 = arith.constant 0 : index
    %58 = vector.load %arg14[%c16, %c0_21] : memref<64x384xf32, #tpu.memory_space<vmem>>, vector<8x384xf32>
    %cst_22 = arith.constant dense<0.000000e+00> : vector<8x384xf32>
    %59 = tpu.matmul %57, %7, %cst_22 {dimension_numbers = #tpu.dot_dimension_numbers<[1], [0], [0], [1], [0, 0, 1, 1], [], []>} : vector<8x128xf32>, vector<128x384xf32>, vector<8x384xf32> -> vector<8x384xf32>
    %60 = vector.extract_strided_slice %58 {offsets = [0, 0], sizes = [8, 256], strides = [1, 1]} : vector<8x384xf32> to vector<8x256xf32>
    %61 = vector.extract_strided_slice %59 {offsets = [0, 0], sizes = [8, 256], strides = [1, 1]} : vector<8x384xf32> to vector<8x256xf32>
    %62 = arith.addf %60, %61 : vector<8x256xf32>
    %63 = arith.negf %62 : vector<8x256xf32>
    %64 = math.exp %63 : vector<8x256xf32>
    %cst_23 = arith.constant 1.000000e+00 : f32
    %65 = vector.broadcast %cst_23 : f32 to vector<8x256xf32>
    %66 = arith.addf %65, %64 : vector<8x256xf32>
    %67 = arith.divf %65, %66 : vector<8x256xf32>
    %68 = vector.extract_strided_slice %67 {offsets = [0, 0], sizes = [8, 128], strides = [1, 1]} : vector<8x256xf32> to vector<8x128xf32>
    %69 = vector.extract_strided_slice %67 {offsets = [0, 128], sizes = [8, 128], strides = [1, 1]} : vector<8x256xf32> to vector<8x128xf32>
    %70 = vector.extract_strided_slice %58 {offsets = [0, 256], sizes = [8, 128], strides = [1, 1]} : vector<8x384xf32> to vector<8x128xf32>
    %71 = vector.extract_strided_slice %59 {offsets = [0, 256], sizes = [8, 128], strides = [1, 1]} : vector<8x384xf32> to vector<8x128xf32>
    %72 = arith.addf %71, %10 : vector<8x128xf32>
    %73 = arith.mulf %68, %72 : vector<8x128xf32>
    %74 = arith.addf %70, %73 : vector<8x128xf32>
    %75 = math.tanh %74 : vector<8x128xf32>
    %cst_24 = arith.constant 1.000000e+00 : f32
    %76 = vector.broadcast %cst_24 : f32 to vector<8x128xf32>
    %77 = arith.subf %76, %69 : vector<8x128xf32>
    %78 = arith.mulf %77, %75 : vector<8x128xf32>
    %79 = arith.mulf %69, %57 : vector<8x128xf32>
    %80 = arith.addf %78, %79 : vector<8x128xf32>
    %c24 = arith.constant 24 : index
    %c0_25 = arith.constant 0 : index
    %81 = vector.load %arg14[%c24, %c0_25] : memref<64x384xf32, #tpu.memory_space<vmem>>, vector<8x384xf32>
    %cst_26 = arith.constant dense<0.000000e+00> : vector<8x384xf32>
    %82 = tpu.matmul %80, %7, %cst_26 {dimension_numbers = #tpu.dot_dimension_numbers<[1], [0], [0], [1], [0, 0, 1, 1], [], []>} : vector<8x128xf32>, vector<128x384xf32>, vector<8x384xf32> -> vector<8x384xf32>
    %83 = vector.extract_strided_slice %81 {offsets = [0, 0], sizes = [8, 256], strides = [1, 1]} : vector<8x384xf32> to vector<8x256xf32>
    %84 = vector.extract_strided_slice %82 {offsets = [0, 0], sizes = [8, 256], strides = [1, 1]} : vector<8x384xf32> to vector<8x256xf32>
    %85 = arith.addf %83, %84 : vector<8x256xf32>
    %86 = arith.negf %85 : vector<8x256xf32>
    %87 = math.exp %86 : vector<8x256xf32>
    %cst_27 = arith.constant 1.000000e+00 : f32
    %88 = vector.broadcast %cst_27 : f32 to vector<8x256xf32>
    %89 = arith.addf %88, %87 : vector<8x256xf32>
    %90 = arith.divf %88, %89 : vector<8x256xf32>
    %91 = vector.extract_strided_slice %90 {offsets = [0, 0], sizes = [8, 128], strides = [1, 1]} : vector<8x256xf32> to vector<8x128xf32>
    %92 = vector.extract_strided_slice %90 {offsets = [0, 128], sizes = [8, 128], strides = [1, 1]} : vector<8x256xf32> to vector<8x128xf32>
    %93 = vector.extract_strided_slice %81 {offsets = [0, 256], sizes = [8, 128], strides = [1, 1]} : vector<8x384xf32> to vector<8x128xf32>
    %94 = vector.extract_strided_slice %82 {offsets = [0, 256], sizes = [8, 128], strides = [1, 1]} : vector<8x384xf32> to vector<8x128xf32>
    %95 = arith.addf %94, %10 : vector<8x128xf32>
    %96 = arith.mulf %91, %95 : vector<8x128xf32>
    %97 = arith.addf %93, %96 : vector<8x128xf32>
    %98 = math.tanh %97 : vector<8x128xf32>
    %cst_28 = arith.constant 1.000000e+00 : f32
    %99 = vector.broadcast %cst_28 : f32 to vector<8x128xf32>
    %100 = arith.subf %99, %92 : vector<8x128xf32>
    %101 = arith.mulf %100, %98 : vector<8x128xf32>
    %102 = arith.mulf %92, %80 : vector<8x128xf32>
    %103 = arith.addf %101, %102 : vector<8x128xf32>
    %c32 = arith.constant 32 : index
    %c0_29 = arith.constant 0 : index
    %104 = vector.load %arg14[%c32, %c0_29] : memref<64x384xf32, #tpu.memory_space<vmem>>, vector<8x384xf32>
    %cst_30 = arith.constant dense<0.000000e+00> : vector<8x384xf32>
    %105 = tpu.matmul %103, %7, %cst_30 {dimension_numbers = #tpu.dot_dimension_numbers<[1], [0], [0], [1], [0, 0, 1, 1], [], []>} : vector<8x128xf32>, vector<128x384xf32>, vector<8x384xf32> -> vector<8x384xf32>
    %106 = vector.extract_strided_slice %104 {offsets = [0, 0], sizes = [8, 256], strides = [1, 1]} : vector<8x384xf32> to vector<8x256xf32>
    %107 = vector.extract_strided_slice %105 {offsets = [0, 0], sizes = [8, 256], strides = [1, 1]} : vector<8x384xf32> to vector<8x256xf32>
    %108 = arith.addf %106, %107 : vector<8x256xf32>
    %109 = arith.negf %108 : vector<8x256xf32>
    %110 = math.exp %109 : vector<8x256xf32>
    %cst_31 = arith.constant 1.000000e+00 : f32
    %111 = vector.broadcast %cst_31 : f32 to vector<8x256xf32>
    %112 = arith.addf %111, %110 : vector<8x256xf32>
    %113 = arith.divf %111, %112 : vector<8x256xf32>
    %114 = vector.extract_strided_slice %113 {offsets = [0, 0], sizes = [8, 128], strides = [1, 1]} : vector<8x256xf32> to vector<8x128xf32>
    %115 = vector.extract_strided_slice %113 {offsets = [0, 128], sizes = [8, 128], strides = [1, 1]} : vector<8x256xf32> to vector<8x128xf32>
    %116 = vector.extract_strided_slice %104 {offsets = [0, 256], sizes = [8, 128], strides = [1, 1]} : vector<8x384xf32> to vector<8x128xf32>
    %117 = vector.extract_strided_slice %105 {offsets = [0, 256], sizes = [8, 128], strides = [1, 1]} : vector<8x384xf32> to vector<8x128xf32>
    %118 = arith.addf %117, %10 : vector<8x128xf32>
    %119 = arith.mulf %114, %118 : vector<8x128xf32>
    %120 = arith.addf %116, %119 : vector<8x128xf32>
    %121 = math.tanh %120 : vector<8x128xf32>
    %cst_32 = arith.constant 1.000000e+00 : f32
    %122 = vector.broadcast %cst_32 : f32 to vector<8x128xf32>
    %123 = arith.subf %122, %115 : vector<8x128xf32>
    %124 = arith.mulf %123, %121 : vector<8x128xf32>
    %125 = arith.mulf %115, %103 : vector<8x128xf32>
    %126 = arith.addf %124, %125 : vector<8x128xf32>
    %c40 = arith.constant 40 : index
    %c0_33 = arith.constant 0 : index
    %127 = vector.load %arg14[%c40, %c0_33] : memref<64x384xf32, #tpu.memory_space<vmem>>, vector<8x384xf32>
    %cst_34 = arith.constant dense<0.000000e+00> : vector<8x384xf32>
    %128 = tpu.matmul %126, %7, %cst_34 {dimension_numbers = #tpu.dot_dimension_numbers<[1], [0], [0], [1], [0, 0, 1, 1], [], []>} : vector<8x128xf32>, vector<128x384xf32>, vector<8x384xf32> -> vector<8x384xf32>
    %129 = vector.extract_strided_slice %127 {offsets = [0, 0], sizes = [8, 256], strides = [1, 1]} : vector<8x384xf32> to vector<8x256xf32>
    %130 = vector.extract_strided_slice %128 {offsets = [0, 0], sizes = [8, 256], strides = [1, 1]} : vector<8x384xf32> to vector<8x256xf32>
    %131 = arith.addf %129, %130 : vector<8x256xf32>
    %132 = arith.negf %131 : vector<8x256xf32>
    %133 = math.exp %132 : vector<8x256xf32>
    %cst_35 = arith.constant 1.000000e+00 : f32
    %134 = vector.broadcast %cst_35 : f32 to vector<8x256xf32>
    %135 = arith.addf %134, %133 : vector<8x256xf32>
    %136 = arith.divf %134, %135 : vector<8x256xf32>
    %137 = vector.extract_strided_slice %136 {offsets = [0, 0], sizes = [8, 128], strides = [1, 1]} : vector<8x256xf32> to vector<8x128xf32>
    %138 = vector.extract_strided_slice %136 {offsets = [0, 128], sizes = [8, 128], strides = [1, 1]} : vector<8x256xf32> to vector<8x128xf32>
    %139 = vector.extract_strided_slice %127 {offsets = [0, 256], sizes = [8, 128], strides = [1, 1]} : vector<8x384xf32> to vector<8x128xf32>
    %140 = vector.extract_strided_slice %128 {offsets = [0, 256], sizes = [8, 128], strides = [1, 1]} : vector<8x384xf32> to vector<8x128xf32>
    %141 = arith.addf %140, %10 : vector<8x128xf32>
    %142 = arith.mulf %137, %141 : vector<8x128xf32>
    %143 = arith.addf %139, %142 : vector<8x128xf32>
    %144 = math.tanh %143 : vector<8x128xf32>
    %cst_36 = arith.constant 1.000000e+00 : f32
    %145 = vector.broadcast %cst_36 : f32 to vector<8x128xf32>
    %146 = arith.subf %145, %138 : vector<8x128xf32>
    %147 = arith.mulf %146, %144 : vector<8x128xf32>
    %148 = arith.mulf %138, %126 : vector<8x128xf32>
    %149 = arith.addf %147, %148 : vector<8x128xf32>
    %c48 = arith.constant 48 : index
    %c0_37 = arith.constant 0 : index
    %150 = vector.load %arg14[%c48, %c0_37] : memref<64x384xf32, #tpu.memory_space<vmem>>, vector<8x384xf32>
    %cst_38 = arith.constant dense<0.000000e+00> : vector<8x384xf32>
    %151 = tpu.matmul %149, %7, %cst_38 {dimension_numbers = #tpu.dot_dimension_numbers<[1], [0], [0], [1], [0, 0, 1, 1], [], []>} : vector<8x128xf32>, vector<128x384xf32>, vector<8x384xf32> -> vector<8x384xf32>
    %152 = vector.extract_strided_slice %150 {offsets = [0, 0], sizes = [8, 256], strides = [1, 1]} : vector<8x384xf32> to vector<8x256xf32>
    %153 = vector.extract_strided_slice %151 {offsets = [0, 0], sizes = [8, 256], strides = [1, 1]} : vector<8x384xf32> to vector<8x256xf32>
    %154 = arith.addf %152, %153 : vector<8x256xf32>
    %155 = arith.negf %154 : vector<8x256xf32>
    %156 = math.exp %155 : vector<8x256xf32>
    %cst_39 = arith.constant 1.000000e+00 : f32
    %157 = vector.broadcast %cst_39 : f32 to vector<8x256xf32>
    %158 = arith.addf %157, %156 : vector<8x256xf32>
    %159 = arith.divf %157, %158 : vector<8x256xf32>
    %160 = vector.extract_strided_slice %159 {offsets = [0, 0], sizes = [8, 128], strides = [1, 1]} : vector<8x256xf32> to vector<8x128xf32>
    %161 = vector.extract_strided_slice %159 {offsets = [0, 128], sizes = [8, 128], strides = [1, 1]} : vector<8x256xf32> to vector<8x128xf32>
    %162 = vector.extract_strided_slice %150 {offsets = [0, 256], sizes = [8, 128], strides = [1, 1]} : vector<8x384xf32> to vector<8x128xf32>
    %163 = vector.extract_strided_slice %151 {offsets = [0, 256], sizes = [8, 128], strides = [1, 1]} : vector<8x384xf32> to vector<8x128xf32>
    %164 = arith.addf %163, %10 : vector<8x128xf32>
    %165 = arith.mulf %160, %164 : vector<8x128xf32>
    %166 = arith.addf %162, %165 : vector<8x128xf32>
    %167 = math.tanh %166 : vector<8x128xf32>
    %cst_40 = arith.constant 1.000000e+00 : f32
    %168 = vector.broadcast %cst_40 : f32 to vector<8x128xf32>
    %169 = arith.subf %168, %161 : vector<8x128xf32>
    %170 = arith.mulf %169, %167 : vector<8x128xf32>
    %171 = arith.mulf %161, %149 : vector<8x128xf32>
    %172 = arith.addf %170, %171 : vector<8x128xf32>
    %c56 = arith.constant 56 : index
    %c0_41 = arith.constant 0 : index
    %173 = vector.load %arg14[%c56, %c0_41] : memref<64x384xf32, #tpu.memory_space<vmem>>, vector<8x384xf32>
    %cst_42 = arith.constant dense<0.000000e+00> : vector<8x384xf32>
    %174 = tpu.matmul %172, %7, %cst_42 {dimension_numbers = #tpu.dot_dimension_numbers<[1], [0], [0], [1], [0, 0, 1, 1], [], []>} : vector<8x128xf32>, vector<128x384xf32>, vector<8x384xf32> -> vector<8x384xf32>
    %175 = vector.extract_strided_slice %173 {offsets = [0, 0], sizes = [8, 256], strides = [1, 1]} : vector<8x384xf32> to vector<8x256xf32>
    %176 = vector.extract_strided_slice %174 {offsets = [0, 0], sizes = [8, 256], strides = [1, 1]} : vector<8x384xf32> to vector<8x256xf32>
    %177 = arith.addf %175, %176 : vector<8x256xf32>
    %178 = arith.negf %177 : vector<8x256xf32>
    %179 = math.exp %178 : vector<8x256xf32>
    %cst_43 = arith.constant 1.000000e+00 : f32
    %180 = vector.broadcast %cst_43 : f32 to vector<8x256xf32>
    %181 = arith.addf %180, %179 : vector<8x256xf32>
    %182 = arith.divf %180, %181 : vector<8x256xf32>
    %183 = vector.extract_strided_slice %182 {offsets = [0, 0], sizes = [8, 128], strides = [1, 1]} : vector<8x256xf32> to vector<8x128xf32>
    %184 = vector.extract_strided_slice %182 {offsets = [0, 128], sizes = [8, 128], strides = [1, 1]} : vector<8x256xf32> to vector<8x128xf32>
    %185 = vector.extract_strided_slice %173 {offsets = [0, 256], sizes = [8, 128], strides = [1, 1]} : vector<8x384xf32> to vector<8x128xf32>
    %186 = vector.extract_strided_slice %174 {offsets = [0, 256], sizes = [8, 128], strides = [1, 1]} : vector<8x384xf32> to vector<8x128xf32>
    %187 = arith.addf %186, %10 : vector<8x128xf32>
    %188 = arith.mulf %183, %187 : vector<8x128xf32>
    %189 = arith.addf %185, %188 : vector<8x128xf32>
    %190 = math.tanh %189 : vector<8x128xf32>
    %cst_44 = arith.constant 1.000000e+00 : f32
    %191 = vector.broadcast %cst_44 : f32 to vector<8x128xf32>
    %192 = arith.subf %191, %184 : vector<8x128xf32>
    %193 = arith.mulf %192, %190 : vector<8x128xf32>
    %194 = arith.mulf %184, %172 : vector<8x128xf32>
    %195 = arith.addf %193, %194 : vector<8x128xf32>
    %196 = tpu.concatenate %34, %57, %80, %103, %126, %149, %172, %195 in 0 : vector<8x128xf32>, vector<8x128xf32>, vector<8x128xf32>, vector<8x128xf32>, vector<8x128xf32>, vector<8x128xf32>, vector<8x128xf32>, vector<8x128xf32> -> vector<64x128xf32>
    %c0_45 = arith.constant 0 : index
    %c0_46 = arith.constant 0 : index
    %197 = vector.load %arg5[%c0_45, %c0_46] : memref<128x384xf32, #tpu.memory_space<vmem>>, vector<128x384xf32>
    %cst_47 = arith.constant dense<0.000000e+00> : vector<64x384xf32>
    %198 = tpu.matmul %196, %197, %cst_47 {dimension_numbers = #tpu.dot_dimension_numbers<[1], [0], [0], [1], [0, 0, 1, 1], [], []>} : vector<64x128xf32>, vector<128x384xf32>, vector<64x384xf32> -> vector<64x384xf32>
    %c0_48 = arith.constant 0 : index
    %c0_49 = arith.constant 0 : index
    %199 = vector.load %arg7[%c0_48, %c0_49] : memref<1x384xf32, #tpu.memory_space<vmem>>, vector<1x384xf32>
    %200 = vector.broadcast %199 : vector<1x384xf32> to vector<64x384xf32>
    %201 = arith.addf %198, %200 : vector<64x384xf32>
    %c0_50 = arith.constant 0 : index
    %c0_51 = arith.constant 0 : index
    %202 = vector.load %arg14[%c0_50, %c0_51] : memref<64x384xf32, #tpu.memory_space<vmem>>, vector<64x384xf32>
    tpu.vector_store %arg14[%c0_50, %c0_51], %201 {strides = array<i32>} : memref<64x384xf32, #tpu.memory_space<vmem>>, vector<64x384xf32>,
    %c0_52 = arith.constant 0 : index
    %c0_53 = arith.constant 0 : index
    %203 = vector.load %arg6[%c0_52, %c0_53] : memref<128x384xf32, #tpu.memory_space<vmem>>, vector<128x384xf32>
    %c0_54 = arith.constant 0 : index
    %c0_55 = arith.constant 0 : index
    %204 = vector.load %arg8[%c0_54, %c0_55] : memref<1x128xf32, #tpu.memory_space<vmem>>, vector<1x128xf32>
    %205 = vector.shape_cast %204 : vector<1x128xf32> to vector<1x128xf32>
    %206 = vector.broadcast %205 : vector<1x128xf32> to vector<8x128xf32>
    %cst_56 = arith.constant 0.000000e+00 : f32
    %207 = vector.broadcast %cst_56 : f32 to vector<8x128xf32>
    %c0_57 = arith.constant 0 : index
    %c0_58 = arith.constant 0 : index
    %208 = vector.load %arg14[%c0_57, %c0_58] : memref<64x384xf32, #tpu.memory_space<vmem>>, vector<8x384xf32>
    %cst_59 = arith.constant dense<0.000000e+00> : vector<8x384xf32>
    %209 = tpu.matmul %207, %203, %cst_59 {dimension_numbers = #tpu.dot_dimension_numbers<[1], [0], [0], [1], [0, 0, 1, 1], [], []>} : vector<8x128xf32>, vector<128x384xf32>, vector<8x384xf32> -> vector<8x384xf32>
    %210 = vector.extract_strided_slice %208 {offsets = [0, 0], sizes = [8, 256], strides = [1, 1]} : vector<8x384xf32> to vector<8x256xf32>
    %211 = vector.extract_strided_slice %209 {offsets = [0, 0], sizes = [8, 256], strides = [1, 1]} : vector<8x384xf32> to vector<8x256xf32>
    %212 = arith.addf %210, %211 : vector<8x256xf32>
    %213 = arith.negf %212 : vector<8x256xf32>
    %214 = math.exp %213 : vector<8x256xf32>
    %cst_60 = arith.constant 1.000000e+00 : f32
    %215 = vector.broadcast %cst_60 : f32 to vector<8x256xf32>
    %216 = arith.addf %215, %214 : vector<8x256xf32>
    %217 = arith.divf %215, %216 : vector<8x256xf32>
    %218 = vector.extract_strided_slice %217 {offsets = [0, 0], sizes = [8, 128], strides = [1, 1]} : vector<8x256xf32> to vector<8x128xf32>
    %219 = vector.extract_strided_slice %217 {offsets = [0, 128], sizes = [8, 128], strides = [1, 1]} : vector<8x256xf32> to vector<8x128xf32>
    %220 = vector.extract_strided_slice %208 {offsets = [0, 256], sizes = [8, 128], strides = [1, 1]} : vector<8x384xf32> to vector<8x128xf32>
    %221 = vector.extract_strided_slice %209 {offsets = [0, 256], sizes = [8, 128], strides = [1, 1]} : vector<8x384xf32> to vector<8x128xf32>
    %222 = arith.addf %221, %206 : vector<8x128xf32>
    %223 = arith.mulf %218, %222 : vector<8x128xf32>
    %224 = arith.addf %220, %223 : vector<8x128xf32>
    %225 = math.tanh %224 : vector<8x128xf32>
    %cst_61 = arith.constant 1.000000e+00 : f32
    %226 = vector.broadcast %cst_61 : f32 to vector<8x128xf32>
    %227 = arith.subf %226, %219 : vector<8x128xf32>
    %228 = arith.mulf %227, %225 : vector<8x128xf32>
    %229 = arith.mulf %219, %207 : vector<8x128xf32>
    %230 = arith.addf %228, %229 : vector<8x128xf32>
    %c8_62 = arith.constant 8 : index
    %c0_63 = arith.constant 0 : index
    %231 = vector.load %arg14[%c8_62, %c0_63] : memref<64x384xf32, #tpu.memory_space<vmem>>, vector<8x384xf32>
    %cst_64 = arith.constant dense<0.000000e+00> : vector<8x384xf32>
    %232 = tpu.matmul %230, %203, %cst_64 {dimension_numbers = #tpu.dot_dimension_numbers<[1], [0], [0], [1], [0, 0, 1, 1], [], []>} : vector<8x128xf32>, vector<128x384xf32>, vector<8x384xf32> -> vector<8x384xf32>
    %233 = vector.extract_strided_slice %231 {offsets = [0, 0], sizes = [8, 256], strides = [1, 1]} : vector<8x384xf32> to vector<8x256xf32>
    %234 = vector.extract_strided_slice %232 {offsets = [0, 0], sizes = [8, 256], strides = [1, 1]} : vector<8x384xf32> to vector<8x256xf32>
    %235 = arith.addf %233, %234 : vector<8x256xf32>
    %236 = arith.negf %235 : vector<8x256xf32>
    %237 = math.exp %236 : vector<8x256xf32>
    %cst_65 = arith.constant 1.000000e+00 : f32
    %238 = vector.broadcast %cst_65 : f32 to vector<8x256xf32>
    %239 = arith.addf %238, %237 : vector<8x256xf32>
    %240 = arith.divf %238, %239 : vector<8x256xf32>
    %241 = vector.extract_strided_slice %240 {offsets = [0, 0], sizes = [8, 128], strides = [1, 1]} : vector<8x256xf32> to vector<8x128xf32>
    %242 = vector.extract_strided_slice %240 {offsets = [0, 128], sizes = [8, 128], strides = [1, 1]} : vector<8x256xf32> to vector<8x128xf32>
    %243 = vector.extract_strided_slice %231 {offsets = [0, 256], sizes = [8, 128], strides = [1, 1]} : vector<8x384xf32> to vector<8x128xf32>
    %244 = vector.extract_strided_slice %232 {offsets = [0, 256], sizes = [8, 128], strides = [1, 1]} : vector<8x384xf32> to vector<8x128xf32>
    %245 = arith.addf %244, %206 : vector<8x128xf32>
    %246 = arith.mulf %241, %245 : vector<8x128xf32>
    %247 = arith.addf %243, %246 : vector<8x128xf32>
    %248 = math.tanh %247 : vector<8x128xf32>
    %cst_66 = arith.constant 1.000000e+00 : f32
    %249 = vector.broadcast %cst_66 : f32 to vector<8x128xf32>
    %250 = arith.subf %249, %242 : vector<8x128xf32>
    %251 = arith.mulf %250, %248 : vector<8x128xf32>
    %252 = arith.mulf %242, %230 : vector<8x128xf32>
    %253 = arith.addf %251, %252 : vector<8x128xf32>
    %c16_67 = arith.constant 16 : index
    %c0_68 = arith.constant 0 : index
    %254 = vector.load %arg14[%c16_67, %c0_68] : memref<64x384xf32, #tpu.memory_space<vmem>>, vector<8x384xf32>
    %cst_69 = arith.constant dense<0.000000e+00> : vector<8x384xf32>
    %255 = tpu.matmul %253, %203, %cst_69 {dimension_numbers = #tpu.dot_dimension_numbers<[1], [0], [0], [1], [0, 0, 1, 1], [], []>} : vector<8x128xf32>, vector<128x384xf32>, vector<8x384xf32> -> vector<8x384xf32>
    %256 = vector.extract_strided_slice %254 {offsets = [0, 0], sizes = [8, 256], strides = [1, 1]} : vector<8x384xf32> to vector<8x256xf32>
    %257 = vector.extract_strided_slice %255 {offsets = [0, 0], sizes = [8, 256], strides = [1, 1]} : vector<8x384xf32> to vector<8x256xf32>
    %258 = arith.addf %256, %257 : vector<8x256xf32>
    %259 = arith.negf %258 : vector<8x256xf32>
    %260 = math.exp %259 : vector<8x256xf32>
    %cst_70 = arith.constant 1.000000e+00 : f32
    %261 = vector.broadcast %cst_70 : f32 to vector<8x256xf32>
    %262 = arith.addf %261, %260 : vector<8x256xf32>
    %263 = arith.divf %261, %262 : vector<8x256xf32>
    %264 = vector.extract_strided_slice %263 {offsets = [0, 0], sizes = [8, 128], strides = [1, 1]} : vector<8x256xf32> to vector<8x128xf32>
    %265 = vector.extract_strided_slice %263 {offsets = [0, 128], sizes = [8, 128], strides = [1, 1]} : vector<8x256xf32> to vector<8x128xf32>
    %266 = vector.extract_strided_slice %254 {offsets = [0, 256], sizes = [8, 128], strides = [1, 1]} : vector<8x384xf32> to vector<8x128xf32>
    %267 = vector.extract_strided_slice %255 {offsets = [0, 256], sizes = [8, 128], strides = [1, 1]} : vector<8x384xf32> to vector<8x128xf32>
    %268 = arith.addf %267, %206 : vector<8x128xf32>
    %269 = arith.mulf %264, %268 : vector<8x128xf32>
    %270 = arith.addf %266, %269 : vector<8x128xf32>
    %271 = math.tanh %270 : vector<8x128xf32>
    %cst_71 = arith.constant 1.000000e+00 : f32
    %272 = vector.broadcast %cst_71 : f32 to vector<8x128xf32>
    %273 = arith.subf %272, %265 : vector<8x128xf32>
    %274 = arith.mulf %273, %271 : vector<8x128xf32>
    %275 = arith.mulf %265, %253 : vector<8x128xf32>
    %276 = arith.addf %274, %275 : vector<8x128xf32>
    %c24_72 = arith.constant 24 : index
    %c0_73 = arith.constant 0 : index
    %277 = vector.load %arg14[%c24_72, %c0_73] : memref<64x384xf32, #tpu.memory_space<vmem>>, vector<8x384xf32>
    %cst_74 = arith.constant dense<0.000000e+00> : vector<8x384xf32>
    %278 = tpu.matmul %276, %203, %cst_74 {dimension_numbers = #tpu.dot_dimension_numbers<[1], [0], [0], [1], [0, 0, 1, 1], [], []>} : vector<8x128xf32>, vector<128x384xf32>, vector<8x384xf32> -> vector<8x384xf32>
    %279 = vector.extract_strided_slice %277 {offsets = [0, 0], sizes = [8, 256], strides = [1, 1]} : vector<8x384xf32> to vector<8x256xf32>
    %280 = vector.extract_strided_slice %278 {offsets = [0, 0], sizes = [8, 256], strides = [1, 1]} : vector<8x384xf32> to vector<8x256xf32>
    %281 = arith.addf %279, %280 : vector<8x256xf32>
    %282 = arith.negf %281 : vector<8x256xf32>
    %283 = math.exp %282 : vector<8x256xf32>
    %cst_75 = arith.constant 1.000000e+00 : f32
    %284 = vector.broadcast %cst_75 : f32 to vector<8x256xf32>
    %285 = arith.addf %284, %283 : vector<8x256xf32>
    %286 = arith.divf %284, %285 : vector<8x256xf32>
    %287 = vector.extract_strided_slice %286 {offsets = [0, 0], sizes = [8, 128], strides = [1, 1]} : vector<8x256xf32> to vector<8x128xf32>
    %288 = vector.extract_strided_slice %286 {offsets = [0, 128], sizes = [8, 128], strides = [1, 1]} : vector<8x256xf32> to vector<8x128xf32>
    %289 = vector.extract_strided_slice %277 {offsets = [0, 256], sizes = [8, 128], strides = [1, 1]} : vector<8x384xf32> to vector<8x128xf32>
    %290 = vector.extract_strided_slice %278 {offsets = [0, 256], sizes = [8, 128], strides = [1, 1]} : vector<8x384xf32> to vector<8x128xf32>
    %291 = arith.addf %290, %206 : vector<8x128xf32>
    %292 = arith.mulf %287, %291 : vector<8x128xf32>
    %293 = arith.addf %289, %292 : vector<8x128xf32>
    %294 = math.tanh %293 : vector<8x128xf32>
    %cst_76 = arith.constant 1.000000e+00 : f32
    %295 = vector.broadcast %cst_76 : f32 to vector<8x128xf32>
    %296 = arith.subf %295, %288 : vector<8x128xf32>
    %297 = arith.mulf %296, %294 : vector<8x128xf32>
    %298 = arith.mulf %288, %276 : vector<8x128xf32>
    %299 = arith.addf %297, %298 : vector<8x128xf32>
    %c32_77 = arith.constant 32 : index
    %c0_78 = arith.constant 0 : index
    %300 = vector.load %arg14[%c32_77, %c0_78] : memref<64x384xf32, #tpu.memory_space<vmem>>, vector<8x384xf32>
    %cst_79 = arith.constant dense<0.000000e+00> : vector<8x384xf32>
    %301 = tpu.matmul %299, %203, %cst_79 {dimension_numbers = #tpu.dot_dimension_numbers<[1], [0], [0], [1], [0, 0, 1, 1], [], []>} : vector<8x128xf32>, vector<128x384xf32>, vector<8x384xf32> -> vector<8x384xf32>
    %302 = vector.extract_strided_slice %300 {offsets = [0, 0], sizes = [8, 256], strides = [1, 1]} : vector<8x384xf32> to vector<8x256xf32>
    %303 = vector.extract_strided_slice %301 {offsets = [0, 0], sizes = [8, 256], strides = [1, 1]} : vector<8x384xf32> to vector<8x256xf32>
    %304 = arith.addf %302, %303 : vector<8x256xf32>
    %305 = arith.negf %304 : vector<8x256xf32>
    %306 = math.exp %305 : vector<8x256xf32>
    %cst_80 = arith.constant 1.000000e+00 : f32
    %307 = vector.broadcast %cst_80 : f32 to vector<8x256xf32>
    %308 = arith.addf %307, %306 : vector<8x256xf32>
    %309 = arith.divf %307, %308 : vector<8x256xf32>
    %310 = vector.extract_strided_slice %309 {offsets = [0, 0], sizes = [8, 128], strides = [1, 1]} : vector<8x256xf32> to vector<8x128xf32>
    %311 = vector.extract_strided_slice %309 {offsets = [0, 128], sizes = [8, 128], strides = [1, 1]} : vector<8x256xf32> to vector<8x128xf32>
    %312 = vector.extract_strided_slice %300 {offsets = [0, 256], sizes = [8, 128], strides = [1, 1]} : vector<8x384xf32> to vector<8x128xf32>
    %313 = vector.extract_strided_slice %301 {offsets = [0, 256], sizes = [8, 128], strides = [1, 1]} : vector<8x384xf32> to vector<8x128xf32>
    %314 = arith.addf %313, %206 : vector<8x128xf32>
    %315 = arith.mulf %310, %314 : vector<8x128xf32>
    %316 = arith.addf %312, %315 : vector<8x128xf32>
    %317 = math.tanh %316 : vector<8x128xf32>
    %cst_81 = arith.constant 1.000000e+00 : f32
    %318 = vector.broadcast %cst_81 : f32 to vector<8x128xf32>
    %319 = arith.subf %318, %311 : vector<8x128xf32>
    %320 = arith.mulf %319, %317 : vector<8x128xf32>
    %321 = arith.mulf %311, %299 : vector<8x128xf32>
    %322 = arith.addf %320, %321 : vector<8x128xf32>
    %c40_82 = arith.constant 40 : index
    %c0_83 = arith.constant 0 : index
    %323 = vector.load %arg14[%c40_82, %c0_83] : memref<64x384xf32, #tpu.memory_space<vmem>>, vector<8x384xf32>
    %cst_84 = arith.constant dense<0.000000e+00> : vector<8x384xf32>
    %324 = tpu.matmul %322, %203, %cst_84 {dimension_numbers = #tpu.dot_dimension_numbers<[1], [0], [0], [1], [0, 0, 1, 1], [], []>} : vector<8x128xf32>, vector<128x384xf32>, vector<8x384xf32> -> vector<8x384xf32>
    %325 = vector.extract_strided_slice %323 {offsets = [0, 0], sizes = [8, 256], strides = [1, 1]} : vector<8x384xf32> to vector<8x256xf32>
    %326 = vector.extract_strided_slice %324 {offsets = [0, 0], sizes = [8, 256], strides = [1, 1]} : vector<8x384xf32> to vector<8x256xf32>
    %327 = arith.addf %325, %326 : vector<8x256xf32>
    %328 = arith.negf %327 : vector<8x256xf32>
    %329 = math.exp %328 : vector<8x256xf32>
    %cst_85 = arith.constant 1.000000e+00 : f32
    %330 = vector.broadcast %cst_85 : f32 to vector<8x256xf32>
    %331 = arith.addf %330, %329 : vector<8x256xf32>
    %332 = arith.divf %330, %331 : vector<8x256xf32>
    %333 = vector.extract_strided_slice %332 {offsets = [0, 0], sizes = [8, 128], strides = [1, 1]} : vector<8x256xf32> to vector<8x128xf32>
    %334 = vector.extract_strided_slice %332 {offsets = [0, 128], sizes = [8, 128], strides = [1, 1]} : vector<8x256xf32> to vector<8x128xf32>
    %335 = vector.extract_strided_slice %323 {offsets = [0, 256], sizes = [8, 128], strides = [1, 1]} : vector<8x384xf32> to vector<8x128xf32>
    %336 = vector.extract_strided_slice %324 {offsets = [0, 256], sizes = [8, 128], strides = [1, 1]} : vector<8x384xf32> to vector<8x128xf32>
    %337 = arith.addf %336, %206 : vector<8x128xf32>
    %338 = arith.mulf %333, %337 : vector<8x128xf32>
    %339 = arith.addf %335, %338 : vector<8x128xf32>
    %340 = math.tanh %339 : vector<8x128xf32>
    %cst_86 = arith.constant 1.000000e+00 : f32
    %341 = vector.broadcast %cst_86 : f32 to vector<8x128xf32>
    %342 = arith.subf %341, %334 : vector<8x128xf32>
    %343 = arith.mulf %342, %340 : vector<8x128xf32>
    %344 = arith.mulf %334, %322 : vector<8x128xf32>
    %345 = arith.addf %343, %344 : vector<8x128xf32>
    %c48_87 = arith.constant 48 : index
    %c0_88 = arith.constant 0 : index
    %346 = vector.load %arg14[%c48_87, %c0_88] : memref<64x384xf32, #tpu.memory_space<vmem>>, vector<8x384xf32>
    %cst_89 = arith.constant dense<0.000000e+00> : vector<8x384xf32>
    %347 = tpu.matmul %345, %203, %cst_89 {dimension_numbers = #tpu.dot_dimension_numbers<[1], [0], [0], [1], [0, 0, 1, 1], [], []>} : vector<8x128xf32>, vector<128x384xf32>, vector<8x384xf32> -> vector<8x384xf32>
    %348 = vector.extract_strided_slice %346 {offsets = [0, 0], sizes = [8, 256], strides = [1, 1]} : vector<8x384xf32> to vector<8x256xf32>
    %349 = vector.extract_strided_slice %347 {offsets = [0, 0], sizes = [8, 256], strides = [1, 1]} : vector<8x384xf32> to vector<8x256xf32>
    %350 = arith.addf %348, %349 : vector<8x256xf32>
    %351 = arith.negf %350 : vector<8x256xf32>
    %352 = math.exp %351 : vector<8x256xf32>
    %cst_90 = arith.constant 1.000000e+00 : f32
    %353 = vector.broadcast %cst_90 : f32 to vector<8x256xf32>
    %354 = arith.addf %353, %352 : vector<8x256xf32>
    %355 = arith.divf %353, %354 : vector<8x256xf32>
    %356 = vector.extract_strided_slice %355 {offsets = [0, 0], sizes = [8, 128], strides = [1, 1]} : vector<8x256xf32> to vector<8x128xf32>
    %357 = vector.extract_strided_slice %355 {offsets = [0, 128], sizes = [8, 128], strides = [1, 1]} : vector<8x256xf32> to vector<8x128xf32>
    %358 = vector.extract_strided_slice %346 {offsets = [0, 256], sizes = [8, 128], strides = [1, 1]} : vector<8x384xf32> to vector<8x128xf32>
    %359 = vector.extract_strided_slice %347 {offsets = [0, 256], sizes = [8, 128], strides = [1, 1]} : vector<8x384xf32> to vector<8x128xf32>
    %360 = arith.addf %359, %206 : vector<8x128xf32>
    %361 = arith.mulf %356, %360 : vector<8x128xf32>
    %362 = arith.addf %358, %361 : vector<8x128xf32>
    %363 = math.tanh %362 : vector<8x128xf32>
    %cst_91 = arith.constant 1.000000e+00 : f32
    %364 = vector.broadcast %cst_91 : f32 to vector<8x128xf32>
    %365 = arith.subf %364, %357 : vector<8x128xf32>
    %366 = arith.mulf %365, %363 : vector<8x128xf32>
    %367 = arith.mulf %357, %345 : vector<8x128xf32>
    %368 = arith.addf %366, %367 : vector<8x128xf32>
    %c56_92 = arith.constant 56 : index
    %c0_93 = arith.constant 0 : index
    %369 = vector.load %arg14[%c56_92, %c0_93] : memref<64x384xf32, #tpu.memory_space<vmem>>, vector<8x384xf32>
    %cst_94 = arith.constant dense<0.000000e+00> : vector<8x384xf32>
    %370 = tpu.matmul %368, %203, %cst_94 {dimension_numbers = #tpu.dot_dimension_numbers<[1], [0], [0], [1], [0, 0, 1, 1], [], []>} : vector<8x128xf32>, vector<128x384xf32>, vector<8x384xf32> -> vector<8x384xf32>
    %371 = vector.extract_strided_slice %369 {offsets = [0, 0], sizes = [8, 256], strides = [1, 1]} : vector<8x384xf32> to vector<8x256xf32>
    %372 = vector.extract_strided_slice %370 {offsets = [0, 0], sizes = [8, 256], strides = [1, 1]} : vector<8x384xf32> to vector<8x256xf32>
    %373 = arith.addf %371, %372 : vector<8x256xf32>
    %374 = arith.negf %373 : vector<8x256xf32>
    %375 = math.exp %374 : vector<8x256xf32>
    %cst_95 = arith.constant 1.000000e+00 : f32
    %376 = vector.broadcast %cst_95 : f32 to vector<8x256xf32>
    %377 = arith.addf %376, %375 : vector<8x256xf32>
    %378 = arith.divf %376, %377 : vector<8x256xf32>
    %379 = vector.extract_strided_slice %378 {offsets = [0, 0], sizes = [8, 128], strides = [1, 1]} : vector<8x256xf32> to vector<8x128xf32>
    %380 = vector.extract_strided_slice %378 {offsets = [0, 128], sizes = [8, 128], strides = [1, 1]} : vector<8x256xf32> to vector<8x128xf32>
    %381 = vector.extract_strided_slice %369 {offsets = [0, 256], sizes = [8, 128], strides = [1, 1]} : vector<8x384xf32> to vector<8x128xf32>
    %382 = vector.extract_strided_slice %370 {offsets = [0, 256], sizes = [8, 128], strides = [1, 1]} : vector<8x384xf32> to vector<8x128xf32>
    %383 = arith.addf %382, %206 : vector<8x128xf32>
    %384 = arith.mulf %379, %383 : vector<8x128xf32>
    %385 = arith.addf %381, %384 : vector<8x128xf32>
    %386 = math.tanh %385 : vector<8x128xf32>
    %cst_96 = arith.constant 1.000000e+00 : f32
    %387 = vector.broadcast %cst_96 : f32 to vector<8x128xf32>
    %388 = arith.subf %387, %380 : vector<8x128xf32>
    %389 = arith.mulf %388, %386 : vector<8x128xf32>
    %390 = arith.mulf %380, %368 : vector<8x128xf32>
    %391 = arith.addf %389, %390 : vector<8x128xf32>
    %c0_97 = arith.constant 0 : index
    %c0_98 = arith.constant 0 : index
    %392 = vector.load %arg9[%c0_97, %c0_98] : memref<128x128xf32, #tpu.memory_space<vmem>>, vector<128x128xf32>
    %cst_99 = arith.constant dense<0.000000e+00> : vector<8x128xf32>
    %393 = tpu.matmul %391, %392, %cst_99 {dimension_numbers = #tpu.dot_dimension_numbers<[1], [0], [0], [1], [0, 0, 1, 1], [], []>} : vector<8x128xf32>, vector<128x128xf32>, vector<8x128xf32> -> vector<8x128xf32>
    %c0_100 = arith.constant 0 : index
    %c0_101 = arith.constant 0 : index
    %394 = vector.load %arg10[%c0_100, %c0_101] : memref<1x128xf32, #tpu.memory_space<vmem>>, vector<1x128xf32>
    %395 = vector.broadcast %394 : vector<1x128xf32> to vector<8x128xf32>
    %396 = arith.addf %393, %395 : vector<8x128xf32>
    %cst_102 = arith.constant 0.000000e+00 : f32
    %397 = vector.broadcast %cst_102 : f32 to vector<8x128xf32>
    %398 = arith.maximumf %396, %397 : vector<8x128xf32>
    %c0_103 = arith.constant 0 : index
    %c0_104 = arith.constant 0 : index
    %399 = vector.load %arg11[%c0_103, %c0_104] : memref<128x128xf32, #tpu.memory_space<vmem>>, vector<128x128xf32>
    %cst_105 = arith.constant dense<0.000000e+00> : vector<8x128xf32>
    %400 = tpu.matmul %398, %399, %cst_105 {dimension_numbers = #tpu.dot_dimension_numbers<[1], [0], [0], [1], [0, 0, 1, 1], [], []>} : vector<8x128xf32>, vector<128x128xf32>, vector<8x128xf32> -> vector<8x128xf32>
    %c0_106 = arith.constant 0 : index
    %c0_107 = arith.constant 0 : index
    %401 = vector.load %arg12[%c0_106, %c0_107] : memref<1x128xf32, #tpu.memory_space<vmem>>, vector<1x128xf32>
    %402 = vector.broadcast %401 : vector<1x128xf32> to vector<8x128xf32>
    %403 = arith.addf %400, %402 : vector<8x128xf32>
    %c0_108 = arith.constant 0 : index
    %c0_109 = arith.constant 0 : index
    %404 = vector.load %arg13[%c0_108, %c0_109] : memref<8x128xf32, #tpu.memory_space<vmem>>, vector<8x128xf32>
    tpu.vector_store %arg13[%c0_108, %c0_109], %403 {strides = array<i32>} : memref<8x128xf32, #tpu.memory_space<vmem>>, vector<8x128xf32>,
    return
  }
}

</mosaic_0001>

<bundles_post_ra>
// kernel: tpu_custom_call.1
= control target key start
LH: loop header
LB: loop body
LE: loop exit
PB: predicated region body
PF: predicated region fallthrough
CT: control target
= control target key end

     0   :  { %18 = vsyncpa [#allocation4], 0  ;;  %s4757_s0 = inlined_call_operand.hbm [shape: f32[64,128], index: 0, kind: input, shape index: {}]   ;;  %s4758_s1 = inlined_call_operand.hbm [shape: f32[128,384], index: 1, kind: input, shape index: {}]   ;;  %s4759_s2 = inlined_call_operand.hbm [shape: f32[128,384], index: 2, kind: input, shape index: {}]   ;;  %s4760_s3 = inlined_call_operand.hbm [shape: f32[1,384], index: 3, kind: input, shape index: {}]   ;;  %s4761_s4 = inlined_call_operand.vmem [shape: f32[1,128], index: 4, kind: input, shape index: {}]   ;;  %s4762_s5 = inlined_call_operand.hbm [shape: f32[128,384], index: 5, kind: input, shape index: {}]   ;;  %s4763_s6 = inlined_call_operand.hbm [shape: f32[128,384], index: 6, kind: input, shape index: {}]   ;;  %s4764_s7 = inlined_call_operand.vmem [shape: f32[1,384], index: 7, kind: input, shape index: {}]   ;;  %s4765_s8 = inlined_call_operand.vmem [shape: f32[1,128], index: 8, kind: input, shape index: {}]   ;;  %s4766_s9 = inlined_call_operand.hbm [shape: f32[128,128], index: 9, kind: input, shape index: {}]   ;;  %s4767_s10 = inlined_call_operand.vmem [shape: f32[1,128], index: 10, kind: input, shape index: {}]   ;;  %s4768_s11 = inlined_call_operand.hbm [shape: f32[128,128], index: 11, kind: input, shape index: {}]   ;;  %s4769_s12 = inlined_call_operand.vmem [shape: f32[1,128], index: 12, kind: input, shape index: {}]   ;;  %s4770_s13 = inlined_call_operand.hbm [shape: f32[8,128], index: 13, kind: output, shape index: {}]  }
   0x1   :  { %19 = vsyncpa [#allocation7], 0 }
   0x2   :  { %20 = vsyncpa [#allocation10], 0 }
   0x3   :  { %21 = vsyncpa [#allocation13], 0 }
   0x4   :  { %22 = vsyncpa [#allocation16], 0  ;;  %s41_s27 = sshll.u32 %s4758_s1, 4  ;;  %s42_s27 = int_to_ptr.hbm [resolvable:$true] %s41_s27 }
   0x5   :  { %23 = vsyncpa [#allocation5], 0  ;;  %s3101_s28 = smov [#allocation6]   ;;  %s68_s15 = sshll.u32 %s4760_s3, 4  ;;  %s69_s15 = int_to_ptr.hbm [resolvable:$true] %s68_s15 }
   0x6   :  { %s43_s29 = sshll.u32 %s3101_s28, 4  ;;  %s3102_s16 = smov 384   ;;  %s44_s29 = int_to_ptr.vmem [resolvable:$true] %s43_s29 }
   0x7   :  { %s3103_s17 = smov 24   ;;  %s3104_s18 = smov [#allocation9]  }
   0x8   :  { %49 = dma.hbm_to_vmem [thread:$0]  %s42_s27, 6144, %s44_s29, [#allocation7], %s3102_s16, %s3102_s16, %s3103_s17  }
   0x9   :  { %s70_s19 = sshll.u32 %s3104_s18, 4  ;;  %s93_s21 = sshll.u32 %s4763_s6, 4  ;;  %s71_s19 = int_to_ptr.vmem [resolvable:$true] %s70_s19  ;;  %s94_s21 = int_to_ptr.hbm [resolvable:$true] %s93_s21 }
   0xa   :  { %73 = dma.hbm_to_vmem [thread:$0]  %s69_s15, 48, %s71_s19, [#allocation10]  }
   0xb   :  { %s28_s3 = sshll.u32 %s4757_s0, 4  ;;  %s3105_s24 = smov [#allocation12]   ;;  %s29_s3 = int_to_ptr.hbm [resolvable:$true] %s28_s3 }
   0xc   :  { %s95_s25 = sshll.u32 %s3105_s24, 4  ;;  %s3106_s26 = smov [#allocation3]   ;;  %s96_s25 = int_to_ptr.vmem [resolvable:$true] %s95_s25 }
   0xd   :  { %101 = dma.hbm_to_vmem [thread:$0]  %s94_s21, 6144, %s96_s25, [#allocation13], %s3102_s16, %s3102_s16, %s3103_s17  }
   0xe   :  { %s30_s27 = sshll.u32 %s3106_s26, 4  ;;  %s3107_s28 = smov 128   ;;  %s31_s27 = int_to_ptr.vmem [resolvable:$true] %s30_s27 }
   0xf   :  { %s3108_s6 = smov 8   ;;  %s54_s14 = sshll.u32 %s4759_s2, 4  ;;  %s55_s14 = int_to_ptr.hbm [resolvable:$true] %s54_s14 }
  0x10   :  { %36 = dma.hbm_to_vmem [thread:$0]  %s29_s3, 1024, %s31_s27, [#allocation4], %s3107_s28, %s3107_s28, %s3108_s6  }
  0x11   :  { %s3109_s0 = smov [#allocation8]   ;;  %s80_s20 = sshll.u32 %s4762_s5, 4  ;;  %s81_s20 = int_to_ptr.hbm [resolvable:$true] %s80_s20 }
  0x12   :  { %s56_s15 = sshll.u32 %s3109_s0, 4  ;;  %s3110_s1 = smov [#allocation11]   ;;  %s57_s15 = int_to_ptr.vmem [resolvable:$true] %s56_s15 }
  0x13   :  { %62 = dma.hbm_to_vmem [thread:$0]  %s55_s14, 6144, %s57_s15, [#allocation7], %s3102_s16, %s3102_s16, %s3103_s17  }
  0x14   :  { %s82_s21 = sshll.u32 %s3110_s1, 4  ;;  %s110_s3 = sshll.u32 %s4766_s9, 4  ;;  %s83_s21 = int_to_ptr.vmem [resolvable:$true] %s82_s21  ;;  %s111_s3 = int_to_ptr.hbm [resolvable:$true] %s110_s3 }
  0x15   :  { %88 = dma.hbm_to_vmem [thread:$0]  %s81_s20, 6144, %s83_s21, [#allocation10], %s3102_s16, %s3102_s16, %s3103_s17  }
  0x16   :  { %s125_s5 = sshll.u32 %s4768_s11, 4  ;;  %s3111_s25 = smov [#allocation14]   ;;  %s126_s5 = int_to_ptr.hbm [resolvable:$true] %s125_s5 }
  0x17   :  { %s112_s26 = sshll.u32 %s3111_s25, 4  ;;  %s3112_s27 = smov [#allocation15]   ;;  %s113_s26 = int_to_ptr.vmem [resolvable:$true] %s112_s26 }
  0x18   :  { %118 = dma.hbm_to_vmem [thread:$0]  %s111_s3, 2048, %s113_s26, [#allocation13], %s3107_s28, %s3107_s28, %s3108_s6  }
  0x19   :  { %s127_s29 = sshll.u32 %s3112_s27, 4  ;;  %s128_s29 = int_to_ptr.vmem [resolvable:$true] %s127_s29 }
  0x1a   :  { %133 = dma.hbm_to_vmem [thread:$0]  %s126_s5, 2048, %s128_s29, [#allocation16], %s3107_s28, %s3107_s28, %s3108_s6  }
  0x1b   :  { %3089 = dma.done.wait [#allocation4], 1024  }
  0x1c   :  { %3090 = vsyncadd [#allocation4], 4294966272 }
  0x1d   :  { %3091 = dma.done.wait [#allocation7], 12288  }
  0x1e   :  { %3092 = vsyncadd [#allocation7], 4294955008 }
  0x1f   :  { %3093 = dma.done.wait [#allocation10], 6192  }
  0x20   :  { %3094 = vsyncadd [#allocation10], 4294961104 }
  0x21   :  { %3095 = dma.done.wait [#allocation13], 8192  }
  0x22   :  { %3096 = vsyncadd [#allocation13], 4294959104 }
  0x23   :  { %3097 = dma.done.wait [#allocation16], 2048  }
  0x24   :  { %3098 = vsyncadd [#allocation16], 4294965248  ;;  %v221_v0 = vld [vmem:[#allocation6 + $0x168] sm:$0xff]  ;;  %v218_v2 = vld [vmem:[#allocation6 + $0x150] sm:$0xff]  ;;  %v4771_v47 = vmov 0.0   ;;  %s3114_s19 = smov [#allocation17]  }
  0x25   :  { %v3221_v1 = vld [vmem:[#allocation8 + $0x168] sm:$0xff]  ;;  %232 = vmatpush.msra.mxu0 %v221_v0  ;;  %v3224_v3 = vld [vmem:[#allocation8 + $0x150] sm:$0xff]  ;;  %v215_v4 = vld [vmem:[#allocation6 + $0x138] sm:$0xff]  ;;  %s2549_s20 = sshll.u32 %s3114_s19, 4  ;;  %s2551_s22 = sshll.u32 %s4770_s13, 4  ;;  %s2550_s20 = int_to_ptr.vmem [resolvable:$true] %s2549_s20  ;;  %s2552_s22 = int_to_ptr.hbm [resolvable:$true] %s2551_s22 }
  0x26   :  { %434 = vmatpush.msra.mxu3 %v3221_v1  ;;  %v3226_v5 = vld [vmem:[#allocation8 + $0x138] sm:$0xff]  ;;  %v212_v6 = vld [vmem:[#allocation6 + $0x120] sm:$0xff]  ;;  %v209_v8 = vld [vmem:[#allocation6 + $0x108] sm:$0xff] }
  0x27   :  { %233 = vmatpush.msra.mxu0 %v218_v2  ;;  %v3229_v7 = vld [vmem:[#allocation8 + $0x120] sm:$0xff]  ;;  %v3232_v9 = vld [vmem:[#allocation8 + $0x108] sm:$0xff]  ;;  %v206_v10 = vld [vmem:[#allocation6 + $0xf0] sm:$0xff] }
  0x28   :  { %435 = vmatpush.msra.mxu3 %v3224_v3  ;;  %v3235_v11 = vld [vmem:[#allocation8 + $0xf0] sm:$0xff]  ;;  %v203_v12 = vld [vmem:[#allocation6 + $0xd8] sm:$0xff]  ;;  %v200_v14 = vld [vmem:[#allocation6 + $0xc0] sm:$0xff] }
  0x29   :  { %234 = vmatpush.msra.mxu0 %v215_v4  ;;  %v3238_v13 = vld [vmem:[#allocation8 + $0xd8] sm:$0xff]  ;;  %v3241_v15 = vld [vmem:[#allocation8 + $0xc0] sm:$0xff]  ;;  %v222_v16 = vld [vmem:[#allocation6 + $0x170] sm:$0xff] }
  0x2a   :  { %436 = vmatpush.msra.mxu3 %v3226_v5  ;;  %v219_v17 = vld [vmem:[#allocation6 + $0x158] sm:$0xff]  ;;  %v197_v18 = vld [vmem:[#allocation6 + $0xa8] sm:$0xff]  ;;  %273 = vmatpush.msra.mxu1 %v222_v16  ;;  %v216_v20 = vld [vmem:[#allocation6 + $0x140] sm:$0xff] }
  0x2b   :  { %235 = vmatpush.msra.mxu0 %v212_v6  ;;  %v3244_v19 = vld [vmem:[#allocation8 + $0xa8] sm:$0xff]  ;;  %v194_v21 = vld [vmem:[#allocation6 + $0x90] sm:$0xff]  ;;  %v191_v24 = vld [vmem:[#allocation6 + $0x78] sm:$0xff] }
  0x2c   :  { %437 = vmatpush.msra.mxu3 %v3229_v7  ;;  %v3247_v22 = vld [vmem:[#allocation8 + $0x90] sm:$0xff]  ;;  %274 = vmatpush.msra.mxu1 %v219_v17  ;;  %v213_v23 = vld [vmem:[#allocation6 + $0x128] sm:$0xff]  ;;  %v3250_v25 = vld [vmem:[#allocation8 + $0x78] sm:$0xff] }
  0x2d   :  { %236 = vmatpush.msra.mxu0 %v209_v8  ;;  %v188_v26 = vld [vmem:[#allocation6 + $0x60] sm:$0xff]  ;;  %v210_v28 = vld [vmem:[#allocation6 + $0x110] sm:$0xff]  ;;  %v207_v29 = vld [vmem:[#allocation6 + $0xf8] sm:$0xff] }
  0x2e   :  { %438 = vmatpush.msra.mxu3 %v3232_v9  ;;  %275 = vmatpush.msra.mxu1 %v216_v20  ;;  %v3253_v27 = vld [vmem:[#allocation8 + $0x60] sm:$0xff]  ;;  %v185_v30 = vld [vmem:[#allocation6 + $0x48] sm:$0xff]  ;;  %v182_v33 = vld [vmem:[#allocation6 + $0x30] sm:$0xff] }
  0x2f   :  { %237 = vmatpush.msra.mxu0 %v206_v10  ;;  %v3256_v31 = vld [vmem:[#allocation8 + $0x48] sm:$0xff]  ;;  %v204_v32 = vld [vmem:[#allocation6 + $0xe0] sm:$0xff]  ;;  %v3259_v34 = vld [vmem:[#allocation8 + $0x30] sm:$0xff] }
  0x30   :  { %439 = vmatpush.msra.mxu3 %v3235_v11  ;;  %276 = vmatpush.msra.mxu1 %v213_v23  ;;  %v201_v35 = vld [vmem:[#allocation6 + $0xc8] sm:$0xff]  ;;  %v179_v36 = vld [vmem:[#allocation6 + $0x18] sm:$0xff]  ;;  %v198_v38 = vld [vmem:[#allocation6 + $0xb0] sm:$0xff] }
  0x31   :  { %238 = vmatpush.msra.mxu0 %v203_v12  ;;  %v3262_v37 = vld [vmem:[#allocation8 + $0x18] sm:$0xff]  ;;  %v176_v39 = vld [vmem:[#allocation6] sm:$0xff]  ;;  %v3270_v43 = vld [vmem:[#allocation8 + $0x170] sm:$0xff] }
  0x32   :  { %440 = vmatpush.msra.mxu3 %v3238_v13  ;;  %277 = vmatpush.msra.mxu1 %v210_v28  ;;  %4820 = vst [vmem:[#allocation24_spill] sm:$0xff] %v3262_v37  ;;  %v3265_v40 = vld [vmem:[#allocation8] sm:$0xff]  ;;  %v223_v42 = vld [vmem:[#allocation6 + $0x178] sm:$0xff]  ;;  %v217_v51 = vld [vmem:[#allocation6 + $0x148] sm:$0xff] }
  0x33   :  { %239 = vmatpush.msra.mxu0 %v200_v14  ;;  %4821 = vst [vmem:[#allocation25_spill] sm:$0xff] %v3265_v40  ;;  %v3268_v41 = vld [vmem:[#allocation3] sm:$0xff]  ;;  %v3272_v44 = vld [vmem:[#allocation8 + $0x178] sm:$0xff]  ;;  %314 = vmatpush.msra.mxu2 %v223_v42  ;;  %v3285_v53 = vld [vmem:[#allocation8 + $0x148] sm:$0xff] }
  0x34   :  { %441 = vmatpush.msra.mxu3 %v3241_v15  ;;  %278 = vmatpush.msra.mxu1 %v207_v29  ;;  %v195_v45 = vld [vmem:[#allocation6 + $0x98] sm:$0xff]  ;;  %v220_v46 = vld [vmem:[#allocation6 + $0x160] sm:$0xff]  ;;  %v189_v54 = vld [vmem:[#allocation6 + $0x68] sm:$0xff] }
  0x35   :  { %240 = vmatpush.msra.mxu0 %v197_v18  ;;  %v3277_v48 = vld [vmem:[#allocation8 + $0x158] sm:$0xff]  ;;  %v3279_v49 = vld [vmem:[#allocation8 + $0x160] sm:$0xff]  ;;  %315 = vmatpush.msra.mxu2 %v220_v46  ;;  %v214_v55 = vld [vmem:[#allocation6 + $0x130] sm:$0xff] }
  0x36   :  { %442 = vmatpush.msra.mxu3 %v3244_v19  ;;  %279 = vmatpush.msra.mxu1 %v204_v32  ;;  %v192_v50 = vld [vmem:[#allocation6 + $0x80] sm:$0xff]  ;;  %v3289_v56 = vld [vmem:[#allocation8 + $0x128] sm:$0xff]  ;;  %v3291_v57 = vld [vmem:[#allocation8 + $0x130] sm:$0xff] }
  0x37   :  { %241 = vmatpush.msra.mxu0 %v194_v21  ;;  %v3283_v52 = vld [vmem:[#allocation8 + $0x140] sm:$0xff]  ;;  %316 = vmatpush.msra.mxu2 %v217_v51  ;;  %v3294_v58 = vld [vmem:[#allocation3 + $0x8] sm:$0xff]  ;;  %v186_v59 = vld [vmem:[#allocation6 + $0x50] sm:$0xff] }
  0x38   :  { %443 = vmatpush.msra.mxu3 %v3247_v22  ;;  %280 = vmatpush.msra.mxu1 %v201_v35  ;;  %v3297_v60 = vld [vmem:[#allocation8 + $0x110] sm:$0xff]  ;;  %v3299_v61 = vld [vmem:[#allocation8 + $0x118] sm:$0xff]  ;;  %v3306_v2 = vld [vmem:[#allocation8 + $0x100] sm:$0xff] }
  0x39   :  { %242 = vmatpush.msra.mxu0 %v191_v24  ;;  %317 = vmatpush.msra.mxu2 %v214_v55  ;;  %v183_v62 = vld [vmem:[#allocation6 + $0x38] sm:$0xff]  ;;  %v180_v4 = vld [vmem:[#allocation6 + $0x20] sm:$0xff]  ;;  %v3312_v10 = vld [vmem:[#allocation8 + $0xe8] sm:$0xff] }
  0x3a   :  { %444 = vmatpush.msra.mxu3 %v3250_v25  ;;  %281 = vmatpush.msra.mxu1 %v198_v38  ;;  %v211_v63 = vld [vmem:[#allocation6 + $0x118] sm:$0xff]  ;;  %v208_v6 = vld [vmem:[#allocation6 + $0x100] sm:$0xff]  ;;  %v177_v12 = vld [vmem:[#allocation6 + $0x8] sm:$0xff] }
  0x3b   :  { %243 = vmatpush.msra.mxu0 %v188_v26  ;;  %v3304_v0 = vld [vmem:[#allocation8 + $0xf8] sm:$0xff]  ;;  %v3310_v8 = vld [vmem:[#allocation8 + $0xe0] sm:$0xff]  ;;  %318 = vmatpush.msra.mxu2 %v211_v63  ;;  %v205_v14 = vld [vmem:[#allocation6 + $0xe8] sm:$0xff] }
  0x3c   :  { %445 = vmatpush.msra.mxu3 %v3253_v27  ;;  %282 = vmatpush.msra.mxu1 %v195_v45  ;;  %v3316_v16 = vld [vmem:[#allocation8 + $0xc8] sm:$0xff]  ;;  %v3318_v17 = vld [vmem:[#allocation8 + $0xd0] sm:$0xff]  ;;  %v3326_v21 = vld [vmem:[#allocation8 + $0xb8] sm:$0xff] }
  0x3d   :  { %244 = vmatpush.msra.mxu0 %v185_v30  ;;  %319 = vmatpush.msra.mxu2 %v208_v6  ;;  %v3321_v18 = vld [vmem:[#allocation3 + $0x10] sm:$0xff]  ;;  %v3331_v24 = vld [vmem:[#allocation8 + $0x98] sm:$0xff]  ;;  %v3334_v26 = vld [vmem:[#allocation8 + $0xa0] sm:$0xff] }
  0x3e   :  { %446 = vmatpush.msra.mxu3 %v3256_v31  ;;  %283 = vmatpush.msra.mxu1 %v192_v50  ;;  %v3324_v20 = vld [vmem:[#allocation8 + $0xb0] sm:$0xff]  ;;  %v199_v28 = vld [vmem:[#allocation6 + $0xb8] sm:$0xff]  ;;  %v3338_v29 = vld [vmem:[#allocation8 + $0x80] sm:$0xff] }
  0x3f   :  { %245 = vmatpush.msra.mxu0 %v182_v33  ;;  %320 = vmatpush.msra.mxu2 %v205_v14  ;;  %v202_v23 = vld [vmem:[#allocation6 + $0xd0] sm:$0xff]  ;;  %v3340_v30 = vld [vmem:[#allocation8 + $0x88] sm:$0xff]  ;;  %v196_v32 = vld [vmem:[#allocation6 + $0xa0] sm:$0xff] }
  0x40   :  { %447 = vmatpush.msra.mxu3 %v3259_v34  ;;  %284 = vmatpush.msra.mxu1 %v189_v54  ;;  %v3345_v33 = vld [vmem:[#allocation8 + $0x68] sm:$0xff]  ;;  %v3347_v35 = vld [vmem:[#allocation8 + $0x70] sm:$0xff]  ;;  %v3356_v42 = vld [vmem:[#allocation8 + $0x58] sm:$0xff] }
  0x41   :  { %246 = vmatpush.msra.mxu0 %v179_v36  ;;  %321 = vmatpush.msra.mxu2 %v202_v23  ;;  %v3351_v36 = vld [vmem:[#allocation3 + $0x18] sm:$0xff]  ;;  %v193_v38 = vld [vmem:[#allocation6 + $0x88] sm:$0xff]  ;;  %v190_v45 = vld [vmem:[#allocation6 + $0x70] sm:$0xff] }
  0x42   :  { %448 = vmatpush.msra.mxu3 %v3262_v37  ;;  %285 = vmatpush.msra.mxu1 %v186_v59  ;;  %v3362_v46 = vld [vmem:[#allocation8 + $0x38] sm:$0xff]  ;;  %v3364_v50 = vld [vmem:[#allocation8 + $0x40] sm:$0xff]  ;;  %v3370_v55 = vld [vmem:[#allocation8 + $0x28] sm:$0xff] }
  0x43   :  { %247 = vmatpush.msra.mxu0 %v176_v39  ;;  %322 = vmatpush.msra.mxu2 %v199_v28  ;;  %v3354_v39 = vld [vmem:[#allocation8 + $0x50] sm:$0xff]  ;;  %4822 = vst [vmem:[#allocation26_spill] sm:$0xff] %v3362_v46  ;;  %v187_v51 = vld [vmem:[#allocation6 + $0x58] sm:$0xff]  ;;  %v3368_v54 = vld [vmem:[#allocation8 + $0x20] sm:$0xff] }
  0x44   :  { %449 = vmatpush.msra.mxu3 %v3265_v40  ;;  %248 = vmatmul.f32.vlgmr.msra.gmra.mxu0 %v3268_v41  ;;  %4823 = vst [vmem:[#allocation27_spill] sm:$0xff] %v3368_v54  ;;  %v184_v59 = vld [vmem:[#allocation6 + $0x40] sm:$0xff]  ;;  %v3377_v63 = vld [vmem:[#allocation8 + $0x10] sm:$0xff]  ;;  %v181_v6 = vld [vmem:[#allocation6 + $0x28] sm:$0xff] }
  0x45   :  { %450 = vmatmul.f32.vlgmr.msra.gmra.mxu3 %v4771_v47  ;;  %474 = vmatpush.msrb.mxu0 %v3272_v44  ;;  %4824 = vst [vmem:[#allocation28_spill] sm:$0xff] %v3370_v55  ;;  %v3395_v14 = vld [vmem:[#allocation3 + $0x28] sm:$0xff]  ;;  %v224_v23 = vld [vmem:[#allocation9] sm:$0x7] }
  0x46   :  { %454 = vmatpush.msrb.mxu3 %v3270_v43  ;;  %286 = vmatpush.msra.mxu1 %v183_v62  ;;  %v3375_v62 = vld [vmem:[#allocation8 + $0x8] sm:$0xff]  ;;  %4826 = vst [vmem:[#allocation30_spill] sm:$0xff] %v3377_v63 }
  0x47   :  { %475 = vmatpush.msrb.mxu0 %v3279_v49  ;;  %323 = vmatpush.msra.mxu2 %v196_v32  ;;  %4825 = vst [vmem:[#allocation29_spill] sm:$0xff] %v3375_v62  ;;  %v3538_v32 = vperm.slane %v224_v23, 0 }
  0x48   :  { %455 = vmatpush.msrb.mxu3 %v3277_v48  ;;  %287 = vmatpush.msra.mxu1 %v180_v4  ;;  %v3381_v4 = vld [vmem:[#allocation3 + $0x20] sm:$0xff] }
  0x49   :  { %476 = vmatpush.msrb.mxu0 %v3285_v53  ;;  %324 = vmatpush.msra.mxu2 %v193_v38  ;;  %4828 = vst [vmem:[#allocation32_spill] sm:$0xff] %v3538_v32 }
  0x4a   :  { %456 = vmatpush.msrb.mxu3 %v3283_v52  ;;  %288 = vmatpush.msra.mxu1 %v177_v12  ;;  %v178_v12 = vld [vmem:[#allocation6 + $0x10] sm:$0xff] }
  0x4b   :  { %477 = vmatpush.msrb.mxu0 %v3291_v57  ;;  %289 = vmatmul.f32.vlgmr.msra.gmra.mxu1 %v3268_v41 }
  0x4c   :  { %457 = vmatpush.msrb.mxu3 %v3289_v56  ;;  %251 = vmatmul.f32.gmra.mxu0 %v3294_v58 }
  0x4d   :  { %478 = vmatpush.msrb.mxu0 %v3299_v61  ;;  %545 = vmatpush.msrb.mxu1 %v3221_v1 }
  0x4e   :  { %458 = vmatpush.msrb.mxu3 %v3297_v60  ;;  %325 = vmatpush.msra.mxu2 %v190_v45 }
  0x4f   :  { %479 = vmatpush.msrb.mxu0 %v3306_v2  ;;  %546 = vmatpush.msrb.mxu1 %v3224_v3 }
  0x50   :  { %459 = vmatpush.msrb.mxu3 %v3304_v0  ;;  %326 = vmatpush.msra.mxu2 %v187_v51 }
  0x51   :  { %480 = vmatpush.msrb.mxu0 %v3312_v10  ;;  %547 = vmatpush.msrb.mxu1 %v3226_v5 }
  0x52   :  { %460 = vmatpush.msrb.mxu3 %v3310_v8  ;;  %327 = vmatpush.msra.mxu2 %v184_v59 }
  0x53   :  { %481 = vmatpush.msrb.mxu0 %v3318_v17  ;;  %292 = vmatmul.f32.gmra.mxu1 %v3294_v58 }
  0x54   :  { %461 = vmatpush.msrb.mxu3 %v3316_v16  ;;  %254 = vmatmul.f32.gmra.mxu0 %v3321_v18 }
  0x55   :  { %482 = vmatpush.msrb.mxu0 %v3326_v21  ;;  %548 = vmatpush.msrb.mxu1 %v3229_v7 }
  0x56   :  { %462 = vmatpush.msrb.mxu3 %v3324_v20  ;;  %328 = vmatpush.msra.mxu2 %v181_v6 }
  0x57   :  { %483 = vmatpush.msrb.mxu0 %v3334_v26  ;;  %549 = vmatpush.msrb.mxu1 %v3232_v9 }
  0x58   :  { %463 = vmatpush.msrb.mxu3 %v3331_v24  ;;  %329 = vmatpush.msra.mxu2 %v178_v12  ;;  %v3545_v12 = vperm.slane %v224_v23, 1 }
  0x59   :  { %484 = vmatpush.msrb.mxu0 %v3340_v30  ;;  %550 = vmatpush.msrb.mxu1 %v3235_v11 }
  0x5a   :  { %464 = vmatpush.msrb.mxu3 %v3338_v29  ;;  %330 = vmatmul.f32.vlgmr.msra.gmra.mxu2 %v3268_v41  ;;  %v3413_v41 = vld [vmem:[#allocation3 + $0x30] sm:$0xff]  ;;  %4831 = vst [vmem:[#allocation35_spill] sm:$0xff] %v3545_v12 }
  0x5b   :  { %485 = vmatpush.msrb.mxu0 %v3347_v35  ;;  %295 = vmatmul.f32.gmra.mxu1 %v3321_v18 }
  0x5c   :  { %465 = vmatpush.msrb.mxu3 %v3345_v33  ;;  %257 = vmatmul.f32.gmra.mxu0 %v3351_v36 }
  0x5d   :  { %486 = vmatpush.msrb.mxu0 %v3356_v42  ;;  %551 = vmatpush.msrb.mxu1 %v3238_v13 }
  0x5e   :  { %466 = vmatpush.msrb.mxu3 %v3354_v39  ;;  %565 = vmatpush.msrb.mxu2 %v3270_v43 }
  0x5f   :  { %487 = vmatpush.msrb.mxu0 %v3364_v50  ;;  %552 = vmatpush.msrb.mxu1 %v3241_v15 }
  0x60   :  { %467 = vmatpush.msrb.mxu3 %v3362_v46  ;;  %566 = vmatpush.msrb.mxu2 %v3277_v48 }
  0x61   :  { %488 = vmatpush.msrb.mxu0 %v3370_v55  ;;  %553 = vmatpush.msrb.mxu1 %v3244_v19 }
  0x62   :  { %468 = vmatpush.msrb.mxu3 %v3368_v54  ;;  %567 = vmatpush.msrb.mxu2 %v3283_v52 }
  0x63   :  { %489 = vmatpush.msrb.mxu0 %v3377_v63  ;;  %554 = vmatpush.msrb.mxu1 %v3247_v22 }
  0x64   :  { %469 = vmatpush.msrb.mxu3 %v3375_v62  ;;  %260 = vmatmul.f32.gmra.mxu0 %v3381_v4 }
  0x65   :  { %470 = vmatmul.f32.vlgmr.msrb.gmra.mxu3 %v4771_v47  ;;  %656 = vmatpush.msra.mxu0 %v3221_v1 }
  0x66   :  { %585 = vmatpush.msra.mxu3 %v3272_v44  ;;  %298 = vmatmul.f32.gmra.mxu1 %v3351_v36 }
  0x67   :  { %568 = vmatpush.msrb.mxu2 %v3289_v56  ;;  %555 = vmatpush.msrb.mxu1 %v3250_v25 }
  0x68   :  { %586 = vmatpush.msra.mxu3 %v3279_v49  ;;  %333 = vmatmul.f32.gmra.mxu2 %v3294_v58  ;;  %v3431_v58 = vld [vmem:[#allocation3 + $0x38] sm:$0xff] }
  0x69   :  { %569 = vmatpush.msrb.mxu2 %v3297_v60  ;;  %556 = vmatpush.msrb.mxu1 %v3253_v27 }
  0x6a   :  { %587 = vmatpush.msra.mxu3 %v3285_v53  ;;  %657 = vmatpush.msra.mxu0 %v3224_v3 }
  0x6b   :  { %570 = vmatpush.msrb.mxu2 %v3304_v0  ;;  %557 = vmatpush.msrb.mxu1 %v3256_v31 }
  0x6c   :  { %263 = vmatmul.f32.gmra.mxu0 %v3395_v14  ;;  %588 = vmatpush.msra.mxu3 %v3291_v57 }
  0x6d   :  { %571 = vmatpush.msrb.mxu2 %v3310_v8  ;;  %558 = vmatpush.msrb.mxu1 %v3259_v34 }
  0x6e   :  { %589 = vmatpush.msra.mxu3 %v3299_v61  ;;  %301 = vmatmul.f32.gmra.mxu1 %v3381_v4 }
  0x6f   :  { %572 = vmatpush.msrb.mxu2 %v3316_v16  ;;  %559 = vmatpush.msrb.mxu1 %v3262_v37 }
  0x70   :  { %590 = vmatpush.msra.mxu3 %v3306_v2  ;;  %336 = vmatmul.f32.gmra.mxu2 %v3321_v18 }
  0x71   :  { %573 = vmatpush.msrb.mxu2 %v3324_v20  ;;  %560 = vmatpush.msrb.mxu1 %v3265_v40 }
  0x72   :  { %591 = vmatpush.msra.mxu3 %v3312_v10  ;;  %658 = vmatpush.msra.mxu0 %v3226_v5 }
  0x73   :  { %676 = vmatpush.msra.mxu1 %v3270_v43  ;;  %574 = vmatpush.msrb.mxu2 %v3331_v24 }
  0x74   :  { %266 = vmatmul.f32.gmra.mxu0 %v3413_v41  ;;  %592 = vmatpush.msra.mxu3 %v3318_v17 }
  0x75   :  { %575 = vmatpush.msrb.mxu2 %v3338_v29  ;;  %677 = vmatpush.msra.mxu1 %v3277_v48 }
  0x76   :  { %593 = vmatpush.msra.mxu3 %v3326_v21  ;;  %304 = vmatmul.f32.gmra.mxu1 %v3395_v14 }
  0x77   :  { %576 = vmatpush.msrb.mxu2 %v3345_v33  ;;  %678 = vmatpush.msra.mxu1 %v3283_v52 }
  0x78   :  { %594 = vmatpush.msra.mxu3 %v3334_v26  ;;  %339 = vmatmul.f32.gmra.mxu2 %v3351_v36 }
  0x79   :  { %577 = vmatpush.msrb.mxu2 %v3354_v39  ;;  %659 = vmatpush.msra.mxu0 %v3229_v7 }
  0x7a   :  { %595 = vmatpush.msra.mxu3 %v3340_v30  ;;  %679 = vmatpush.msra.mxu1 %v3289_v56 }
  0x7b   :  { %578 = vmatpush.msrb.mxu2 %v3362_v46  ;;  %660 = vmatpush.msra.mxu0 %v3232_v9 }
  0x7c   :  { %269 = vmatmul.f32.gmra.mxu0 %v3431_v58  ;;  %596 = vmatpush.msra.mxu3 %v3347_v35 }
  0x7d   :  { %579 = vmatpush.msrb.mxu2 %v3368_v54  ;;  %680 = vmatpush.msra.mxu1 %v3297_v60 }
  0x7e   :  { %597 = vmatpush.msra.mxu3 %v3356_v42  ;;  %307 = vmatmul.f32.gmra.mxu1 %v3413_v41 }
  0x7f   :  { %661 = vmatpush.msra.mxu0 %v3235_v11  ;;  %580 = vmatpush.msrb.mxu2 %v3375_v62 }
  0x80   :  { %598 = vmatpush.msra.mxu3 %v3364_v50  ;;  %681 = vmatpush.msra.mxu1 %v3304_v0 }
  0x81   :  { %342 = vmatmul.f32.gmra.mxu2 %v3381_v4  ;;  %662 = vmatpush.msra.mxu0 %v3238_v13 }
  0x82   :  { %599 = vmatpush.msra.mxu3 %v3370_v55  ;;  %696 = vmatpush.msra.mxu2 %v3272_v44 }
  0x83   :  { %682 = vmatpush.msra.mxu1 %v3310_v8  ;;  %663 = vmatpush.msra.mxu0 %v3241_v15 }
  0x84   :  { %490 = vmatmul.f32.vlgmr.msrb.gmra.mxu0 %v4771_v47  ;;  %600 = vmatpush.msra.mxu3 %v3377_v63 }
  0x85   :  { %697 = vmatpush.msra.mxu2 %v3279_v49  ;;  %683 = vmatpush.msra.mxu1 %v3316_v16 }
  0x86   :  { %767 = vmatpush.msrb.mxu3 %v3221_v1  ;;  %664 = vmatpush.msra.mxu0 %v3244_v19 }
  0x87   :  { %698 = vmatpush.msra.mxu2 %v3285_v53  ;;  %684 = vmatpush.msra.mxu1 %v3324_v20 }
  0x88   :  { %768 = vmatpush.msrb.mxu3 %v3224_v3  ;;  %310 = vmatmul.f32.gmra.mxu1 %v3431_v58 }
  0x89   :  { %665 = vmatpush.msra.mxu0 %v3247_v22  ;;  %699 = vmatpush.msra.mxu2 %v3291_v57 }
  0x8a   :  { %685 = vmatpush.msra.mxu1 %v3331_v24  ;;  %345 = vmatmul.f32.gmra.mxu2 %v3395_v14 }
  0x8b   :  { %666 = vmatpush.msra.mxu0 %v3250_v25  ;;  %700 = vmatpush.msra.mxu2 %v3299_v61 }
  0x8c   :  { %686 = vmatpush.msra.mxu1 %v3338_v29  ;;  %769 = vmatpush.msrb.mxu3 %v3226_v5 }
  0x8d   :  { %667 = vmatpush.msra.mxu0 %v3253_v27  ;;  %701 = vmatpush.msra.mxu2 %v3306_v2 }
  0x8e   :  { %687 = vmatpush.msra.mxu1 %v3345_v33  ;;  %770 = vmatpush.msrb.mxu3 %v3229_v7 }
  0x8f   :  { %668 = vmatpush.msra.mxu0 %v3256_v31  ;;  %702 = vmatpush.msra.mxu2 %v3312_v10 }
  0x90   :  { %688 = vmatpush.msra.mxu1 %v3354_v39  ;;  %771 = vmatpush.msrb.mxu3 %v3232_v9 }
  0x91   :  { %669 = vmatpush.msra.mxu0 %v3259_v34  ;;  %703 = vmatpush.msra.mxu2 %v3318_v17 }
  0x92   :  { %689 = vmatpush.msra.mxu1 %v3362_v46  ;;  %348 = vmatmul.f32.gmra.mxu2 %v3413_v41 }
  0x93   :  { %670 = vmatpush.msra.mxu0 %v3262_v37  ;;  %704 = vmatpush.msra.mxu2 %v3326_v21 }
  0x94   :  { %690 = vmatpush.msra.mxu1 %v3368_v54  ;;  %772 = vmatpush.msrb.mxu3 %v3235_v11 }
  0x95   :  { %671 = vmatpush.msra.mxu0 %v3265_v40  ;;  %705 = vmatpush.msra.mxu2 %v3334_v26 }
  0x96   :  { %691 = vmatpush.msra.mxu1 %v3375_v62  ;;  %773 = vmatpush.msrb.mxu3 %v3238_v13 }
  0x97   :  { %787 = vmatpush.msrb.mxu0 %v3270_v43  ;;  %706 = vmatpush.msra.mxu2 %v3340_v30 }
  0x98   :  { %774 = vmatpush.msrb.mxu3 %v3241_v15 }
  0x99   :  { %788 = vmatpush.msrb.mxu0 %v3277_v48  ;;  %707 = vmatpush.msra.mxu2 %v3347_v35 }
  0x9a   :  { %351 = vmatmul.f32.gmra.mxu2 %v3431_v58  ;;  %775 = vmatpush.msrb.mxu3 %v3244_v19 }
  0x9b   :  { %789 = vmatpush.msrb.mxu0 %v3283_v52  ;;  %708 = vmatpush.msra.mxu2 %v3356_v42 }
  0x9c   :  { %776 = vmatpush.msrb.mxu3 %v3247_v22 }
  0x9d   :  { %790 = vmatpush.msrb.mxu0 %v3289_v56  ;;  %709 = vmatpush.msra.mxu2 %v3364_v50 }
  0x9e   :  { %777 = vmatpush.msrb.mxu3 %v3250_v25 }
  0x9f   :  { %791 = vmatpush.msrb.mxu0 %v3297_v60  ;;  %710 = vmatpush.msra.mxu2 %v3370_v55 }
  0xa0   :  { %778 = vmatpush.msrb.mxu3 %v3253_v27 }
  0xa1   :  { %792 = vmatpush.msrb.mxu0 %v3304_v0  ;;  %711 = vmatpush.msra.mxu2 %v3377_v63 }
  0xa2   :  { %779 = vmatpush.msrb.mxu3 %v3256_v31 }
  0xa3   :  { %793 = vmatpush.msrb.mxu0 %v3310_v8 }
  0xa4   :  { %780 = vmatpush.msrb.mxu3 %v3259_v34 }
  0xa5   :  { %794 = vmatpush.msrb.mxu0 %v3316_v16 }
  0xa6   :  { %781 = vmatpush.msrb.mxu3 %v3262_v37 }
  0xa7   :  { %795 = vmatpush.msrb.mxu0 %v3324_v20 }
  0xa8   :  { %782 = vmatpush.msrb.mxu3 %v3265_v40 }
  0xa9   :  { %796 = vmatpush.msrb.mxu0 %v3331_v24 }
  0xab   :  { %797 = vmatpush.msrb.mxu0 %v3338_v29 }
  0xad   :  { %798 = vmatpush.msrb.mxu0 %v3345_v33 }
  0xaf   :  { %799 = vmatpush.msrb.mxu0 %v3354_v39 }
  0xb1   :  { %800 = vmatpush.msrb.mxu0 %v3362_v46 }
  0xb3   :  { %801 = vmatpush.msrb.mxu0 %v3368_v54 }
  0xb5   :  { %802 = vmatpush.msrb.mxu0 %v3375_v62 }
  0xc1   :  { %v249_v18 = vpop.f32.mrf.mxu0 }
  0xc2   :  { %v250_v38 = vadd.f32 %v249_v18, %v3538_v32 }
  0xc8   :  { %v451_v36 = vpop.f32.mrf.mxu3  ;;  %v290_v41 = vpop.f32.mrf.mxu1 }
  0xc9   :  { %v3536_v28 = vpop.f32.mrf.mxu0  ;;  %v494_v51 = vadd.f32 %v451_v36, %v250_v38 }
  0xca   :  { %4827 = vst [vmem:[#allocation31_spill] sm:$0xff] %v3536_v28  ;;  %v291_v28 = vadd.f32 %v290_v41, %v3545_v12 }
  0xcb   :  { %v2565_v59 = vmul.f32 -1.442695, %v494_v51 }
  0xcd   :  { %2615 = vpow2.f32 %v2565_v59 }
  0xd1   :  { %v3541_v45 = vpop.f32.mrf.mxu0 }
  0xd2   :  { %4829 = vst [vmem:[#allocation33_spill] sm:$0xff] %v3541_v45 }
  0xd3   :  { %v2616_v6 = vpop.eup %2615 }
  0xd4   :  { %v502_v47 = vadd.f32 1.0, %v2616_v6 }
  0xd6   :  { %2617 = vrcp.f32 %v502_v47  ;;  %v515_v54 = vand.u32 2147483648, %v502_v47  ;;  %vm509_vm1 = vweird.f32 %v502_v47 }
  0xd9   :  { %v3543_v4 = vpop.f32.mrf.mxu0 }
  0xda   :  { %4830 = vst [vmem:[#allocation34_spill] sm:$0xff] %v3543_v4 }
  0xdc   :  { %v2618_v59 = vpop.eup %2617 }
  0xdd   :  { %v331_v51 = vpop.f32.mrf.mxu2  ;;  %v505_v4 = vmul.f32 %v2618_v59, %v502_v47  ;;  %vm510_vm0 = vweird.f32 %v2618_v59 }
  0xde   :  { %vm511_vm2 = vmor %vm509_vm1, %vm510_vm0 }
  0xe1   :  { %v261_v14 = vpop.f32.mrf.mxu0 }
  0xe2   :  { %v3548_v58 = vadd.f32 %v261_v14, %v3538_v32 }
  0xe4   :  { %4832 = vst [vmem:[#allocation36_spill] sm:$0xff] %v3548_v58  ;;  %v506_v58 = vsub.f32 1.0, %v505_v4  ;;  %v3569_v4 = vperm.slane %v224_v23, 2 }
  0xe6   :  { %4838 = vst [vmem:[#allocation42_spill] sm:$0xff] %v3569_v4 }
  0xe8   :  { %v471_v18 = vpop.f32.mrf.mxu3 }
  0xe9   :  { %v495_v62 = vadd.f32 %v471_v18, %v291_v28  ;;  %v264_v45 = vpop.f32.mrf.mxu0  ;;  %v507_v28 = vmul.f32 %v2618_v59, %v506_v58 }
  0xea   :  { %v3552_v38 = vadd.f32 %v264_v45, %v3538_v32 }
  0xeb   :  { %v2566_v36 = vmul.f32 -1.442695, %v495_v62  ;;  %v3557_v41 = vpop.f32.mrf.mxu2 }
  0xec   :  { %4833 = vst [vmem:[#allocation37_spill] sm:$0xff] %v3552_v38  ;;  %v508_v38 = vadd.f32 %v2618_v59, %v507_v28 }
  0xed   :  { %2619 = vpow2.f32 %v2566_v36  ;;  %4835 = vst [vmem:[#allocation39_spill] sm:$0xff] %v3557_v41 }
  0xf1   :  { %v267_v40 = vpop.f32.mrf.mxu0 }
  0xf2   :  { %v3555_v14 = vadd.f32 %v267_v40, %v3538_v32  ;;  %v3567_v40 = vld [vmem:[%s4761_s4] ss:$0 sm:$0xff] }
  0xf3   :  { %v2620_v63 = vpop.eup %2619  ;;  %v3562_v12 = vpop.f32.mrf.mxu2 }
  0xf4   :  { %4834 = vst [vmem:[#allocation38_spill] sm:$0xff] %v3555_v14  ;;  %v503_v6 = vadd.f32 1.0, %v2620_v63  ;;  %v513_v63 = vand.u32 2147483647, %v502_v47  ;;  %v516_v14 = vor.u32 1.1754944e-38, %v515_v54 }
  0xf5   :  { %4837 = vst [vmem:[#allocation41_spill] sm:$0xff] %v3562_v12  ;;  %v332_v12 = vadd.f32 %v331_v51, %v3569_v4 }
  0xf6   :  { %2621 = vrcp.f32 %v503_v6  ;;  %vm514_vm3 = vcmp.eq.f32.partialorder %v513_v63, 8.507059e+37  ;;  %vm524_vm4 = vweird.f32 %v503_v6  ;;  %v528_v47 = vand.u32 2147483647, %v503_v6 }
  0xf8   :  { %vm529_vm7 = vcmp.eq.f32.partialorder %v528_v47, 8.507059e+37 }
  0xf9   :  { %v270_v18 = vpop.f32.mrf.mxu0 }
  0xfa   :  { %v3560_v62 = vadd.f32 %v270_v18, %v3538_v32  ;;  %v512_v18 = vsel %vm511_vm2, %v2618_v59, %v508_v38  ;;  %v530_v32 = vand.u32 2147483648, %v503_v6 }
  0xfb   :  { %v517_v41 = vsel %vm514_vm3, %v516_v14, %v512_v18  ;;  %v340_v46 = vpop.f32.mrf.mxu2 }
  0xfc   :  { %4836 = vst [vmem:[#allocation40_spill] sm:$0xff] %v3560_v62  ;;  %v2622_v45 = vpop.eup %2621  ;;  %v3574_v23 = vadd.f32 %v340_v46, %v3569_v4  ;;  %v531_v54 = vor.u32 1.1754944e-38, %v530_v32 }
  0xfd   :  { %v520_v36 = vmul.f32 %v2622_v45, %v503_v6  ;;  %vm525_vm5 = vweird.f32 %v2622_v45 }
  0xfe   :  { %vm526_vm6 = vmor %vm524_vm4, %vm525_vm5 }
  0xff   :  { %v521_v37 = vsub.f32 1.0, %v520_v36 }
 0x101   :  { %v522_v58 = vmul.f32 %v2622_v45, %v521_v37  ;;  %v491_v62 = vpop.f32.mrf.mxu0 }
 0x102   :  { %v534_v28 = vadd.f32 %v3567_v40, %v491_v62 }
 0x103   :  { %v523_v36 = vadd.f32 %v2622_v45, %v522_v58 }
 0x104   :  { %v535_v55 = vmul.f32 %v534_v28, %v517_v41  ;;  %v343_v62 = vpop.f32.mrf.mxu2  ;;  %v4856_v28 = vld [vmem:[#allocation31_spill] sm:$0xff] }
 0x105   :  { %v527_v38 = vsel %vm526_vm6, %v2622_v45, %v523_v36  ;;  %v3577_v63 = vadd.f32 %v343_v62, %v3569_v4  ;;  %v4855_v45 = vld [vmem:[#allocation32_spill] sm:$0xff] }
 0x106   :  { %v536_v37 = vadd.f32 %v535_v55, %v332_v12  ;;  %v532_v59 = vsel %vm529_vm7, %v531_v54, %v527_v38  ;;  %v253_v36 = vadd.f32 %v4856_v28, %v4855_v45  ;;  %v4857_v54 = vld [vmem:[#allocation35_spill] sm:$0xff] }
 0x107   :  { %v538_v51 = vsub.f32 1.0, %v532_v59  ;;  %4839 = vst [vmem:[#allocation43_spill] sm:$0xff] %v3577_v63  ;;  %v540_v41 = vmul.f32 0.0, %v532_v59 }
 0x108   :  { %2623 = vtanh.f32 %v536_v37 }
 0x10d   :  { %v346_v46 = vpop.f32.mrf.mxu2 }
 0x10e   :  { %v2624_v14 = vpop.eup %2623  ;;  %v3586_v55 = vadd.f32 %v346_v46, %v3569_v4 }
 0x10f   :  { %v539_v58 = vmul.f32 %v2624_v14, %v538_v51 }
 0x110   :  { %4841 = vst [vmem:[#allocation45_spill] sm:$0xff] %v3586_v55 }
 0x111   :  { %v3579_v18 = vadd.f32 %v540_v41, %v539_v58 }
 0x113   :  { %4840 = vst [vmem:[#allocation44_spill] sm:$0xff] %v3579_v18  ;;  %561 = vmatmul.f32.vlgmr.msrb.gmra.mxu1 %v3579_v18  ;;  %581 = vmatmul.f32.vlgmr.msrb.gmra.mxu2 %v3579_v18 }
 0x114   :  { %601 = vmatmul.f32.vlgmr.msra.gmra.mxu3 %v3579_v18  ;;  %807 = vmatpush.msrb.mxu1 %v3272_v44 }
 0x115   :  { %878 = vmatpush.msrb.mxu2 %v3221_v1  ;;  %898 = vmatpush.msra.mxu3 %v3270_v43  ;;  %v349_v1 = vpop.f32.mrf.mxu2 }
 0x116   :  { %808 = vmatpush.msrb.mxu1 %v3279_v49  ;;  %v3601_v32 = vadd.f32 %v349_v1, %v3569_v4 }
 0x117   :  { %879 = vmatpush.msrb.mxu2 %v3224_v3  ;;  %899 = vmatpush.msra.mxu3 %v3277_v48  ;;  %v4843_v3 = vld [vmem:[#allocation26_spill] sm:$0xff] }
 0x118   :  { %809 = vmatpush.msrb.mxu1 %v3285_v53  ;;  %4842 = vst [vmem:[#allocation46_spill] sm:$0xff] %v3601_v32 }
 0x119   :  { %880 = vmatpush.msrb.mxu2 %v3226_v5  ;;  %900 = vmatpush.msra.mxu3 %v3283_v52  ;;  %v4844_v5 = vld [vmem:[#allocation28_spill] sm:$0xff] }
 0x11a   :  { %810 = vmatpush.msrb.mxu1 %v3291_v57 }
 0x11b   :  { %881 = vmatpush.msrb.mxu2 %v3229_v7  ;;  %901 = vmatpush.msra.mxu3 %v3289_v56  ;;  %v4845_v7 = vld [vmem:[#allocation24_spill] sm:$0xff] }
 0x11c   :  { %811 = vmatpush.msrb.mxu1 %v3299_v61 }
 0x11d   :  { %882 = vmatpush.msrb.mxu2 %v3232_v9  ;;  %902 = vmatpush.msra.mxu3 %v3297_v60  ;;  %v4846_v9 = vld [vmem:[#allocation27_spill] sm:$0xff]  ;;  %v3650_v6 = vpop.f32.mrf.mxu2 }
 0x11e   :  { %812 = vmatpush.msrb.mxu1 %v3306_v2 }
 0x11f   :  { %883 = vmatpush.msrb.mxu2 %v3235_v11  ;;  %903 = vmatpush.msra.mxu3 %v3304_v0  ;;  %v4847_v11 = vld [vmem:[#allocation30_spill] sm:$0xff] }
 0x120   :  { %813 = vmatpush.msrb.mxu1 %v3312_v10  ;;  %4854 = vst [vmem:[#allocation30_spill] sm:$0xff] %v3650_v6 }
 0x121   :  { %884 = vmatpush.msrb.mxu2 %v3238_v13  ;;  %904 = vmatpush.msra.mxu3 %v3310_v8  ;;  %v4848_v13 = vld [vmem:[#allocation25_spill] sm:$0xff] }
 0x122   :  { %814 = vmatpush.msrb.mxu1 %v3318_v17 }
 0x123   :  { %885 = vmatpush.msrb.mxu2 %v3241_v15  ;;  %905 = vmatpush.msra.mxu3 %v3316_v16  ;;  %v4849_v15 = vld [vmem:[#allocation29_spill] sm:$0xff] }
 0x124   :  { %815 = vmatpush.msrb.mxu1 %v3326_v21 }
 0x125   :  { %886 = vmatpush.msrb.mxu2 %v3244_v19  ;;  %906 = vmatpush.msra.mxu3 %v3324_v20  ;;  %v293_v19 = vpop.f32.mrf.mxu1 }
 0x126   :  { %816 = vmatpush.msrb.mxu1 %v3334_v26  ;;  %v294_v59 = vadd.f32 %v293_v19, %v4857_v54 }
 0x127   :  { %887 = vmatpush.msrb.mxu2 %v3247_v22  ;;  %907 = vmatpush.msra.mxu3 %v3331_v24 }
 0x128   :  { %817 = vmatpush.msrb.mxu1 %v3340_v30 }
 0x129   :  { %888 = vmatpush.msrb.mxu2 %v3250_v25  ;;  %908 = vmatpush.msra.mxu3 %v3338_v29 }
 0x12a   :  { %818 = vmatpush.msrb.mxu1 %v3347_v35 }
 0x12b   :  { %889 = vmatpush.msrb.mxu2 %v3253_v27  ;;  %909 = vmatpush.msra.mxu3 %v3345_v33 }
 0x12c   :  { %819 = vmatpush.msrb.mxu1 %v3356_v42 }
 0x12d   :  { %890 = vmatpush.msrb.mxu2 %v3256_v31  ;;  %910 = vmatpush.msra.mxu3 %v3354_v39  ;;  %v3638_v22 = vpop.f32.mrf.mxu1 }
 0x12e   :  { %820 = vmatpush.msrb.mxu1 %v3364_v50 }
 0x12f   :  { %891 = vmatpush.msrb.mxu2 %v3259_v34  ;;  %911 = vmatpush.msra.mxu3 %v4843_v3 }
 0x130   :  { %821 = vmatpush.msrb.mxu1 %v4844_v5 }
 0x131   :  { %892 = vmatpush.msrb.mxu2 %v4845_v7  ;;  %912 = vmatpush.msra.mxu3 %v4846_v9 }
 0x132   :  { %822 = vmatpush.msrb.mxu1 %v4847_v11 }
 0x133   :  { %893 = vmatpush.msrb.mxu2 %v4848_v13  ;;  %913 = vmatpush.msra.mxu3 %v4849_v15 }
 0x135   :  { %v3640_v25 = vpop.f32.mrf.mxu1 }
 0x13d   :  { %v3642_v27 = vpop.f32.mrf.mxu1 }
 0x13e   :  { %4850 = vst [vmem:[#allocation26_spill] sm:$0xff] %v3642_v27 }
 0x145   :  { %v3644_v31 = vpop.f32.mrf.mxu1 }
 0x146   :  { %4851 = vst [vmem:[#allocation28_spill] sm:$0xff] %v3644_v31 }
 0x14d   :  { %v3646_v34 = vpop.f32.mrf.mxu1 }
 0x14e   :  { %4852 = vst [vmem:[#allocation24_spill] sm:$0xff] %v3646_v34 }
 0x155   :  { %v3648_v12 = vpop.f32.mrf.mxu1 }
 0x156   :  { %4853 = vst [vmem:[#allocation27_spill] sm:$0xff] %v3648_v12 }
 0x190   :  { %v562_v47 = vpop.f32.mrf.mxu1 }
 0x191   :  { %v605_v37 = vadd.f32 %v562_v47, %v253_v36 }
 0x193   :  { %v2567_v38 = vmul.f32 -1.442695, %v605_v37 }
 0x195   :  { %2625 = vpow2.f32 %v2567_v38 }
 0x196   :  { %v582_v62 = vpop.f32.mrf.mxu2 }
 0x197   :  { %v606_v51 = vadd.f32 %v582_v62, %v294_v59  ;;  %v602_v19 = vpop.f32.mrf.mxu3 }
 0x199   :  { %v2568_v14 = vmul.f32 -1.442695, %v606_v51 }
 0x19b   :  { %v2626_v58 = vpop.eup %2625  ;;  %2627 = vpow2.f32 %v2568_v14  ;;  %v645_v14 = vadd.f32 %v3567_v40, %v602_v19 }
 0x19c   :  { %v613_v41 = vadd.f32 1.0, %v2626_v58  ;;  %v4858_v58 = vld [vmem:[#allocation39_spill] sm:$0xff] }
 0x19e   :  { %2629 = vrcp.f32 %v613_v41  ;;  %v626_v28 = vand.u32 2147483648, %v613_v41  ;;  %v624_v36 = vand.u32 2147483647, %v613_v41  ;;  %vm620_vm9 = vweird.f32 %v613_v41 }
 0x1a0   :  { %v627_v59 = vor.u32 1.1754944e-38, %v626_v28  ;;  %vm625_vm11 = vcmp.eq.f32.partialorder %v624_v36, 8.507059e+37 }
 0x1a1   :  { %v2628_v46 = vpop.eup %2627 }
 0x1a2   :  { %v614_v1 = vadd.f32 1.0, %v2628_v46  ;;  %v335_v46 = vadd.f32 %v4858_v58, %v3569_v4 }
 0x1a4   :  { %v2630_v7 = vpop.eup %2629  ;;  %2631 = vrcp.f32 %v614_v1  ;;  %v639_v55 = vand.u32 2147483647, %v614_v1  ;;  %vm635_vm13 = vweird.f32 %v614_v1 }
 0x1a5   :  { %v616_v13 = vmul.f32 %v2630_v7, %v613_v41  ;;  %vm621_vm8 = vweird.f32 %v2630_v7 }
 0x1a6   :  { %vm622_vm10 = vmor %vm620_vm9, %vm621_vm8  ;;  %vm640_vm15 = vcmp.eq.f32.partialorder %v639_v55, 8.507059e+37  ;;  %v3670_v55 = vld [vmem:[#allocation8 + $0x150] sm:$0xff] }
 0x1a7   :  { %v617_v6 = vsub.f32 1.0, %v616_v13 }
 0x1a9   :  { %v618_v12 = vmul.f32 %v2630_v7, %v617_v6  ;;  %v641_v6 = vand.u32 2147483648, %v614_v1 }
 0x1aa   :  { %v2632_v47 = vpop.eup %2631 }
 0x1ab   :  { %v631_v37 = vmul.f32 %v2632_v47, %v614_v1  ;;  %v619_v38 = vadd.f32 %v2630_v7, %v618_v12  ;;  %vm636_vm12 = vweird.f32 %v2632_v47  ;;  %v642_v41 = vor.u32 1.1754944e-38, %v641_v6 }
 0x1ac   :  { %vm637_vm14 = vmor %vm635_vm13, %vm636_vm12 }
 0x1ad   :  { %v632_v62 = vsub.f32 1.0, %v631_v37  ;;  %v623_v51 = vsel %vm622_vm10, %v2630_v7, %v619_v38 }
 0x1ae   :  { %v628_v13 = vsel %vm625_vm11, %v627_v59, %v623_v51 }
 0x1af   :  { %v633_v32 = vmul.f32 %v2632_v47, %v632_v62  ;;  %v646_v34 = vmul.f32 %v645_v14, %v628_v13 }
 0x1b1   :  { %v634_v31 = vadd.f32 %v2632_v47, %v633_v32  ;;  %v647_v12 = vadd.f32 %v646_v34, %v335_v46  ;;  %v3665_v32 = vld [vmem:[#allocation8 + $0x168] sm:$0xff] }
 0x1b3   :  { %v638_v28 = vsel %vm637_vm14, %v2632_v47, %v634_v31  ;;  %2633 = vtanh.f32 %v647_v12  ;;  %v3675_v31 = vld [vmem:[#allocation8 + $0x138] sm:$0xff] }
 0x1b4   :  { %v643_v7 = vsel %vm640_vm15, %v642_v41, %v638_v28  ;;  %v4864_v41 = vld [vmem:[#allocation41_spill] sm:$0xff] }
 0x1b5   :  { %v649_v36 = vsub.f32 1.0, %v643_v7  ;;  %v651_v38 = vmul.f32 %v643_v7, %v3579_v18  ;;  %v338_v28 = vadd.f32 %v4864_v41, %v3569_v4  ;;  %v3838_v41 = vld [vmem:[#allocation8 + $0x68] sm:$0xff] }
 0x1b9   :  { %v2634_v19 = vpop.eup %2633 }
 0x1ba   :  { %v650_v37 = vmul.f32 %v2634_v19, %v649_v36 }
 0x1bc   :  { %v3659_v59 = vadd.f32 %v651_v38, %v650_v37 }
 0x1be   :  { %4859 = vst [vmem:[#allocation25_spill] sm:$0xff] %v3659_v59  ;;  %672 = vmatmul.f32.vlgmr.msra.gmra.mxu0 %v3659_v59  ;;  %692 = vmatmul.f32.vlgmr.msra.gmra.mxu1 %v3659_v59 }
 0x1bf   :  { %712 = vmatmul.f32.vlgmr.msra.gmra.mxu2 %v3659_v59  ;;  %918 = vmatpush.msra.mxu0 %v3272_v44  ;;  %v3680_v44 = vld [vmem:[#allocation8 + $0x120] sm:$0xff] }
 0x1c0   :  { %989 = vmatpush.msra.mxu1 %v3665_v32  ;;  %1009 = vmatpush.msra.mxu2 %v3270_v43  ;;  %v3685_v43 = vld [vmem:[#allocation8 + $0x108] sm:$0xff] }
 0x1c1   :  { %919 = vmatpush.msra.mxu0 %v3279_v49  ;;  %v3695_v49 = vld [vmem:[#allocation8 + $0xd8] sm:$0xff] }
 0x1c2   :  { %990 = vmatpush.msra.mxu1 %v3670_v55  ;;  %1010 = vmatpush.msra.mxu2 %v3277_v48  ;;  %v3690_v48 = vld [vmem:[#allocation8 + $0xf0] sm:$0xff] }
 0x1c3   :  { %920 = vmatpush.msra.mxu0 %v3285_v53  ;;  %v3705_v53 = vld [vmem:[#allocation8 + $0xa8] sm:$0xff] }
 0x1c4   :  { %991 = vmatpush.msra.mxu1 %v3675_v31  ;;  %1011 = vmatpush.msra.mxu2 %v3283_v52  ;;  %v3700_v52 = vld [vmem:[#allocation8 + $0xc0] sm:$0xff] }
 0x1c5   :  { %921 = vmatpush.msra.mxu0 %v3291_v57  ;;  %v3715_v57 = vld [vmem:[#allocation8 + $0x78] sm:$0xff] }
 0x1c6   :  { %992 = vmatpush.msra.mxu1 %v3680_v44  ;;  %1012 = vmatpush.msra.mxu2 %v3289_v56  ;;  %v3710_v56 = vld [vmem:[#allocation8 + $0x90] sm:$0xff] }
 0x1c7   :  { %922 = vmatpush.msra.mxu0 %v3299_v61  ;;  %v3725_v61 = vld [vmem:[#allocation8 + $0x48] sm:$0xff] }
 0x1c8   :  { %993 = vmatpush.msra.mxu1 %v3685_v43  ;;  %1013 = vmatpush.msra.mxu2 %v3297_v60  ;;  %v3720_v60 = vld [vmem:[#allocation8 + $0x60] sm:$0xff] }
 0x1c9   :  { %923 = vmatpush.msra.mxu0 %v3306_v2  ;;  %v3735_v2 = vld [vmem:[#allocation8 + $0x18] sm:$0xff] }
 0x1ca   :  { %994 = vmatpush.msra.mxu1 %v3690_v48  ;;  %1014 = vmatpush.msra.mxu2 %v3304_v0  ;;  %v3730_v0 = vld [vmem:[#allocation8 + $0x30] sm:$0xff]  ;;  %4861 = vst [vmem:[#allocation32_spill] sm:$0xff] %v3735_v2 }
 0x1cb   :  { %924 = vmatpush.msra.mxu0 %v3312_v10  ;;  %4860 = vst [vmem:[#allocation29_spill] sm:$0xff] %v3730_v0  ;;  %v4863_v10 = vld [vmem:[#allocation33_spill] sm:$0xff] }
 0x1cc   :  { %995 = vmatpush.msra.mxu1 %v3695_v49  ;;  %1015 = vmatpush.msra.mxu2 %v3310_v8  ;;  %v3740_v8 = vld [vmem:[#allocation8] sm:$0xff] }
 0x1cd   :  { %925 = vmatpush.msra.mxu0 %v3318_v17  ;;  %4862 = vst [vmem:[#allocation31_spill] sm:$0xff] %v3740_v8  ;;  %v297_v17 = vadd.f32 %v3638_v22, %v4857_v54 }
 0x1ce   :  { %996 = vmatpush.msra.mxu1 %v3700_v52  ;;  %1016 = vmatpush.msra.mxu2 %v3316_v16  ;;  %v256_v16 = vadd.f32 %v4863_v10, %v4855_v45 }
 0x1cf   :  { %926 = vmatpush.msra.mxu0 %v3326_v21 }
 0x1d0   :  { %997 = vmatpush.msra.mxu1 %v3705_v53  ;;  %1017 = vmatpush.msra.mxu2 %v3324_v20 }
 0x1d1   :  { %927 = vmatpush.msra.mxu0 %v3334_v26 }
 0x1d2   :  { %998 = vmatpush.msra.mxu1 %v3710_v56  ;;  %1018 = vmatpush.msra.mxu2 %v3331_v24 }
 0x1d3   :  { %928 = vmatpush.msra.mxu0 %v3340_v30 }
 0x1d4   :  { %999 = vmatpush.msra.mxu1 %v3715_v57  ;;  %1019 = vmatpush.msra.mxu2 %v3338_v29 }
 0x1d5   :  { %929 = vmatpush.msra.mxu0 %v3347_v35 }
 0x1d6   :  { %1000 = vmatpush.msra.mxu1 %v3720_v60  ;;  %1020 = vmatpush.msra.mxu2 %v3345_v33 }
 0x1d7   :  { %930 = vmatpush.msra.mxu0 %v3356_v42 }
 0x1d8   :  { %1001 = vmatpush.msra.mxu1 %v3725_v61  ;;  %1021 = vmatpush.msra.mxu2 %v3354_v39 }
 0x1d9   :  { %931 = vmatpush.msra.mxu0 %v3364_v50 }
 0x1da   :  { %1002 = vmatpush.msra.mxu1 %v3730_v0  ;;  %1022 = vmatpush.msra.mxu2 %v4843_v3 }
 0x1db   :  { %932 = vmatpush.msra.mxu0 %v4844_v5 }
 0x1dc   :  { %1003 = vmatpush.msra.mxu1 %v3735_v2  ;;  %1023 = vmatpush.msra.mxu2 %v4846_v9 }
 0x1dd   :  { %933 = vmatpush.msra.mxu0 %v4847_v11 }
 0x1de   :  { %1004 = vmatpush.msra.mxu1 %v3740_v8  ;;  %1024 = vmatpush.msra.mxu2 %v4849_v15 }
 0x23b   :  { %v673_v20 = vpop.f32.mrf.mxu0  ;;  %v693_v21 = vpop.f32.mrf.mxu1 }
 0x23c   :  { %v716_v24 = vadd.f32 %v673_v20, %v256_v16  ;;  %v717_v26 = vadd.f32 %v693_v21, %v297_v17 }
 0x23e   :  { %v2569_v29 = vmul.f32 -1.442695, %v716_v24  ;;  %v2570_v30 = vmul.f32 -1.442695, %v717_v26 }
 0x240   :  { %2635 = vpow2.f32 %v2569_v29  ;;  %v3757_v29 = vld [vmem:[#allocation8 + $0x178] sm:$0xff] }
 0x241   :  { %2637 = vpow2.f32 %v2570_v30  ;;  %v3761_v30 = vld [vmem:[#allocation8 + $0x170] sm:$0xff] }
 0x242   :  { %v713_v51 = vpop.f32.mrf.mxu2 }
 0x243   :  { %v756_v13 = vadd.f32 %v3567_v40, %v713_v51  ;;  %v3813_v51 = vld [vmem:[#allocation8 + $0xb8] sm:$0xff] }
 0x246   :  { %v2636_v33 = vpop.eup %2635 }
 0x247   :  { %v2638_v35 = vpop.eup %2637  ;;  %v724_v39 = vadd.f32 1.0, %v2636_v33  ;;  %v3764_v33 = vld [vmem:[#allocation8 + $0x160] sm:$0xff] }
 0x248   :  { %v725_v42 = vadd.f32 1.0, %v2638_v35  ;;  %v3768_v35 = vld [vmem:[#allocation8 + $0x158] sm:$0xff] }
 0x249   :  { %2639 = vrcp.f32 %v724_v39  ;;  %v737_v34 = vand.u32 2147483648, %v724_v39  ;;  %v735_v47 = vand.u32 2147483647, %v724_v39  ;;  %vm731_vm1 = vweird.f32 %v724_v39 }
 0x24a   :  { %2641 = vrcp.f32 %v725_v42  ;;  %v752_v7 = vand.u32 2147483648, %v725_v42  ;;  %vm746_vm5 = vweird.f32 %v725_v42  ;;  %v750_v19 = vand.u32 2147483647, %v725_v42 }
 0x24b   :  { %v738_v58 = vor.u32 1.1754944e-38, %v737_v34  ;;  %vm736_vm3 = vcmp.eq.f32.partialorder %v735_v47, 8.507059e+37  ;;  %v3799_v34 = vld [vmem:[#allocation8 + $0xe8] sm:$0xff]  ;;  %v3806_v47 = vld [vmem:[#allocation8 + $0xd0] sm:$0xff] }
 0x24c   :  { %v753_v10 = vor.u32 1.1754944e-38, %v752_v7  ;;  %vm751_vm7 = vcmp.eq.f32.partialorder %v750_v19, 8.507059e+37  ;;  %v3845_v7 = vld [vmem:[#allocation8 + $0x50] sm:$0xff]  ;;  %v3852_v19 = vld [vmem:[#allocation8 + $0x38] sm:$0xff] }
 0x24d   :  { %4865 = vst [vmem:[#allocation39_spill] sm:$0xff] %v3852_v19 }
 0x24f   :  { %v2640_v50 = vpop.eup %2639 }
 0x250   :  { %v2642_v3 = vpop.eup %2641  ;;  %v727_v5 = vmul.f32 %v2640_v50, %v724_v39  ;;  %vm732_vm0 = vweird.f32 %v2640_v50  ;;  %v3771_v39 = vld [vmem:[#allocation8 + $0x148] sm:$0xff] }
 0x251   :  { %v742_v9 = vmul.f32 %v2642_v3, %v725_v42  ;;  %vm733_vm2 = vmor %vm731_vm1, %vm732_vm0  ;;  %vm747_vm4 = vweird.f32 %v2642_v3  ;;  %v3775_v42 = vld [vmem:[#allocation8 + $0x140] sm:$0xff] }
 0x252   :  { %v728_v15 = vsub.f32 1.0, %v727_v5  ;;  %vm748_vm6 = vmor %vm746_vm5, %vm747_vm4  ;;  %v3785_v5 = vld [vmem:[#allocation8 + $0x118] sm:$0xff] }
 0x253   :  { %v743_v22 = vsub.f32 1.0, %v742_v9  ;;  %v3789_v9 = vld [vmem:[#allocation8 + $0x110] sm:$0xff] }
 0x254   :  { %v729_v1 = vmul.f32 %v2640_v50, %v728_v15  ;;  %v3792_v15 = vld [vmem:[#allocation8 + $0x100] sm:$0xff] }
 0x255   :  { %v744_v62 = vmul.f32 %v2642_v3, %v743_v22  ;;  %v3796_v22 = vld [vmem:[#allocation8 + $0xf8] sm:$0xff] }
 0x256   :  { %v730_v14 = vadd.f32 %v2640_v50, %v729_v1  ;;  %v3803_v1 = vld [vmem:[#allocation8 + $0xe0] sm:$0xff] }
 0x257   :  { %v745_v6 = vadd.f32 %v2642_v3, %v744_v62  ;;  %v3810_v62 = vld [vmem:[#allocation8 + $0xc8] sm:$0xff] }
 0x258   :  { %v734_v46 = vsel %vm733_vm2, %v2640_v50, %v730_v14  ;;  %v3778_v50 = vld [vmem:[#allocation8 + $0x130] sm:$0xff] }
 0x259   :  { %v739_v12 = vsel %vm736_vm3, %v738_v58, %v734_v46  ;;  %v749_v38 = vsel %vm748_vm6, %v2642_v3, %v745_v6  ;;  %v3782_v3 = vld [vmem:[#allocation8 + $0x128] sm:$0xff]  ;;  %v3817_v14 = vld [vmem:[#allocation8 + $0xb0] sm:$0xff]  ;;  %v3820_v58 = vld [vmem:[#allocation8 + $0xa0] sm:$0xff] }
 0x25a   :  { %v757_v36 = vmul.f32 %v756_v13, %v739_v12  ;;  %v754_v16 = vsel %vm751_vm7, %v753_v10, %v749_v38  ;;  %v3824_v46 = vld [vmem:[#allocation8 + $0x98] sm:$0xff]  ;;  %v3827_v13 = vld [vmem:[#allocation8 + $0x88] sm:$0xff]  ;;  %v3831_v6 = vld [vmem:[#allocation8 + $0x80] sm:$0xff] }
 0x25b   :  { %v760_v17 = vsub.f32 1.0, %v754_v16  ;;  %v762_v24 = vmul.f32 %v754_v16, %v3659_v59  ;;  %v3834_v12 = vld [vmem:[#allocation8 + $0x70] sm:$0xff]  ;;  %v3859_v38 = vld [vmem:[#allocation8 + $0x20] sm:$0xff]  ;;  %v3864_v10 = vld [vmem:[#allocation8 + $0x8] sm:$0xff]  ;;  %v300_v16 = vadd.f32 %v3640_v25, %v4857_v54 }
 0x25c   :  { %v758_v37 = vadd.f32 %v757_v36, %v338_v28  ;;  %v3841_v28 = vld [vmem:[#allocation8 + $0x58] sm:$0xff]  ;;  %v3848_v36 = vld [vmem:[#allocation8 + $0x40] sm:$0xff]  ;;  %4867 = vst [vmem:[#allocation41_spill] sm:$0xff] %v3859_v38 }
 0x25d   :  { %4868 = vst [vmem:[#allocation47_spill] sm:$0xff] %v3864_v10 }
 0x25e   :  { %2643 = vtanh.f32 %v758_v37  ;;  %v3855_v37 = vld [vmem:[#allocation8 + $0x28] sm:$0xff] }
 0x25f   :  { %4866 = vst [vmem:[#allocation33_spill] sm:$0xff] %v3855_v37 }
 0x264   :  { %v2644_v20 = vpop.eup %2643 }
 0x265   :  { %v761_v21 = vmul.f32 %v2644_v20, %v760_v17 }
 0x267   :  { %v3752_v26 = vadd.f32 %v762_v24, %v761_v21  ;;  %v4869_v24 = vld [vmem:[#allocation34_spill] sm:$0xff] }
 0x268   :  { %v259_v4 = vadd.f32 %v4869_v24, %v4855_v45 }
 0x269   :  { %783 = vmatmul.f32.vlgmr.msrb.gmra.mxu3 %v3752_v26  ;;  %803 = vmatmul.f32.vlgmr.msrb.gmra.mxu0 %v3752_v26 }
 0x26a   :  { %823 = vmatmul.f32.vlgmr.msrb.gmra.mxu1 %v3752_v26  ;;  %1029 = vmatpush.msrb.mxu3 %v3757_v29 }
 0x26b   :  { %1100 = vmatpush.msrb.mxu0 %v3665_v32  ;;  %1120 = vmatpush.msrb.mxu1 %v3761_v30 }
 0x26c   :  { %1030 = vmatpush.msrb.mxu3 %v3764_v33 }
 0x26d   :  { %1101 = vmatpush.msrb.mxu0 %v3670_v55  ;;  %1121 = vmatpush.msrb.mxu1 %v3768_v35 }
 0x26e   :  { %1031 = vmatpush.msrb.mxu3 %v3771_v39 }
 0x26f   :  { %1102 = vmatpush.msrb.mxu0 %v3675_v31  ;;  %1122 = vmatpush.msrb.mxu1 %v3775_v42 }
 0x270   :  { %1032 = vmatpush.msrb.mxu3 %v3778_v50 }
 0x271   :  { %1103 = vmatpush.msrb.mxu0 %v3680_v44  ;;  %1123 = vmatpush.msrb.mxu1 %v3782_v3 }
 0x272   :  { %1033 = vmatpush.msrb.mxu3 %v3785_v5 }
 0x273   :  { %1104 = vmatpush.msrb.mxu0 %v3685_v43  ;;  %1124 = vmatpush.msrb.mxu1 %v3789_v9 }
 0x274   :  { %1034 = vmatpush.msrb.mxu3 %v3792_v15 }
 0x275   :  { %1105 = vmatpush.msrb.mxu0 %v3690_v48  ;;  %1125 = vmatpush.msrb.mxu1 %v3796_v22 }
 0x276   :  { %1035 = vmatpush.msrb.mxu3 %v3799_v34 }
 0x277   :  { %1106 = vmatpush.msrb.mxu0 %v3695_v49  ;;  %1126 = vmatpush.msrb.mxu1 %v3803_v1 }
 0x278   :  { %1036 = vmatpush.msrb.mxu3 %v3806_v47 }
 0x279   :  { %1107 = vmatpush.msrb.mxu0 %v3700_v52  ;;  %1127 = vmatpush.msrb.mxu1 %v3810_v62 }
 0x27a   :  { %1037 = vmatpush.msrb.mxu3 %v3813_v51 }
 0x27b   :  { %1108 = vmatpush.msrb.mxu0 %v3705_v53  ;;  %1128 = vmatpush.msrb.mxu1 %v3817_v14 }
 0x27c   :  { %1038 = vmatpush.msrb.mxu3 %v3820_v58 }
 0x27d   :  { %1109 = vmatpush.msrb.mxu0 %v3710_v56  ;;  %1129 = vmatpush.msrb.mxu1 %v3824_v46 }
 0x27e   :  { %1039 = vmatpush.msrb.mxu3 %v3827_v13 }
 0x27f   :  { %1110 = vmatpush.msrb.mxu0 %v3715_v57  ;;  %1130 = vmatpush.msrb.mxu1 %v3831_v6 }
 0x280   :  { %1040 = vmatpush.msrb.mxu3 %v3834_v12 }
 0x281   :  { %1111 = vmatpush.msrb.mxu0 %v3720_v60  ;;  %1131 = vmatpush.msrb.mxu1 %v3838_v41 }
 0x282   :  { %1041 = vmatpush.msrb.mxu3 %v3841_v28 }
 0x283   :  { %1112 = vmatpush.msrb.mxu0 %v3725_v61  ;;  %1132 = vmatpush.msrb.mxu1 %v3845_v7 }
 0x284   :  { %1042 = vmatpush.msrb.mxu3 %v3848_v36 }
 0x285   :  { %1113 = vmatpush.msrb.mxu0 %v3730_v0  ;;  %1133 = vmatpush.msrb.mxu1 %v3852_v19 }
 0x286   :  { %1043 = vmatpush.msrb.mxu3 %v3855_v37 }
 0x287   :  { %1114 = vmatpush.msrb.mxu0 %v3735_v2  ;;  %1134 = vmatpush.msrb.mxu1 %v3859_v38 }
 0x288   :  { %1044 = vmatpush.msrb.mxu3 %v4847_v11 }
 0x289   :  { %1115 = vmatpush.msrb.mxu0 %v3740_v8  ;;  %1135 = vmatpush.msrb.mxu1 %v3864_v10 }
 0x2e6   :  { %v804_v17 = vpop.f32.mrf.mxu0 }
 0x2e7   :  { %v828_v20 = vadd.f32 %v804_v17, %v300_v16 }
 0x2e9   :  { %v2572_v21 = vmul.f32 -1.442695, %v828_v20 }
 0x2eb   :  { %2645 = vpow2.f32 %v2572_v21 }
 0x2ec   :  { %v784_v59 = vpop.f32.mrf.mxu3 }
 0x2ed   :  { %v827_v18 = vadd.f32 %v784_v59, %v259_v4  ;;  %v824_v4 = vpop.f32.mrf.mxu1 }
 0x2ee   :  { %v867_v59 = vadd.f32 %v3567_v40, %v824_v4 }
 0x2ef   :  { %v2571_v63 = vmul.f32 -1.442695, %v827_v18 }
 0x2f1   :  { %v2646_v11 = vpop.eup %2645  ;;  %2647 = vpow2.f32 %v2571_v63 }
 0x2f2   :  { %v836_v27 = vadd.f32 1.0, %v2646_v11 }
 0x2f4   :  { %2649 = vrcp.f32 %v836_v27  ;;  %v863_v19 = vand.u32 2147483648, %v836_v27  ;;  %vm857_vm13 = vweird.f32 %v836_v27 }
 0x2f6   :  { %v864_v0 = vor.u32 1.1754944e-38, %v863_v19 }
 0x2f7   :  { %v2648_v8 = vpop.eup %2647 }
 0x2f8   :  { %v835_v38 = vadd.f32 1.0, %v2648_v8 }
 0x2fa   :  { %2651 = vrcp.f32 %v835_v38  ;;  %v2650_v10 = vpop.eup %2649  ;;  %v848_v20 = vand.u32 2147483648, %v835_v38  ;;  %v846_v45 = vand.u32 2147483647, %v835_v38  ;;  %vm842_vm9 = vweird.f32 %v835_v38 }
 0x2fb   :  { %v853_v2 = vmul.f32 %v2650_v10, %v836_v27  ;;  %vm858_vm12 = vweird.f32 %v2650_v10 }
 0x2fc   :  { %v849_v63 = vor.u32 1.1754944e-38, %v848_v20  ;;  %vm847_vm11 = vcmp.eq.f32.partialorder %v846_v45, 8.507059e+37  ;;  %vm859_vm14 = vmor %vm857_vm13, %vm858_vm12 }
 0x2fd   :  { %v854_v16 = vsub.f32 1.0, %v853_v2 }
 0x2ff   :  { %v855_v21 = vmul.f32 %v2650_v10, %v854_v16 }
 0x300   :  { %v2652_v25 = vpop.eup %2651 }
 0x301   :  { %v838_v54 = vmul.f32 %v2652_v25, %v835_v38  ;;  %vm843_vm8 = vweird.f32 %v2652_v25  ;;  %v856_v24 = vadd.f32 %v2650_v10, %v855_v21 }
 0x302   :  { %vm844_vm10 = vmor %vm842_vm9, %vm843_vm8 }
 0x303   :  { %v839_v17 = vsub.f32 1.0, %v838_v54  ;;  %v861_v54 = vand.u32 2147483647, %v836_v27  ;;  %v860_v16 = vsel %vm859_vm14, %v2650_v10, %v856_v24  ;;  %v4871_v27 = vld [vmem:[#allocation39_spill] sm:$0xff] }
 0x305   :  { %v840_v37 = vmul.f32 %v2652_v25, %v839_v17  ;;  %vm862_vm15 = vcmp.eq.f32.partialorder %v861_v54, 8.507059e+37 }
 0x307   :  { %v841_v18 = vadd.f32 %v2652_v25, %v840_v37  ;;  %v865_v37 = vsel %vm862_vm15, %v864_v0, %v860_v16 }
 0x308   :  { %v871_v38 = vsub.f32 1.0, %v865_v37 }
 0x309   :  { %v845_v8 = vsel %vm844_vm10, %v2652_v25, %v841_v18  ;;  %v873_v25 = vmul.f32 %v865_v37, %v3752_v26  ;;  %v4880_v37 = vld [vmem:[#allocation43_spill] sm:$0xff] }
 0x30a   :  { %v850_v11 = vsel %vm847_vm11, %v849_v63, %v845_v8 }
 0x30b   :  { %v868_v2 = vmul.f32 %v867_v59, %v850_v11 }
 0x30d   :  { %v869_v17 = vadd.f32 %v868_v2, %v3574_v23  ;;  %v4870_v23 = vld [vmem:[#allocation29_spill] sm:$0xff] }
 0x30f   :  { %2653 = vtanh.f32 %v869_v17 }
 0x315   :  { %v2654_v20 = vpop.eup %2653 }
 0x316   :  { %v872_v45 = vmul.f32 %v2654_v20, %v871_v38 }
 0x318   :  { %v3874_v21 = vadd.f32 %v873_v25, %v872_v45 }
 0x31a   :  { %894 = vmatmul.f32.vlgmr.msrb.gmra.mxu2 %v3874_v21  ;;  %914 = vmatmul.f32.vlgmr.msra.gmra.mxu3 %v3874_v21 }
 0x31b   :  { %934 = vmatmul.f32.vlgmr.msra.gmra.mxu0 %v3874_v21  ;;  %1140 = vmatpush.msrb.mxu2 %v3757_v29 }
 0x31c   :  { %1211 = vmatpush.msra.mxu3 %v3665_v32  ;;  %1231 = vmatpush.msra.mxu0 %v3761_v30  ;;  %v4872_v32 = vld [vmem:[#allocation33_spill] sm:$0xff] }
 0x31d   :  { %1141 = vmatpush.msrb.mxu2 %v3764_v33 }
 0x31e   :  { %1212 = vmatpush.msra.mxu3 %v3670_v55  ;;  %1232 = vmatpush.msra.mxu0 %v3768_v35  ;;  %v4873_v55 = vld [vmem:[#allocation32_spill] sm:$0xff] }
 0x31f   :  { %1142 = vmatpush.msrb.mxu2 %v3771_v39 }
 0x320   :  { %1213 = vmatpush.msra.mxu3 %v3675_v31  ;;  %1233 = vmatpush.msra.mxu0 %v3775_v42  ;;  %v4874_v31 = vld [vmem:[#allocation41_spill] sm:$0xff] }
 0x321   :  { %1143 = vmatpush.msrb.mxu2 %v3778_v50 }
 0x322   :  { %1214 = vmatpush.msra.mxu3 %v3680_v44  ;;  %1234 = vmatpush.msra.mxu0 %v3782_v3  ;;  %v3924_v44 = vld [vmem:[#allocation8 + $0x10] sm:$0xff] }
 0x323   :  { %1144 = vmatpush.msrb.mxu2 %v3785_v5 }
 0x324   :  { %1215 = vmatpush.msra.mxu3 %v3685_v43  ;;  %1235 = vmatpush.msra.mxu0 %v3789_v9  ;;  %v4875_v43 = vld [vmem:[#allocation31_spill] sm:$0xff] }
 0x325   :  { %1145 = vmatpush.msrb.mxu2 %v3792_v15 }
 0x326   :  { %1216 = vmatpush.msra.mxu3 %v3690_v48  ;;  %1236 = vmatpush.msra.mxu0 %v3796_v22  ;;  %v4876_v48 = vld [vmem:[#allocation47_spill] sm:$0xff] }
 0x327   :  { %1146 = vmatpush.msrb.mxu2 %v3799_v34 }
 0x328   :  { %1217 = vmatpush.msra.mxu3 %v3695_v49  ;;  %1237 = vmatpush.msra.mxu0 %v3803_v1  ;;  %v4877_v49 = vld [vmem:[#allocation35_spill] sm:$0xff] }
 0x329   :  { %1147 = vmatpush.msrb.mxu2 %v3806_v47 }
 0x32a   :  { %1218 = vmatpush.msra.mxu3 %v3700_v52  ;;  %1238 = vmatpush.msra.mxu0 %v3810_v62  ;;  %v4878_v52 = vld [vmem:[#allocation26_spill] sm:$0xff] }
 0x32b   :  { %1148 = vmatpush.msrb.mxu2 %v3813_v51 }
 0x32c   :  { %1219 = vmatpush.msra.mxu3 %v3705_v53  ;;  %1239 = vmatpush.msra.mxu0 %v3817_v14  ;;  %v303_v53 = vadd.f32 %v4878_v52, %v4877_v49  ;;  %v1337_v52 = vld [vmem:[#allocation11 + $0x90] sm:$0xff] }
 0x32d   :  { %1149 = vmatpush.msrb.mxu2 %v3820_v58 }
 0x32e   :  { %1220 = vmatpush.msra.mxu3 %v3710_v56  ;;  %1240 = vmatpush.msra.mxu0 %v3824_v46 }
 0x32f   :  { %1150 = vmatpush.msrb.mxu2 %v3827_v13 }
 0x330   :  { %1221 = vmatpush.msra.mxu3 %v3715_v57  ;;  %1241 = vmatpush.msra.mxu0 %v3831_v6 }
 0x331   :  { %1151 = vmatpush.msrb.mxu2 %v3834_v12 }
 0x332   :  { %1222 = vmatpush.msra.mxu3 %v3720_v60  ;;  %1242 = vmatpush.msra.mxu0 %v3838_v41  ;;  %v4879_v60 = vld [vmem:[#allocation36_spill] sm:$0xff] }
 0x333   :  { %1152 = vmatpush.msrb.mxu2 %v3841_v28 }
 0x334   :  { %1223 = vmatpush.msra.mxu3 %v3725_v61  ;;  %1243 = vmatpush.msra.mxu0 %v3845_v7 }
 0x335   :  { %1153 = vmatpush.msrb.mxu2 %v3848_v36 }
 0x336   :  { %1224 = vmatpush.msra.mxu3 %v4870_v23  ;;  %1244 = vmatpush.msra.mxu0 %v4871_v27 }
 0x337   :  { %1154 = vmatpush.msrb.mxu2 %v4872_v32 }
 0x338   :  { %1225 = vmatpush.msra.mxu3 %v4873_v55  ;;  %1245 = vmatpush.msra.mxu0 %v4874_v31 }
 0x339   :  { %1155 = vmatpush.msrb.mxu2 %v3924_v44 }
 0x33a   :  { %1226 = vmatpush.msra.mxu3 %v4875_v43  ;;  %1246 = vmatpush.msra.mxu0 %v4876_v48  ;;  %v1340_v43 = vld [vmem:[#allocation11 + $0xa8] sm:$0xff] }
 0x398   :  { %v935_v4 = vpop.f32.mrf.mxu0 }
 0x399   :  { %v978_v8 = vadd.f32 %v3567_v40, %v935_v4 }
 0x39d   :  { %v895_v56 = vpop.f32.mrf.mxu2  ;;  %v915_v57 = vpop.f32.mrf.mxu3 }
 0x39e   :  { %v938_v61 = vadd.f32 %v895_v56, %v4879_v60  ;;  %v939_v0 = vadd.f32 %v915_v57, %v303_v53  ;;  %v1334_v56 = vld [vmem:[#allocation11 + $0x78] sm:$0xff]  ;;  %v1331_v60 = vld [vmem:[#allocation11 + $0x60] sm:$0xff] }
 0x3a0   :  { %v2573_v30 = vmul.f32 -1.442695, %v938_v61  ;;  %v2574_v35 = vmul.f32 -1.442695, %v939_v0  ;;  %v1328_v61 = vld [vmem:[#allocation11 + $0x48] sm:$0xff]  ;;  %v1325_v0 = vld [vmem:[#allocation11 + $0x30] sm:$0xff] }
 0x3a2   :  { %2655 = vpow2.f32 %v2573_v30 }
 0x3a3   :  { %2657 = vpow2.f32 %v2574_v35  ;;  %v1322_v35 = vld [vmem:[#allocation11 + $0x18] sm:$0xff] }
 0x3a8   :  { %v2656_v42 = vpop.eup %2655 }
 0x3a9   :  { %v2658_v3 = vpop.eup %2657  ;;  %v946_v9 = vadd.f32 1.0, %v2656_v42 }
 0x3aa   :  { %v947_v22 = vadd.f32 1.0, %v2658_v3  ;;  %v1319_v3 = vld [vmem:[#allocation11] sm:$0xff] }
 0x3ab   :  { %2659 = vrcp.f32 %v946_v9  ;;  %v959_v41 = vand.u32 2147483648, %v946_v9  ;;  %v957_v10 = vand.u32 2147483647, %v946_v9  ;;  %vm953_vm1 = vweird.f32 %v946_v9 }
 0x3ac   :  { %2661 = vrcp.f32 %v947_v22  ;;  %v974_v17 = vand.u32 2147483648, %v947_v22  ;;  %vm968_vm5 = vweird.f32 %v947_v22  ;;  %v972_v16 = vand.u32 2147483647, %v947_v22 }
 0x3ad   :  { %v960_v59 = vor.u32 1.1754944e-38, %v959_v41  ;;  %vm958_vm3 = vcmp.eq.f32.partialorder %v957_v10, 8.507059e+37 }
 0x3ae   :  { %v975_v25 = vor.u32 1.1754944e-38, %v974_v17  ;;  %vm973_vm7 = vcmp.eq.f32.partialorder %v972_v16, 8.507059e+37  ;;  %v4883_v16 = vld [vmem:[#allocation45_spill] sm:$0xff] }
 0x3b1   :  { %v2660_v1 = vpop.eup %2659 }
 0x3b2   :  { %v2662_v62 = vpop.eup %2661  ;;  %v949_v14 = vmul.f32 %v2660_v1, %v946_v9  ;;  %vm954_vm0 = vweird.f32 %v2660_v1 }
 0x3b3   :  { %v964_v46 = vmul.f32 %v2662_v62, %v947_v22  ;;  %vm955_vm2 = vmor %vm953_vm1, %vm954_vm0  ;;  %vm969_vm4 = vweird.f32 %v2662_v62 }
 0x3b4   :  { %v950_v6 = vsub.f32 1.0, %v949_v14  ;;  %vm970_vm6 = vmor %vm968_vm5, %vm969_vm4 }
 0x3b5   :  { %v965_v7 = vsub.f32 1.0, %v964_v46 }
 0x3b6   :  { %v951_v19 = vmul.f32 %v2660_v1, %v950_v6 }
 0x3b7   :  { %v966_v18 = vmul.f32 %v2662_v62, %v965_v7 }
 0x3b8   :  { %v952_v63 = vadd.f32 %v2660_v1, %v951_v19 }
 0x3b9   :  { %v967_v2 = vadd.f32 %v2662_v62, %v966_v18 }
 0x3ba   :  { %v956_v24 = vsel %vm955_vm2, %v2660_v1, %v952_v63  ;;  %v3962_v63 = vld [vmem:[%s4761_s4] ss:$0 sm:$0xff] }
 0x3bb   :  { %v961_v11 = vsel %vm958_vm3, %v960_v59, %v956_v24  ;;  %v971_v20 = vsel %vm970_vm6, %v2662_v62, %v967_v2 }
 0x3bc   :  { %v979_v54 = vmul.f32 %v978_v8, %v961_v11  ;;  %v976_v45 = vsel %vm973_vm7, %v975_v25, %v971_v20 }
 0x3bd   :  { %v982_v23 = vsub.f32 1.0, %v976_v45  ;;  %v984_v55 = vmul.f32 %v976_v45, %v3874_v21 }
 0x3be   :  { %v980_v38 = vadd.f32 %v979_v54, %v4880_v37 }
 0x3c0   :  { %2663 = vtanh.f32 %v980_v38 }
 0x3c6   :  { %v2664_v27 = vpop.eup %2663 }
 0x3c7   :  { %v983_v40 = vmul.f32 %v2664_v27, %v982_v23 }
 0x3c9   :  { %v3935_v31 = vadd.f32 %v984_v55, %v983_v40 }
 0x3cb   :  { %1005 = vmatmul.f32.vlgmr.msra.gmra.mxu1 %v3935_v31  ;;  %1025 = vmatmul.f32.vlgmr.msra.gmra.mxu2 %v3935_v31 }
 0x3cc   :  { %1045 = vmatmul.f32.vlgmr.msrb.gmra.mxu3 %v3935_v31  ;;  %1251 = vmatpush.msra.mxu1 %v3757_v29  ;;  %v1364_v29 = vld [vmem:[#allocation11 + $0x168] sm:$0xff] }
 0x3cd   :  { %1375 = vmatpush.msra.mxu2 %v1364_v29  ;;  %v4884_v29 = vld [vmem:[#allocation44_spill] sm:$0xff] }
 0x3ce   :  { %1252 = vmatpush.msra.mxu1 %v3764_v33  ;;  %v1361_v33 = vld [vmem:[#allocation11 + $0x150] sm:$0xff] }
 0x3cf   :  { %1376 = vmatpush.msra.mxu2 %v1361_v33  ;;  %v4885_v33 = vld [vmem:[#allocation25_spill] sm:$0xff] }
 0x3d0   :  { %1253 = vmatpush.msra.mxu1 %v3771_v39  ;;  %v1358_v39 = vld [vmem:[#allocation11 + $0x138] sm:$0xff] }
 0x3d1   :  { %1377 = vmatpush.msra.mxu2 %v1358_v39  ;;  %v3978_v39 = vld [vmem:[#allocation12 + $0x168] sm:$0xff] }
 0x3d2   :  { %1254 = vmatpush.msra.mxu1 %v3778_v50  ;;  %v1355_v50 = vld [vmem:[#allocation11 + $0x120] sm:$0xff] }
 0x3d3   :  { %1378 = vmatpush.msra.mxu2 %v1355_v50  ;;  %v3981_v50 = vld [vmem:[#allocation12 + $0x150] sm:$0xff] }
 0x3d4   :  { %1255 = vmatpush.msra.mxu1 %v3785_v5  ;;  %v1352_v5 = vld [vmem:[#allocation11 + $0x108] sm:$0xff] }
 0x3d5   :  { %1379 = vmatpush.msra.mxu2 %v1352_v5  ;;  %v3984_v5 = vld [vmem:[#allocation12 + $0x138] sm:$0xff] }
 0x3d6   :  { %1256 = vmatpush.msra.mxu1 %v3792_v15 }
 0x3d8   :  { %1257 = vmatpush.msra.mxu1 %v3799_v34  ;;  %v4881_v34 = vld [vmem:[#allocation37_spill] sm:$0xff] }
 0x3da   :  { %1258 = vmatpush.msra.mxu1 %v3806_v47 }
 0x3dc   :  { %1259 = vmatpush.msra.mxu1 %v3813_v51  ;;  %v1349_v51 = vld [vmem:[#allocation11 + $0xf0] sm:$0xff] }
 0x3dd   :  { %1380 = vmatpush.msra.mxu2 %v1349_v51  ;;  %v3990_v51 = vld [vmem:[#allocation12 + $0x108] sm:$0xff] }
 0x3de   :  { %1260 = vmatpush.msra.mxu1 %v3820_v58 }
 0x3e0   :  { %1261 = vmatpush.msra.mxu1 %v3827_v13  ;;  %v1346_v13 = vld [vmem:[#allocation11 + $0xd8] sm:$0xff] }
 0x3e1   :  { %1381 = vmatpush.msra.mxu2 %v1346_v13  ;;  %v1363_v13 = vld [vmem:[#allocation11 + $0x160] sm:$0xff] }
 0x3e2   :  { %1262 = vmatpush.msra.mxu1 %v3834_v12  ;;  %v4882_v12 = vld [vmem:[#allocation28_spill] sm:$0xff] }
 0x3e4   :  { %1263 = vmatpush.msra.mxu1 %v3841_v28  ;;  %v306_v28 = vadd.f32 %v4882_v12, %v4877_v49  ;;  %v3993_v12 = vld [vmem:[#allocation12 + $0xf0] sm:$0xff] }
 0x3e6   :  { %1264 = vmatpush.msra.mxu1 %v3848_v36  ;;  %v1343_v36 = vld [vmem:[#allocation11 + $0xc0] sm:$0xff] }
 0x3e7   :  { %1382 = vmatpush.msra.mxu2 %v1343_v36  ;;  %v1360_v36 = vld [vmem:[#allocation11 + $0x148] sm:$0xff] }
 0x3e8   :  { %1265 = vmatpush.msra.mxu1 %v4872_v32 }
 0x3e9   :  { %1383 = vmatpush.msra.mxu2 %v1340_v43  ;;  %v1357_v43 = vld [vmem:[#allocation11 + $0x130] sm:$0xff] }
 0x3ea   :  { %1266 = vmatpush.msra.mxu1 %v3924_v44 }
 0x3eb   :  { %1384 = vmatpush.msra.mxu2 %v1337_v52  ;;  %v4886_v52 = vld [vmem:[#allocation24_spill] sm:$0xff] }
 0x3ed   :  { %1385 = vmatpush.msra.mxu2 %v1334_v56  ;;  %v1353_v56 = vld [vmem:[#allocation11 + $0x110] sm:$0xff] }
 0x3ef   :  { %1386 = vmatpush.msra.mxu2 %v1331_v60  ;;  %v4004_v60 = vld [vmem:[#allocation12 + $0xa8] sm:$0xff] }
 0x3f1   :  { %1387 = vmatpush.msra.mxu2 %v1328_v61 }
 0x3f3   :  { %1388 = vmatpush.msra.mxu2 %v1325_v0 }
 0x3f5   :  { %1389 = vmatpush.msra.mxu2 %v1322_v35 }
 0x3f7   :  { %1390 = vmatpush.msra.mxu2 %v1319_v3  ;;  %v1350_v3 = vld [vmem:[#allocation11 + $0xf8] sm:$0xff] }
 0x448   :  { %v1006_v15 = vpop.f32.mrf.mxu1 }
 0x449   :  { %v1049_v47 = vadd.f32 %v1006_v15, %v4881_v34  ;;  %v3987_v15 = vld [vmem:[#allocation12 + $0x120] sm:$0xff]  ;;  %v1365_v34 = vld [vmem:[#allocation11 + $0x170] sm:$0xff] }
 0x44a   :  { %1416 = vmatpush.msrb.mxu3 %v1365_v34  ;;  %v1327_v34 = vld [vmem:[#allocation11 + $0x40] sm:$0xff] }
 0x44b   :  { %v2575_v58 = vmul.f32 -1.442695, %v1049_v47  ;;  %v1366_v47 = vld [vmem:[#allocation11 + $0x178] sm:$0xff] }
 0x44d   :  { %2665 = vpow2.f32 %v2575_v58  ;;  %v1362_v58 = vld [vmem:[#allocation11 + $0x158] sm:$0xff] }
 0x44e   :  { %v1026_v32 = vpop.f32.mrf.mxu2  ;;  %1417 = vmatpush.msrb.mxu3 %v1362_v58  ;;  %v1323_v58 = vld [vmem:[#allocation11 + $0x20] sm:$0xff] }
 0x44f   :  { %v1050_v44 = vadd.f32 %v1026_v32, %v306_v28  ;;  %v1046_v41 = vpop.f32.mrf.mxu3  ;;  %v1359_v28 = vld [vmem:[#allocation11 + $0x140] sm:$0xff]  ;;  %v3996_v32 = vld [vmem:[#allocation12 + $0xd8] sm:$0xff] }
 0x450   :  { %v1089_v59 = vadd.f32 %v3962_v63, %v1046_v41  ;;  %1418 = vmatpush.msrb.mxu3 %v1359_v28  ;;  %v1344_v41 = vld [vmem:[#allocation11 + $0xc8] sm:$0xff] }
 0x451   :  { %v2576_v48 = vmul.f32 -1.442695, %v1050_v44  ;;  %v1356_v44 = vld [vmem:[#allocation11 + $0x128] sm:$0xff] }
 0x452   :  { %1419 = vmatpush.msrb.mxu3 %v1356_v44 }
 0x453   :  { %v2666_v53 = vpop.eup %2665  ;;  %2667 = vpow2.f32 %v2576_v48  ;;  %v3999_v48 = vld [vmem:[#allocation12 + $0xc0] sm:$0xff] }
 0x454   :  { %v1057_v57 = vadd.f32 1.0, %v2666_v53  ;;  %v309_v53 = vadd.f32 %v4886_v52, %v4877_v49  ;;  %1420 = vmatpush.msrb.mxu3 %v1353_v56  ;;  %v1321_v52 = vld [vmem:[#allocation11 + $0x10] sm:$0xff] }
 0x456   :  { %2669 = vrcp.f32 %v1057_v57  ;;  %v1070_v62 = vand.u32 2147483648, %v1057_v57  ;;  %v1068_v46 = vand.u32 2147483647, %v1057_v57  ;;  %vm1064_vm9 = vweird.f32 %v1057_v57  ;;  %1421 = vmatpush.msrb.mxu3 %v1350_v3 }
 0x458   :  { %v1071_v10 = vor.u32 1.1754944e-38, %v1070_v62  ;;  %vm1069_vm11 = vcmp.eq.f32.partialorder %v1068_v46, 8.507059e+37  ;;  %v1348_v46 = vld [vmem:[#allocation11 + $0xe8] sm:$0xff] }
 0x459   :  { %v2668_v30 = vpop.eup %2667 }
 0x45a   :  { %v1058_v42 = vadd.f32 1.0, %v2668_v30  ;;  %v4887_v30 = vld [vmem:[#allocation38_spill] sm:$0xff] }
 0x45c   :  { %v2670_v9 = vpop.eup %2669  ;;  %2671 = vrcp.f32 %v1058_v42  ;;  %v1085_v11 = vand.u32 2147483648, %v1058_v42  ;;  %v1083_v54 = vand.u32 2147483647, %v1058_v42  ;;  %vm1079_vm13 = vweird.f32 %v1058_v42 }
 0x45d   :  { %v1060_v22 = vmul.f32 %v2670_v9, %v1057_v57  ;;  %vm1065_vm8 = vweird.f32 %v2670_v9  ;;  %v1354_v57 = vld [vmem:[#allocation11 + $0x118] sm:$0xff] }
 0x45e   :  { %vm1066_vm10 = vmor %vm1064_vm9, %vm1065_vm8  ;;  %v1086_v38 = vor.u32 1.1754944e-38, %v1085_v11  ;;  %vm1084_vm15 = vcmp.eq.f32.partialorder %v1083_v54, 8.507059e+37  ;;  %v1336_v54 = vld [vmem:[#allocation11 + $0x88] sm:$0xff] }
 0x45f   :  { %v1061_v1 = vsub.f32 1.0, %v1060_v22  ;;  %v4008_v22 = vld [vmem:[#allocation12 + $0x90] sm:$0xff] }
 0x461   :  { %v1062_v14 = vmul.f32 %v2670_v9, %v1061_v1 }
 0x462   :  { %v2672_v6 = vpop.eup %2671 }
 0x463   :  { %v1075_v7 = vmul.f32 %v2672_v6, %v1058_v42  ;;  %v1063_v19 = vadd.f32 %v2670_v9, %v1062_v14  ;;  %vm1080_vm12 = vweird.f32 %v2672_v6  ;;  %v1347_v14 = vld [vmem:[#allocation11 + $0xe0] sm:$0xff] }
 0x464   :  { %vm1081_vm14 = vmor %vm1079_vm13, %vm1080_vm12  ;;  %1422 = vmatpush.msrb.mxu3 %v1347_v14 }
 0x465   :  { %v1076_v4 = vsub.f32 1.0, %v1075_v7  ;;  %v1067_v18 = vsel %vm1066_vm10, %v2670_v9, %v1063_v19  ;;  %v1351_v9 = vld [vmem:[#allocation11 + $0x100] sm:$0xff]  ;;  %v1345_v7 = vld [vmem:[#allocation11 + $0xd0] sm:$0xff] }
 0x466   :  { %v1072_v8 = vsel %vm1069_vm11, %v1071_v10, %v1067_v18  ;;  %v4014_v19 = vld [vmem:[#allocation12 + $0x60] sm:$0xff]  ;;  %1423 = vmatpush.msrb.mxu3 %v1344_v41  ;;  %v1341_v10 = vld [vmem:[#allocation11 + $0xb0] sm:$0xff]  ;;  %v4017_v18 = vld [vmem:[#allocation12 + $0x48] sm:$0xff] }
 0x467   :  { %v1077_v24 = vmul.f32 %v2672_v6, %v1076_v4  ;;  %v1090_v2 = vmul.f32 %v1089_v59, %v1072_v8  ;;  %v1342_v4 = vld [vmem:[#allocation11 + $0xb8] sm:$0xff]  ;;  %v1339_v8 = vld [vmem:[#allocation11 + $0xa0] sm:$0xff] }
 0x468   :  { %1424 = vmatpush.msrb.mxu3 %v1341_v10  ;;  %v1338_v59 = vld [vmem:[#allocation11 + $0x98] sm:$0xff] }
 0x469   :  { %v1078_v17 = vadd.f32 %v2672_v6, %v1077_v24  ;;  %v1091_v37 = vadd.f32 %v1090_v2, %v4883_v16  ;;  %v4020_v24 = vld [vmem:[#allocation12 + $0x30] sm:$0xff]  ;;  %v1335_v2 = vld [vmem:[#allocation11 + $0x80] sm:$0xff]  ;;  %v4889_v10 = vld [vmem:[#allocation46_spill] sm:$0xff] }
 0x46a   :  { %1425 = vmatpush.msrb.mxu3 %v1338_v59 }
 0x46b   :  { %v1082_v20 = vsel %vm1081_vm14, %v2672_v6, %v1078_v17  ;;  %2673 = vtanh.f32 %v1091_v37  ;;  %v4011_v6 = vld [vmem:[#allocation12 + $0x78] sm:$0xff] }
 0x46c   :  { %v1087_v25 = vsel %vm1084_vm15, %v1086_v38, %v1082_v20  ;;  %v4023_v17 = vld [vmem:[#allocation12 + $0x18] sm:$0xff]  ;;  %1426 = vmatpush.msrb.mxu3 %v1335_v2  ;;  %v1332_v38 = vld [vmem:[#allocation11 + $0x68] sm:$0xff]  ;;  %v1333_v20 = vld [vmem:[#allocation11 + $0x70] sm:$0xff] }
 0x46d   :  { %v1093_v45 = vsub.f32 1.0, %v1087_v25  ;;  %v1095_v40 = vmul.f32 %v1087_v25, %v3935_v31  ;;  %v4025_v25 = vld [vmem:[#allocation12] sm:$0xff] }
 0x46e   :  { %4888 = vst [vmem:[#allocation34_spill] sm:$0xff] %v4025_v25  ;;  %1427 = vmatpush.msrb.mxu3 %v1332_v38 }
 0x471   :  { %v2674_v23 = vpop.eup %2673 }
 0x472   :  { %v1094_v27 = vmul.f32 %v2674_v23, %v1093_v45  ;;  %v1329_v23 = vld [vmem:[#allocation11 + $0x50] sm:$0xff] }
 0x473   :  { %1428 = vmatpush.msrb.mxu3 %v1329_v23  ;;  %v4044_v23 = vld [vmem:[#allocation12 + $0x140] sm:$0xff] }
 0x474   :  { %v3967_v55 = vadd.f32 %v1095_v40, %v1094_v27  ;;  %v1330_v27 = vld [vmem:[#allocation11 + $0x58] sm:$0xff] }
 0x475   :  { %v1326_v40 = vld [vmem:[#allocation11 + $0x38] sm:$0xff] }
 0x476   :  { %1116 = vmatmul.f32.vlgmr.msrb.gmra.mxu0 %v3967_v55  ;;  %1136 = vmatmul.f32.vlgmr.msrb.gmra.mxu1 %v3967_v55 }
 0x477   :  { %1156 = vmatmul.f32.vlgmr.msrb.gmra.mxu2 %v3967_v55  ;;  %1577 = vmatpush.msrb.mxu1 %v3978_v39 }
 0x478   :  { %1457 = vmatpush.msrb.mxu0 %v1366_v47  ;;  %1429 = vmatpush.msrb.mxu3 %v1326_v40  ;;  %v4054_v40 = vld [vmem:[#allocation12 + $0x110] sm:$0xff] }
 0x479   :  { %1578 = vmatpush.msrb.mxu1 %v3981_v50 }
 0x47a   :  { %1458 = vmatpush.msrb.mxu0 %v1363_v13  ;;  %v1324_v13 = vld [vmem:[#allocation11 + $0x28] sm:$0xff]  ;;  %1430 = vmatpush.msrb.mxu3 %v1323_v58  ;;  %v4065_v58 = vld [vmem:[#allocation12 + $0xe0] sm:$0xff] }
 0x47b   :  { %1579 = vmatpush.msrb.mxu1 %v3984_v5 }
 0x47c   :  { %1459 = vmatpush.msrb.mxu0 %v1360_v36 }
 0x47d   :  { %1580 = vmatpush.msrb.mxu1 %v3987_v15 }
 0x47e   :  { %1460 = vmatpush.msrb.mxu0 %v1357_v43  ;;  %v1320_v43 = vld [vmem:[#allocation11 + $0x8] sm:$0xff] }
 0x47f   :  { %1391 = vmatmul.f32.vlgmr.msra.gmra.mxu2 %v4884_v29  ;;  %1581 = vmatpush.msrb.mxu1 %v3990_v51 }
 0x480   :  { %1461 = vmatpush.msrb.mxu0 %v1354_v57  ;;  %1431 = vmatpush.msrb.mxu3 %v1320_v43  ;;  %v4102_v43 = vld [vmem:[#allocation12 + $0x38] sm:$0xff] }
 0x481   :  { %1582 = vmatpush.msrb.mxu1 %v3993_v12 }
 0x482   :  { %1462 = vmatpush.msrb.mxu0 %v1351_v9 }
 0x483   :  { %1583 = vmatpush.msrb.mxu1 %v3996_v32 }
 0x484   :  { %1463 = vmatpush.msrb.mxu0 %v1348_v46 }
 0x485   :  { %1584 = vmatpush.msrb.mxu1 %v3999_v48 }
 0x486   :  { %1464 = vmatpush.msrb.mxu0 %v1345_v7 }
 0x487   :  { %1394 = vmatmul.f32.gmra.mxu2 %v4885_v33  ;;  %1585 = vmatpush.msrb.mxu1 %v4004_v60 }
 0x488   :  { %1465 = vmatpush.msrb.mxu0 %v1342_v4 }
 0x489   :  { %1586 = vmatpush.msrb.mxu1 %v4008_v22 }
 0x48a   :  { %1466 = vmatpush.msrb.mxu0 %v1339_v8 }
 0x48b   :  { %1587 = vmatpush.msrb.mxu1 %v4011_v6 }
 0x48c   :  { %1467 = vmatpush.msrb.mxu0 %v1336_v54 }
 0x48d   :  { %1588 = vmatpush.msrb.mxu1 %v4014_v19 }
 0x48e   :  { %1468 = vmatpush.msrb.mxu0 %v1333_v20  ;;  %v4034_v20 = vld [vmem:[#allocation12 + $0x170] sm:$0xff] }
 0x48f   :  { %1397 = vmatmul.f32.gmra.mxu2 %v3752_v26  ;;  %1589 = vmatpush.msrb.mxu1 %v4017_v18 }
 0x490   :  { %1469 = vmatpush.msrb.mxu0 %v1330_v27  ;;  %v4049_v27 = vld [vmem:[#allocation12 + $0x128] sm:$0xff] }
 0x491   :  { %1590 = vmatpush.msrb.mxu1 %v4020_v24 }
 0x492   :  { %1470 = vmatpush.msrb.mxu0 %v1327_v34  ;;  %v4890_v34 = vmov 0.0  }
 0x493   :  { %1591 = vmatpush.msrb.mxu1 %v4023_v17 }
 0x494   :  { %1471 = vmatpush.msrb.mxu0 %v1324_v13  ;;  %v4070_v13 = vld [vmem:[#allocation12 + $0xc8] sm:$0xff] }
 0x495   :  { %1592 = vmatpush.msrb.mxu1 %v4025_v25 }
 0x496   :  { %1472 = vmatpush.msrb.mxu0 %v1321_v52  ;;  %v4104_v52 = vld [vmem:[#allocation12 + $0x178] sm:$0xff] }
 0x497   :  { %1400 = vmatmul.f32.gmra.mxu2 %v3874_v21 }
 0x498   :  { %1617 = vmatpush.msrb.mxu2 %v4104_v52 }
 0x49f   :  { %1403 = vmatmul.f32.gmra.mxu2 %v3935_v31 }
 0x4a7   :  { %1406 = vmatmul.f32.gmra.mxu2 %v3967_v55 }
 0x4f3   :  { %v1117_v61 = vpop.f32.mrf.mxu0  ;;  %v1137_v0 = vpop.f32.mrf.mxu1 }
 0x4f4   :  { %v1160_v35 = vadd.f32 %v1117_v61, %v4887_v30  ;;  %v1161_v42 = vadd.f32 %v1137_v0, %v309_v53 }
 0x4f6   :  { %v2577_v1 = vmul.f32 -1.442695, %v1160_v35  ;;  %v2578_v62 = vmul.f32 -1.442695, %v1161_v42 }
 0x4f8   :  { %2675 = vpow2.f32 %v2577_v1 }
 0x4f9   :  { %2677 = vpow2.f32 %v2578_v62 }
 0x4fa   :  { %v1157_v35 = vpop.f32.mrf.mxu2 }
 0x4fb   :  { %v1200_v1 = vadd.f32 %v3962_v63, %v1157_v35 }
 0x4fe   :  { %v2676_v11 = vpop.eup %2675 }
 0x4ff   :  { %v2678_v16 = vpop.eup %2677  ;;  %v1168_v37 = vadd.f32 1.0, %v2676_v11 }
 0x500   :  { %v1169_v45 = vadd.f32 1.0, %v2678_v16 }
 0x501   :  { %2679 = vrcp.f32 %v1168_v37  ;;  %v1181_v57 = vand.u32 2147483648, %v1168_v37  ;;  %v1179_v0 = vand.u32 2147483647, %v1168_v37  ;;  %vm1175_vm1 = vweird.f32 %v1168_v37 }
 0x502   :  { %2681 = vrcp.f32 %v1169_v45  ;;  %v1196_v46 = vand.u32 2147483648, %v1169_v45  ;;  %vm1190_vm5 = vweird.f32 %v1169_v45  ;;  %v1194_v7 = vand.u32 2147483647, %v1169_v45 }
 0x503   :  { %v1182_v3 = vor.u32 1.1754944e-38, %v1181_v57  ;;  %vm1180_vm3 = vcmp.eq.f32.partialorder %v1179_v0, 8.507059e+37  ;;  %v4167_v0 = vld [vmem:[#allocation12 + $0x130] sm:$0xff] }
 0x504   :  { %v1197_v8 = vor.u32 1.1754944e-38, %v1196_v46  ;;  %vm1195_vm7 = vcmp.eq.f32.partialorder %v1194_v7, 8.507059e+37  ;;  %v4189_v46 = vld [vmem:[#allocation12 + $0xb8] sm:$0xff] }
 0x507   :  { %v2680_v47 = vpop.eup %2679 }
 0x508   :  { %v2682_v28 = vpop.eup %2681  ;;  %v1171_v36 = vmul.f32 %v2680_v47, %v1168_v37  ;;  %vm1176_vm0 = vweird.f32 %v2680_v47 }
 0x509   :  { %v1186_v44 = vmul.f32 %v2682_v28, %v1169_v45  ;;  %vm1177_vm2 = vmor %vm1175_vm1, %vm1176_vm0  ;;  %vm1191_vm4 = vweird.f32 %v2682_v28  ;;  %v4040_v45 = vld [vmem:[#allocation12 + $0x158] sm:$0xff] }
 0x50a   :  { %v1172_v53 = vsub.f32 1.0, %v1171_v36  ;;  %vm1192_vm6 = vmor %vm1190_vm5, %vm1191_vm4  ;;  %v4086_v36 = vld [vmem:[#allocation12 + $0x80] sm:$0xff] }
 0x50b   :  { %v1187_v56 = vsub.f32 1.0, %v1186_v44  ;;  %v4091_v44 = vld [vmem:[#allocation12 + $0x68] sm:$0xff] }
 0x50c   :  { %v1173_v61 = vmul.f32 %v2680_v47, %v1172_v53  ;;  %v4109_v53 = vld [vmem:[#allocation12 + $0x20] sm:$0xff] }
 0x50d   :  { %v1188_v30 = vmul.f32 %v2682_v28, %v1187_v56  ;;  %4891 = vst [vmem:[#allocation29_spill] sm:$0xff] %v4109_v53  ;;  %v4114_v56 = vld [vmem:[#allocation12 + $0x8] sm:$0xff] }
 0x50e   :  { %v1174_v42 = vadd.f32 %v2680_v47, %v1173_v61  ;;  %4892 = vst [vmem:[#allocation39_spill] sm:$0xff] %v4114_v56 }
 0x50f   :  { %v1189_v62 = vadd.f32 %v2682_v28, %v1188_v30  ;;  %v4169_v30 = vld [vmem:[#allocation12 + $0x118] sm:$0xff] }
 0x510   :  { %v1178_v9 = vsel %vm1177_vm2, %v2680_v47, %v1174_v42  ;;  %v4061_v47 = vld [vmem:[#allocation12 + $0xf8] sm:$0xff]  ;;  %v4173_v42 = vld [vmem:[#allocation12 + $0x100] sm:$0xff] }
 0x511   :  { %v1183_v14 = vsel %vm1180_vm3, %v1182_v3, %v1178_v9  ;;  %v1193_v59 = vsel %vm1192_vm6, %v2682_v28, %v1189_v62  ;;  %v4081_v28 = vld [vmem:[#allocation12 + $0x98] sm:$0xff]  ;;  %v4894_v9 = vld [vmem:[#allocation40_spill] sm:$0xff]  ;;  %v4184_v62 = vld [vmem:[#allocation12 + $0xd0] sm:$0xff] }
 0x512   :  { %v1201_v41 = vmul.f32 %v1200_v1, %v1183_v14  ;;  %v1198_v11 = vsel %vm1195_vm7, %v1197_v8, %v1193_v59  ;;  %v4205_v8 = vld [vmem:[#allocation12 + $0x88] sm:$0xff] }
 0x513   :  { %v1204_v2 = vsub.f32 1.0, %v1198_v11  ;;  %v1206_v37 = vmul.f32 %v1198_v11, %v3967_v55  ;;  %v4210_v11 = vld [vmem:[#allocation12 + $0x70] sm:$0xff] }
 0x514   :  { %v1202_v4 = vadd.f32 %v1201_v41, %v4889_v10  ;;  %v4201_v10 = vld [vmem:[#allocation12 + $0xa0] sm:$0xff] }
 0x516   :  { %2683 = vtanh.f32 %v1202_v4 }
 0x51c   :  { %v2684_v54 = vpop.eup %2683 }
 0x51d   :  { %v1205_v16 = vmul.f32 %v2684_v54, %v1204_v2  ;;  %v4217_v54 = vld [vmem:[#allocation12 + $0x58] sm:$0xff] }
 0x51e   :  { %4895 = vst [vmem:[#allocation33_spill] sm:$0xff] %v4217_v54 }
 0x51f   :  { %v4032_v38 = vadd.f32 %v1206_v37, %v1205_v16  ;;  %v4224_v37 = vld [vmem:[#allocation12 + $0x40] sm:$0xff] }
 0x520   :  { %4896 = vst [vmem:[#allocation32_spill] sm:$0xff] %v4224_v37 }
 0x521   :  { %1227 = vmatmul.f32.vlgmr.msra.gmra.mxu3 %v4032_v38  ;;  %1247 = vmatmul.f32.vlgmr.msra.gmra.mxu0 %v4032_v38 }
 0x522   :  { %1267 = vmatmul.f32.vlgmr.msra.gmra.mxu1 %v4032_v38  ;;  %1409 = vmatmul.f32.gmra.mxu2 %v4032_v38 }
 0x523   :  { %1597 = vmatpush.msra.mxu1 %v4034_v20  ;;  %1688 = vmatpush.msra.mxu3 %v3978_v39 }
 0x524   :  { %1708 = vmatpush.msra.mxu0 %v4034_v20 }
 0x525   :  { %1598 = vmatpush.msra.mxu1 %v4040_v45  ;;  %1689 = vmatpush.msra.mxu3 %v3981_v50 }
 0x526   :  { %1709 = vmatpush.msra.mxu0 %v4040_v45 }
 0x527   :  { %1599 = vmatpush.msra.mxu1 %v4044_v23  ;;  %1690 = vmatpush.msra.mxu3 %v3984_v5 }
 0x528   :  { %1710 = vmatpush.msra.mxu0 %v4044_v23 }
 0x529   :  { %1600 = vmatpush.msra.mxu1 %v4049_v27  ;;  %1432 = vmatmul.f32.vlgmr.msrb.gmra.mxu3 %v4884_v29 }
 0x52a   :  { %1473 = vmatmul.f32.vlgmr.msrb.gmra.mxu0 %v4884_v29  ;;  %1593 = vmatmul.f32.vlgmr.msrb.gmra.mxu1 %v4890_v34  ;;  %v4075_v29 = vld [vmem:[#allocation12 + $0xb0] sm:$0xff] }
 0x52b   :  { %1601 = vmatpush.msra.mxu1 %v4054_v40  ;;  %1691 = vmatpush.msra.mxu3 %v3987_v15 }
 0x52c   :  { %1711 = vmatpush.msra.mxu0 %v4049_v27 }
 0x52d   :  { %1602 = vmatpush.msra.mxu1 %v4061_v47  ;;  %1692 = vmatpush.msra.mxu3 %v3990_v51 }
 0x52e   :  { %1712 = vmatpush.msra.mxu0 %v4054_v40 }
 0x52f   :  { %1603 = vmatpush.msra.mxu1 %v4065_v58  ;;  %1693 = vmatpush.msra.mxu3 %v3993_v12 }
 0x530   :  { %1713 = vmatpush.msra.mxu0 %v4061_v47 }
 0x531   :  { %1604 = vmatpush.msra.mxu1 %v4070_v13  ;;  %1435 = vmatmul.f32.gmra.mxu3 %v4885_v33 }
 0x532   :  { %1476 = vmatmul.f32.gmra.mxu0 %v4885_v33  ;;  %1694 = vmatpush.msra.mxu3 %v3996_v32  ;;  %v4096_v33 = vld [vmem:[#allocation12 + $0x50] sm:$0xff] }
 0x533   :  { %1605 = vmatpush.msra.mxu1 %v4075_v29  ;;  %1714 = vmatpush.msra.mxu0 %v4065_v58 }
 0x534   :  { %1695 = vmatpush.msra.mxu3 %v3999_v48 }
 0x535   :  { %1606 = vmatpush.msra.mxu1 %v4081_v28  ;;  %1715 = vmatpush.msra.mxu0 %v4070_v13 }
 0x536   :  { %1696 = vmatpush.msra.mxu3 %v4004_v60 }
 0x537   :  { %1607 = vmatpush.msra.mxu1 %v4086_v36  ;;  %1716 = vmatpush.msra.mxu0 %v4075_v29 }
 0x538   :  { %1697 = vmatpush.msra.mxu3 %v4008_v22 }
 0x539   :  { %1608 = vmatpush.msra.mxu1 %v4091_v44  ;;  %1438 = vmatmul.f32.gmra.mxu3 %v3752_v26 }
 0x53a   :  { %1479 = vmatmul.f32.gmra.mxu0 %v3752_v26  ;;  %1698 = vmatpush.msra.mxu3 %v4011_v6  ;;  %v4155_v26 = vld [vmem:[#allocation12 + $0x160] sm:$0xff] }
 0x53b   :  { %1609 = vmatpush.msra.mxu1 %v4096_v33  ;;  %1717 = vmatpush.msra.mxu0 %v4081_v28 }
 0x53c   :  { %1699 = vmatpush.msra.mxu3 %v4014_v19  ;;  %1618 = vmatpush.msrb.mxu2 %v4155_v26 }
 0x53d   :  { %1610 = vmatpush.msra.mxu1 %v4102_v43  ;;  %1718 = vmatpush.msra.mxu0 %v4086_v36 }
 0x53e   :  { %1700 = vmatpush.msra.mxu3 %v4017_v18 }
 0x53f   :  { %1611 = vmatpush.msra.mxu1 %v4109_v53  ;;  %1719 = vmatpush.msra.mxu0 %v4091_v44 }
 0x540   :  { %1701 = vmatpush.msra.mxu3 %v4020_v24 }
 0x541   :  { %1612 = vmatpush.msra.mxu1 %v4114_v56  ;;  %1441 = vmatmul.f32.gmra.mxu3 %v3874_v21 }
 0x542   :  { %1613 = vmatmul.f32.vlgmr.msra.gmra.mxu1 %v4890_v34  ;;  %1482 = vmatmul.f32.gmra.mxu0 %v3874_v21  ;;  %v4157_v21 = vld [vmem:[#allocation12 + $0x148] sm:$0xff] }
 0x543   :  { %1728 = vmatpush.msrb.mxu1 %v4104_v52  ;;  %1702 = vmatpush.msra.mxu3 %v4023_v17 }
 0x544   :  { %1720 = vmatpush.msra.mxu0 %v4096_v33  ;;  %1619 = vmatpush.msrb.mxu2 %v4157_v21 }
 0x545   :  { %1703 = vmatpush.msra.mxu3 %v4025_v25  ;;  %1729 = vmatpush.msrb.mxu1 %v4155_v26 }
 0x546   :  { %1721 = vmatpush.msra.mxu0 %v4102_v43  ;;  %1620 = vmatpush.msrb.mxu2 %v4167_v0 }
 0x547   :  { %1819 = vmatpush.msrb.mxu3 %v4034_v20  ;;  %1730 = vmatpush.msrb.mxu1 %v4157_v21 }
 0x548   :  { %1722 = vmatpush.msra.mxu0 %v4109_v53  ;;  %1621 = vmatpush.msrb.mxu2 %v4169_v30 }
 0x549   :  { %1820 = vmatpush.msrb.mxu3 %v4040_v45  ;;  %1731 = vmatpush.msrb.mxu1 %v4167_v0 }
 0x54a   :  { %1444 = vmatmul.f32.gmra.mxu3 %v3935_v31  ;;  %1485 = vmatmul.f32.gmra.mxu0 %v3935_v31  ;;  %v4893_v31 = vld [vmem:[#allocation27_spill] sm:$0xff] }
 0x54b   :  { %1821 = vmatpush.msrb.mxu3 %v4044_v23  ;;  %1723 = vmatpush.msra.mxu0 %v4114_v56 }
 0x54c   :  { %1732 = vmatpush.msrb.mxu1 %v4169_v30  ;;  %1622 = vmatpush.msrb.mxu2 %v4173_v42 }
 0x54d   :  { %1839 = vmatpush.msrb.mxu0 %v4104_v52  ;;  %1822 = vmatpush.msrb.mxu3 %v4049_v27 }
 0x54e   :  { %1733 = vmatpush.msrb.mxu1 %v4173_v42 }
 0x54f   :  { %1823 = vmatpush.msrb.mxu3 %v4054_v40  ;;  %1840 = vmatpush.msrb.mxu0 %v4155_v26 }
 0x551   :  { %1824 = vmatpush.msrb.mxu3 %v4061_v47  ;;  %1841 = vmatpush.msrb.mxu0 %v4157_v21 }
 0x552   :  { %1447 = vmatmul.f32.gmra.mxu3 %v3967_v55  ;;  %1488 = vmatmul.f32.gmra.mxu0 %v3967_v55  ;;  %v312_v55 = vadd.f32 %v4893_v31, %v4877_v49  ;;  %v4178_v49 = vld [vmem:[#allocation12 + $0xe8] sm:$0xff] }
 0x553   :  { %1825 = vmatpush.msrb.mxu3 %v4065_v58  ;;  %1842 = vmatpush.msrb.mxu0 %v4167_v0 }
 0x554   :  { %1623 = vmatpush.msrb.mxu2 %v4178_v49  ;;  %1734 = vmatpush.msrb.mxu1 %v4178_v49 }
 0x555   :  { %1826 = vmatpush.msrb.mxu3 %v4070_v13  ;;  %1843 = vmatpush.msrb.mxu0 %v4169_v30 }
 0x556   :  { %1624 = vmatpush.msrb.mxu2 %v4184_v62  ;;  %1735 = vmatpush.msrb.mxu1 %v4184_v62 }
 0x557   :  { %1827 = vmatpush.msrb.mxu3 %v4075_v29  ;;  %1844 = vmatpush.msrb.mxu0 %v4173_v42 }
 0x558   :  { %1625 = vmatpush.msrb.mxu2 %v4189_v46  ;;  %1736 = vmatpush.msrb.mxu1 %v4189_v46 }
 0x559   :  { %1828 = vmatpush.msrb.mxu3 %v4081_v28  ;;  %1845 = vmatpush.msrb.mxu0 %v4178_v49 }
 0x55a   :  { %1450 = vmatmul.f32.gmra.mxu3 %v4032_v38  ;;  %1491 = vmatmul.f32.gmra.mxu0 %v4032_v38 }
 0x55b   :  { %1829 = vmatpush.msrb.mxu3 %v4086_v36  ;;  %1846 = vmatpush.msrb.mxu0 %v4184_v62 }
 0x55c   :  { %1626 = vmatpush.msrb.mxu2 %v4201_v10  ;;  %1737 = vmatpush.msrb.mxu1 %v4201_v10 }
 0x55d   :  { %1830 = vmatpush.msrb.mxu3 %v4091_v44  ;;  %1847 = vmatpush.msrb.mxu0 %v4189_v46 }
 0x55e   :  { %1627 = vmatpush.msrb.mxu2 %v4205_v8  ;;  %1738 = vmatpush.msrb.mxu1 %v4205_v8 }
 0x55f   :  { %1831 = vmatpush.msrb.mxu3 %v4096_v33  ;;  %1848 = vmatpush.msrb.mxu0 %v4201_v10 }
 0x560   :  { %1628 = vmatpush.msrb.mxu2 %v4210_v11  ;;  %1739 = vmatpush.msrb.mxu1 %v4210_v11 }
 0x561   :  { %1832 = vmatpush.msrb.mxu3 %v4102_v43  ;;  %1849 = vmatpush.msrb.mxu0 %v4205_v8 }
 0x562   :  { %1629 = vmatpush.msrb.mxu2 %v4217_v54  ;;  %1740 = vmatpush.msrb.mxu1 %v4217_v54 }
 0x563   :  { %1833 = vmatpush.msrb.mxu3 %v4109_v53  ;;  %1850 = vmatpush.msrb.mxu0 %v4210_v11 }
 0x564   :  { %1630 = vmatpush.msrb.mxu2 %v4224_v37  ;;  %1741 = vmatpush.msrb.mxu1 %v4224_v37 }
 0x565   :  { %1834 = vmatpush.msrb.mxu3 %v4114_v56  ;;  %1851 = vmatpush.msrb.mxu0 %v4217_v54 }
 0x567   :  { %1852 = vmatpush.msrb.mxu0 %v4224_v37 }
 0x59e   :  { %v1248_v57 = vpop.f32.mrf.mxu0 }
 0x59f   :  { %v1272_v61 = vadd.f32 %v1248_v57, %v312_v55  ;;  %v4229_v55 = vld [vmem:[#allocation12 + $0x28] sm:$0xff]  ;;  %v4231_v57 = vld [vmem:[#allocation12 + $0x10] sm:$0xff] }
 0x5a0   :  { %4897 = vst [vmem:[#allocation41_spill] sm:$0xff] %v4229_v55  ;;  %1631 = vmatpush.msrb.mxu2 %v4229_v55  ;;  %1742 = vmatpush.msrb.mxu1 %v4229_v55 }
 0x5a1   :  { %v2580_v35 = vmul.f32 -1.442695, %v1272_v61  ;;  %4898 = vst [vmem:[#allocation31_spill] sm:$0xff] %v4231_v57  ;;  %1853 = vmatpush.msrb.mxu0 %v4229_v55 }
 0x5a2   :  { %1632 = vmatpush.msrb.mxu2 %v4231_v57  ;;  %1743 = vmatpush.msrb.mxu1 %v4231_v57 }
 0x5a3   :  { %2685 = vpow2.f32 %v2580_v35  ;;  %1854 = vmatpush.msrb.mxu0 %v4231_v57 }
 0x5a4   :  { %v1228_v3 = vpop.f32.mrf.mxu3  ;;  %1799 = vmatpush.msra.mxu2 %v3978_v39  ;;  %1910 = vmatpush.msra.mxu1 %v3978_v39 }
 0x5a5   :  { %v1271_v1 = vadd.f32 %v1228_v3, %v4894_v9 }
 0x5a6   :  { %1800 = vmatpush.msra.mxu2 %v3981_v50  ;;  %1911 = vmatpush.msra.mxu1 %v3981_v50 }
 0x5a7   :  { %v2579_v14 = vmul.f32 -1.442695, %v1271_v1 }
 0x5a8   :  { %1801 = vmatpush.msra.mxu2 %v3984_v5  ;;  %1912 = vmatpush.msra.mxu1 %v3984_v5 }
 0x5a9   :  { %v2686_v41 = vpop.eup %2685  ;;  %2687 = vpow2.f32 %v2579_v14 }
 0x5aa   :  { %v4195_v7 = vadd.f32 1.0, %v2686_v41  ;;  %v1268_v41 = vpop.f32.mrf.mxu1  ;;  %1802 = vmatpush.msra.mxu2 %v3987_v15  ;;  %1913 = vmatpush.msra.mxu1 %v3987_v15 }
 0x5ab   :  { %v1311_v57 = vadd.f32 %v3962_v63, %v1268_v41 }
 0x5ac   :  { %2689 = vrcp.f32 %v4195_v7  ;;  %vm1301_vm13 = vweird.f32 %v4195_v7  ;;  %v1305_v63 = vand.u32 2147483647, %v4195_v7  ;;  %1803 = vmatpush.msra.mxu2 %v3990_v51  ;;  %1914 = vmatpush.msra.mxu1 %v3990_v51 }
 0x5ae   :  { %1804 = vmatpush.msra.mxu2 %v3993_v12  ;;  %1915 = vmatpush.msra.mxu1 %v3993_v12  ;;  %vm1306_vm15 = vcmp.eq.f32.partialorder %v1305_v63, 8.507059e+37 }
 0x5af   :  { %v2688_v4 = vpop.eup %2687 }
 0x5b0   :  { %v1279_v59 = vadd.f32 1.0, %v2688_v4  ;;  %1805 = vmatpush.msra.mxu2 %v3996_v32  ;;  %1916 = vmatpush.msra.mxu1 %v3996_v32 }
 0x5b2   :  { %2691 = vrcp.f32 %v1279_v59  ;;  %v4213_v2 = vpop.eup %2689  ;;  %v1292_v9 = vand.u32 2147483648, %v1279_v59  ;;  %v1290_v14 = vand.u32 2147483647, %v1279_v59  ;;  %vm1286_vm9 = vweird.f32 %v1279_v59  ;;  %1806 = vmatpush.msra.mxu2 %v3999_v48  ;;  %1917 = vmatpush.msra.mxu1 %v3999_v48 }
 0x5b3   :  { %v1297_v16 = vmul.f32 %v4213_v2, %v4195_v7  ;;  %vm1302_vm12 = vweird.f32 %v4213_v2 }
 0x5b4   :  { %vm1291_vm11 = vcmp.eq.f32.partialorder %v1290_v14, 8.507059e+37  ;;  %vm1303_vm14 = vmor %vm1301_vm13, %vm1302_vm12  ;;  %1807 = vmatpush.msra.mxu2 %v4004_v60  ;;  %1918 = vmatpush.msra.mxu1 %v4004_v60 }
 0x5b5   :  { %v1298_v35 = vsub.f32 1.0, %v1297_v16 }
 0x5b6   :  { %1808 = vmatpush.msra.mxu2 %v4008_v22  ;;  %1919 = vmatpush.msra.mxu1 %v4008_v22 }
 0x5b7   :  { %v1299_v4 = vmul.f32 %v4213_v2, %v1298_v35  ;;  %v4900_v35 = vld [vmem:[#allocation30_spill] sm:$0xff] }
 0x5b8   :  { %v2692_v31 = vpop.eup %2691  ;;  %1809 = vmatpush.msra.mxu2 %v4011_v6  ;;  %1920 = vmatpush.msra.mxu1 %v4011_v6 }
 0x5b9   :  { %v1282_v61 = vmul.f32 %v2692_v31, %v1279_v59  ;;  %vm1287_vm8 = vweird.f32 %v2692_v31  ;;  %v1300_v37 = vadd.f32 %v4213_v2, %v1299_v4  ;;  %v4899_v59 = vld [vmem:[#allocation42_spill] sm:$0xff] }
 0x5ba   :  { %vm1288_vm10 = vmor %vm1286_vm9, %vm1287_vm8  ;;  %1810 = vmatpush.msra.mxu2 %v4014_v19  ;;  %1921 = vmatpush.msra.mxu1 %v4014_v19  ;;  %v1367_v4 = vld [vmem:[%s4764_s7] sm:$0x7] }
 0x5bb   :  { %v1283_v3 = vsub.f32 1.0, %v1282_v61  ;;  %v1293_v61 = vor.u32 1.1754944e-38, %v1292_v9  ;;  %v1307_v9 = vand.u32 2147483648, %v4195_v7  ;;  %v1304_v14 = vsel %vm1303_vm14, %v4213_v2, %v1300_v37 }
 0x5bc   :  { %1811 = vmatpush.msra.mxu2 %v4017_v18  ;;  %1922 = vmatpush.msra.mxu1 %v4017_v18 }
 0x5bd   :  { %v1284_v1 = vmul.f32 %v2692_v31, %v1283_v3  ;;  %v1308_v41 = vor.u32 1.1754944e-38, %v1307_v9  ;;  %v1433_v9 = vpop.f32.mrf.mxu3 }
 0x5be   :  { %1812 = vmatpush.msra.mxu2 %v4020_v24  ;;  %1923 = vmatpush.msra.mxu1 %v4020_v24 }
 0x5bf   :  { %v1285_v16 = vadd.f32 %v2692_v31, %v1284_v1  ;;  %v353_v1 = vadd.f32 %v4900_v35, %v4899_v59 }
 0x5c0   :  { %1813 = vmatpush.msra.mxu2 %v4023_v17  ;;  %1924 = vmatpush.msra.mxu1 %v4023_v17 }
 0x5c1   :  { %v1289_v3 = vsel %vm1288_vm10, %v2692_v31, %v1285_v16 }
 0x5c2   :  { %v1294_v55 = vsel %vm1291_vm11, %v1293_v61, %v1289_v3  ;;  %1814 = vmatpush.msra.mxu2 %v4025_v25  ;;  %1925 = vmatpush.msra.mxu1 %v4025_v25  ;;  %v4307_v61 = vperm.slane %v1367_v4, 0  ;;  %v1594_v3 = vpop.f32.mrf.mxu1 }
 0x5c3   :  { %v1312_v54 = vmul.f32 %v1311_v57, %v1294_v55  ;;  %v1309_v55 = vsel %vm1306_vm15, %v1308_v41, %v1304_v14 }
 0x5c4   :  { %v1315_v7 = vsub.f32 1.0, %v1309_v55  ;;  %v1317_v37 = vmul.f32 %v1309_v55, %v4032_v38  ;;  %v1392_v38 = vpop.f32.mrf.mxu2  ;;  %4903 = vst [vmem:[#allocation26_spill] sm:$0xff] %v4307_v61 }
 0x5c5   :  { %v1313_v31 = vadd.f32 %v1312_v54, %v353_v1  ;;  %v1393_v59 = vadd.f32 %v1392_v38, %v4307_v61  ;;  %v4310_v1 = vperm.slane %v1367_v4, 1 }
 0x5c7   :  { %2693 = vtanh.f32 %v1313_v31  ;;  %v1637_v35 = vadd.f32 %v1594_v3, %v1393_v59  ;;  %4904 = vst [vmem:[#allocation36_spill] sm:$0xff] %v4310_v1  ;;  %v1434_v41 = vadd.f32 %v1433_v9, %v4310_v1 }
 0x5c9   :  { %v2581_v31 = vmul.f32 -1.442695, %v1637_v35 }
 0x5ca   :  { %v1614_v14 = vpop.f32.mrf.mxu1 }
 0x5cb   :  { %v1638_v55 = vadd.f32 %v1614_v14, %v1434_v41  ;;  %2695 = vpow2.f32 %v2581_v31 }
 0x5cd   :  { %v2694_v2 = vpop.eup %2693 }
 0x5ce   :  { %v1316_v54 = vmul.f32 %v2694_v2, %v1315_v7  ;;  %v2582_v7 = vmul.f32 -1.442695, %v1638_v55 }
 0x5d0   :  { %v1318_v57 = vadd.f32 %v1317_v37, %v1316_v54  ;;  %2697 = vpow2.f32 %v2582_v7 }
 0x5d1   :  { %v2696_v54 = vpop.eup %2695 }
 0x5d2   :  { %1412 = vmatmul.f32.gmra.mxu2 %v1318_v57  ;;  %1453 = vmatmul.f32.gmra.mxu3 %v1318_v57  ;;  %v1645_v37 = vadd.f32 1.0, %v2696_v54  ;;  %v4326_v54 = vld [vmem:[%s4765_s8] ss:$0 sm:$0xff] }
 0x5d3   :  { %1494 = vmatmul.f32.gmra.mxu0 %v1318_v57 }
 0x5d4   :  { %2699 = vrcp.f32 %v1645_v37  ;;  %v1658_v7 = vand.u32 2147483648, %v1645_v37  ;;  %vm1652_vm1 = vweird.f32 %v1645_v37 }
 0x5d6   :  { %v2698_v57 = vpop.eup %2697  ;;  %v1659_v61 = vor.u32 1.1754944e-38, %v1658_v7 }
 0x5d7   :  { %v1646_v3 = vadd.f32 1.0, %v2698_v57  ;;  %v1656_v57 = vand.u32 2147483647, %v1645_v37 }
 0x5d9   :  { %2701 = vrcp.f32 %v1646_v3  ;;  %vm1657_vm3 = vcmp.eq.f32.partialorder %v1656_v57, 8.507059e+37  ;;  %v1673_v25 = vand.u32 2147483648, %v1646_v3  ;;  %vm1667_vm5 = vweird.f32 %v1646_v3 }
 0x5da   :  { %1633 = vmatmul.f32.vlgmr.msrb.gmra.mxu2 %v4890_v34  ;;  %v4300_v34 = vpop.f32.mrf.mxu2  ;;  %v2700_v59 = vpop.eup %2699 }
 0x5db   :  { %1930 = vmatpush.msrb.mxu2 %v4034_v20  ;;  %4901 = vst [vmem:[#allocation47_spill] sm:$0xff] %v4300_v34  ;;  %vm1653_vm0 = vweird.f32 %v2700_v59  ;;  %v1474_v34 = vpop.f32.mrf.mxu0 }
 0x5dc   :  { %vm1654_vm2 = vmor %vm1652_vm1, %vm1653_vm0 }
 0x5dd   :  { %1931 = vmatpush.msrb.mxu2 %v4040_v45 }
 0x5df   :  { %1932 = vmatpush.msrb.mxu2 %v4044_v23 }
 0x5e1   :  { %1933 = vmatpush.msrb.mxu2 %v4049_v27 }
 0x5e2   :  { %v4305_v16 = vpop.f32.mrf.mxu2 }
 0x5e3   :  { %1934 = vmatpush.msrb.mxu2 %v4054_v40  ;;  %4902 = vst [vmem:[#allocation35_spill] sm:$0xff] %v4305_v16  ;;  %v2702_v16 = vpop.eup %2701 }
 0x5e4   :  { %v1663_v14 = vmul.f32 %v2702_v16, %v1646_v3  ;;  %vm1668_vm4 = vweird.f32 %v2702_v16 }
 0x5e5   :  { %1935 = vmatpush.msrb.mxu2 %v4061_v47  ;;  %vm1669_vm6 = vmor %vm1667_vm5, %vm1668_vm4 }
 0x5e6   :  { %v1664_v55 = vsub.f32 1.0, %v1663_v14 }
 0x5e7   :  { %1936 = vmatpush.msrb.mxu2 %v4065_v58 }
 0x5e9   :  { %1937 = vmatpush.msrb.mxu2 %v4070_v13 }
 0x5ea   :  { %v4312_v63 = vpop.f32.mrf.mxu2 }
 0x5eb   :  { %1938 = vmatpush.msrb.mxu2 %v4075_v29  ;;  %4905 = vst [vmem:[#allocation43_spill] sm:$0xff] %v4312_v63  ;;  %v1648_v63 = vmul.f32 %v2700_v59, %v1645_v37  ;;  %v1671_v37 = vand.u32 2147483647, %v1646_v3 }
 0x5ed   :  { %1939 = vmatpush.msrb.mxu2 %v4081_v28  ;;  %v1649_v9 = vsub.f32 1.0, %v1648_v63  ;;  %vm1672_vm7 = vcmp.eq.f32.partialorder %v1671_v37, 8.507059e+37  ;;  %v4926_v37 = vld [vmem:[#allocation47_spill] sm:$0xff] }
 0x5ef   :  { %1940 = vmatpush.msrb.mxu2 %v4086_v36  ;;  %v1650_v31 = vmul.f32 %v2700_v59, %v1649_v9 }
 0x5f1   :  { %1941 = vmatpush.msrb.mxu2 %v4091_v44 }
 0x5f2   :  { %v4315_v2 = vpop.f32.mrf.mxu2 }
 0x5f3   :  { %1942 = vmatpush.msrb.mxu2 %v4096_v33  ;;  %4906 = vst [vmem:[#allocation37_spill] sm:$0xff] %v4315_v2  ;;  %v1651_v2 = vadd.f32 %v2700_v59, %v1650_v31 }
 0x5f5   :  { %1943 = vmatpush.msrb.mxu2 %v4102_v43  ;;  %v1655_v63 = vsel %vm1654_vm2, %v2700_v59, %v1651_v2  ;;  %v1674_v2 = vor.u32 1.1754944e-38, %v1673_v25 }
 0x5f6   :  { %v1660_v31 = vsel %vm1657_vm3, %v1659_v61, %v1655_v63 }
 0x5f7   :  { %1944 = vmatpush.msrb.mxu2 %v4109_v53 }
 0x5f9   :  { %1945 = vmatpush.msrb.mxu2 %v4114_v56 }
 0x5fa   :  { %v4317_v38 = vpop.f32.mrf.mxu2 }
 0x5fb   :  { %4907 = vst [vmem:[#allocation28_spill] sm:$0xff] %v4317_v38  ;;  %v1665_v38 = vmul.f32 %v2702_v16, %v1664_v55 }
 0x602   :  { %v4319_v35 = vpop.f32.mrf.mxu2 }
 0x603   :  { %4908 = vst [vmem:[#allocation45_spill] sm:$0xff] %v4319_v35  ;;  %v4328_v35 = vperm.slane %v1367_v4, 2 }
 0x605   :  { %v1475_v1 = vadd.f32 %v1474_v34, %v4328_v35 }
 0x655   :  { %v4321_v41 = vpop.f32.mrf.mxu2 }
 0x656   :  { %4909 = vst [vmem:[#allocation44_spill] sm:$0xff] %v4321_v41  ;;  %v1666_v41 = vadd.f32 %v2702_v16, %v1665_v38  ;;  %v4924_v38 = vld [vmem:[#allocation36_spill] sm:$0xff] }
 0x658   :  { %v1670_v4 = vsel %vm1669_vm6, %v2702_v16, %v1666_v41 }
 0x659   :  { %v1675_v59 = vsel %vm1672_vm7, %v1674_v2, %v1670_v4 }
 0x65a   :  { %v1681_v7 = vsub.f32 1.0, %v1675_v59 }
 0x65d   :  { %v1634_v9 = vpop.f32.mrf.mxu2 }
 0x65e   :  { %v1677_v14 = vadd.f32 %v4326_v54, %v1634_v9  ;;  %v1683_v9 = vmul.f32 0.0, %v1675_v59 }
 0x660   :  { %v1678_v56 = vmul.f32 %v1677_v14, %v1660_v31  ;;  %v4925_v31 = vld [vmem:[#allocation26_spill] sm:$0xff] }
 0x662   :  { %v1679_v55 = vadd.f32 %v1678_v56, %v1475_v1 }
 0x664   :  { %2703 = vtanh.f32 %v1679_v55  ;;  %v1396_v55 = vadd.f32 %v4926_v37, %v4925_v31 }
 0x66a   :  { %v2704_v57 = vpop.eup %2703 }
 0x66b   :  { %v1682_v53 = vmul.f32 %v2704_v57, %v1681_v7 }
 0x66d   :  { %v4332_v61 = vadd.f32 %v1683_v9, %v1682_v53 }
 0x66f   :  { %1704 = vmatmul.f32.vlgmr.msra.gmra.mxu3 %v4332_v61  ;;  %1724 = vmatmul.f32.vlgmr.msra.gmra.mxu0 %v4332_v61 }
 0x670   :  { %1744 = vmatmul.f32.vlgmr.msrb.gmra.mxu1 %v4332_v61  ;;  %1950 = vmatpush.msra.mxu3 %v4104_v52 }
 0x671   :  { %2021 = vmatpush.msra.mxu0 %v3978_v39  ;;  %2041 = vmatpush.msrb.mxu1 %v4034_v20  ;;  %v4910_v39 = vld [vmem:[#allocation33_spill] sm:$0xff] }
 0x672   :  { %1951 = vmatpush.msra.mxu3 %v4155_v26 }
 0x673   :  { %2022 = vmatpush.msra.mxu0 %v3981_v50  ;;  %2042 = vmatpush.msrb.mxu1 %v4040_v45  ;;  %v4911_v50 = vld [vmem:[#allocation32_spill] sm:$0xff] }
 0x674   :  { %1952 = vmatpush.msra.mxu3 %v4157_v21 }
 0x675   :  { %2023 = vmatpush.msra.mxu0 %v3984_v5  ;;  %2043 = vmatpush.msrb.mxu1 %v4044_v23  ;;  %v4912_v5 = vld [vmem:[#allocation41_spill] sm:$0xff] }
 0x676   :  { %1953 = vmatpush.msra.mxu3 %v4167_v0 }
 0x677   :  { %2024 = vmatpush.msra.mxu0 %v3987_v15  ;;  %2044 = vmatpush.msrb.mxu1 %v4049_v27  ;;  %v4913_v15 = vld [vmem:[#allocation29_spill] sm:$0xff] }
 0x678   :  { %1954 = vmatpush.msra.mxu3 %v4169_v30 }
 0x679   :  { %2025 = vmatpush.msra.mxu0 %v3990_v51  ;;  %2045 = vmatpush.msrb.mxu1 %v4054_v40  ;;  %v4914_v51 = vld [vmem:[#allocation31_spill] sm:$0xff] }
 0x67a   :  { %1955 = vmatpush.msra.mxu3 %v4173_v42 }
 0x67b   :  { %2026 = vmatpush.msra.mxu0 %v3993_v12  ;;  %2046 = vmatpush.msrb.mxu1 %v4061_v47  ;;  %v4915_v12 = vld [vmem:[#allocation34_spill] sm:$0xff] }
 0x67c   :  { %1956 = vmatpush.msra.mxu3 %v4178_v49 }
 0x67d   :  { %2027 = vmatpush.msra.mxu0 %v3996_v32  ;;  %2047 = vmatpush.msrb.mxu1 %v4065_v58  ;;  %v4916_v32 = vld [vmem:[#allocation39_spill] sm:$0xff] }
 0x67e   :  { %1957 = vmatpush.msra.mxu3 %v4184_v62 }
 0x67f   :  { %2028 = vmatpush.msra.mxu0 %v3999_v48  ;;  %2048 = vmatpush.msrb.mxu1 %v4070_v13  ;;  %v1477_v48 = vpop.f32.mrf.mxu0 }
 0x680   :  { %1958 = vmatpush.msra.mxu3 %v4189_v46 }
 0x681   :  { %2029 = vmatpush.msra.mxu0 %v4004_v60  ;;  %2049 = vmatpush.msrb.mxu1 %v4075_v29  ;;  %v1436_v60 = vpop.f32.mrf.mxu3 }
 0x682   :  { %1959 = vmatpush.msra.mxu3 %v4201_v10  ;;  %v1437_v3 = vadd.f32 %v1436_v60, %v4924_v38 }
 0x683   :  { %2030 = vmatpush.msra.mxu0 %v4008_v22  ;;  %2050 = vmatpush.msrb.mxu1 %v4081_v28 }
 0x684   :  { %1960 = vmatpush.msra.mxu3 %v4205_v8 }
 0x685   :  { %2031 = vmatpush.msra.mxu0 %v4011_v6  ;;  %2051 = vmatpush.msrb.mxu1 %v4086_v36 }
 0x686   :  { %1961 = vmatpush.msra.mxu3 %v4210_v11 }
 0x687   :  { %2032 = vmatpush.msra.mxu0 %v4014_v19  ;;  %2052 = vmatpush.msrb.mxu1 %v4091_v44  ;;  %v4385_v22 = vpop.f32.mrf.mxu0 }
 0x688   :  { %1962 = vmatpush.msra.mxu3 %v4910_v39 }
 0x689   :  { %2033 = vmatpush.msra.mxu0 %v4017_v18  ;;  %2053 = vmatpush.msrb.mxu1 %v4096_v33  ;;  %v4387_v6 = vpop.f32.mrf.mxu3 }
 0x68a   :  { %1963 = vmatpush.msra.mxu3 %v4911_v50 }
 0x68b   :  { %2034 = vmatpush.msra.mxu0 %v4020_v24  ;;  %2054 = vmatpush.msrb.mxu1 %v4102_v43 }
 0x68c   :  { %1964 = vmatpush.msra.mxu3 %v4912_v5 }
 0x68d   :  { %2035 = vmatpush.msra.mxu0 %v4023_v17  ;;  %2055 = vmatpush.msrb.mxu1 %v4913_v15 }
 0x68e   :  { %1965 = vmatpush.msra.mxu3 %v4914_v51 }
 0x68f   :  { %2036 = vmatpush.msra.mxu0 %v4915_v12  ;;  %2056 = vmatpush.msrb.mxu1 %v4916_v32  ;;  %v4389_v19 = vpop.f32.mrf.mxu0 }
 0x691   :  { %v4391_v18 = vpop.f32.mrf.mxu3 }
 0x697   :  { %v4393_v24 = vpop.f32.mrf.mxu0 }
 0x698   :  { %4917 = vst [vmem:[#allocation25_spill] sm:$0xff] %v4393_v24 }
 0x699   :  { %v4395_v17 = vpop.f32.mrf.mxu3 }
 0x69f   :  { %v4397_v25 = vpop.f32.mrf.mxu0 }
 0x6a0   :  { %4918 = vst [vmem:[#allocation24_spill] sm:$0xff] %v4397_v25 }
 0x6a1   :  { %v4399_v53 = vpop.f32.mrf.mxu3 }
 0x6a2   :  { %4919 = vst [vmem:[#allocation38_spill] sm:$0xff] %v4399_v53 }
 0x6a7   :  { %v4401_v56 = vpop.f32.mrf.mxu0 }
 0x6a8   :  { %4920 = vst [vmem:[#allocation46_spill] sm:$0xff] %v4401_v56 }
 0x6a9   :  { %v4403_v34 = vpop.f32.mrf.mxu3 }
 0x6aa   :  { %4921 = vst [vmem:[#allocation27_spill] sm:$0xff] %v4403_v34 }
 0x6af   :  { %v4405_v16 = vpop.f32.mrf.mxu0 }
 0x6b0   :  { %4922 = vst [vmem:[#allocation40_spill] sm:$0xff] %v4405_v16 }
 0x6b1   :  { %v4407_v1 = vpop.f32.mrf.mxu3 }
 0x6b2   :  { %4923 = vst [vmem:[#allocation42_spill] sm:$0xff] %v4407_v1 }
 0x6ec   :  { %v1725_v41 = vpop.f32.mrf.mxu0 }
 0x6ed   :  { %v1749_v63 = vadd.f32 %v1725_v41, %v1437_v3 }
 0x6ef   :  { %v2584_v14 = vmul.f32 -1.442695, %v1749_v63 }
 0x6f1   :  { %2705 = vpow2.f32 %v2584_v14 }
 0x6f2   :  { %v1705_v4 = vpop.f32.mrf.mxu3 }
 0x6f3   :  { %v1748_v2 = vadd.f32 %v1705_v4, %v1396_v55  ;;  %v1745_v55 = vpop.f32.mrf.mxu1 }
 0x6f5   :  { %v2583_v59 = vmul.f32 -1.442695, %v1748_v2 }
 0x6f7   :  { %v2706_v7 = vpop.eup %2705  ;;  %2707 = vpow2.f32 %v2583_v59  ;;  %v1788_v59 = vadd.f32 %v4326_v54, %v1745_v55 }
 0x6f8   :  { %v1757_v57 = vadd.f32 1.0, %v2706_v7 }
 0x6fa   :  { %2709 = vrcp.f32 %v1757_v57  ;;  %vm1778_vm13 = vweird.f32 %v1757_v57 }
 0x6fd   :  { %v2708_v9 = vpop.eup %2707 }
 0x6fe   :  { %v1756_v12 = vadd.f32 1.0, %v2708_v9 }
 0x700   :  { %2711 = vrcp.f32 %v1756_v12  ;;  %v2710_v16 = vpop.eup %2709  ;;  %v1769_v63 = vand.u32 2147483648, %v1756_v12  ;;  %v1767_v14 = vand.u32 2147483647, %v1756_v12  ;;  %vm1763_vm9 = vweird.f32 %v1756_v12 }
 0x701   :  { %v1774_v1 = vmul.f32 %v2710_v16, %v1757_v57  ;;  %vm1779_vm12 = vweird.f32 %v2710_v16 }
 0x702   :  { %v1770_v2 = vor.u32 1.1754944e-38, %v1769_v63  ;;  %vm1768_vm11 = vcmp.eq.f32.partialorder %v1767_v14, 8.507059e+37  ;;  %vm1780_vm14 = vmor %vm1778_vm13, %vm1779_vm12 }
 0x703   :  { %v1775_v3 = vsub.f32 1.0, %v1774_v1  ;;  %v1478_v1 = vadd.f32 %v1477_v48, %v4328_v35  ;;  %v4421_v48 = vld [vmem:[#allocation12 + $0x168] sm:$0xff] }
 0x705   :  { %v1776_v37 = vmul.f32 %v2710_v16, %v1775_v3 }
 0x706   :  { %v2712_v60 = vpop.eup %2711 }
 0x707   :  { %v1759_v56 = vmul.f32 %v2712_v60, %v1756_v12  ;;  %vm1764_vm8 = vweird.f32 %v2712_v60  ;;  %v1777_v25 = vadd.f32 %v2710_v16, %v1776_v37 }
 0x708   :  { %vm1765_vm10 = vmor %vm1763_vm9, %vm1764_vm8 }
 0x709   :  { %v1760_v41 = vsub.f32 1.0, %v1759_v56  ;;  %v1784_v56 = vand.u32 2147483648, %v1757_v57  ;;  %v1781_v24 = vsel %vm1780_vm14, %v2710_v16, %v1777_v25 }
 0x70b   :  { %v1761_v34 = vmul.f32 %v2712_v60, %v1760_v41  ;;  %v1782_v41 = vand.u32 2147483647, %v1757_v57 }
 0x70d   :  { %v1762_v4 = vadd.f32 %v2712_v60, %v1761_v34  ;;  %v1785_v34 = vor.u32 1.1754944e-38, %v1784_v56  ;;  %vm1783_vm15 = vcmp.eq.f32.partialorder %v1782_v41, 8.507059e+37 }
 0x70f   :  { %v1766_v7 = vsel %vm1765_vm10, %v2712_v60, %v1762_v4  ;;  %v1786_v12 = vsel %vm1783_vm15, %v1785_v34, %v1781_v24  ;;  %v4426_v24 = vld [vmem:[#allocation12 + $0x150] sm:$0xff] }
 0x710   :  { %v1771_v9 = vsel %vm1768_vm11, %v1770_v2, %v1766_v7  ;;  %v1792_v63 = vsub.f32 1.0, %v1786_v12  ;;  %v1794_v14 = vmul.f32 %v1786_v12, %v4332_v61  ;;  %v4431_v61 = vld [vmem:[#allocation12 + $0x138] sm:$0xff] }
 0x711   :  { %v1789_v53 = vmul.f32 %v1788_v59, %v1771_v9 }
 0x713   :  { %v1790_v3 = vadd.f32 %v1789_v53, %v1478_v1 }
 0x715   :  { %2713 = vtanh.f32 %v1790_v3 }
 0x71b   :  { %v2714_v55 = vpop.eup %2713 }
 0x71c   :  { %v1793_v60 = vmul.f32 %v2714_v55, %v1792_v63 }
 0x71e   :  { %v4415_v37 = vadd.f32 %v1794_v14, %v1793_v60 }
 0x720   :  { %1815 = vmatmul.f32.vlgmr.msra.gmra.mxu2 %v4415_v37  ;;  %1835 = vmatmul.f32.vlgmr.msrb.gmra.mxu3 %v4415_v37 }
 0x721   :  { %1855 = vmatmul.f32.vlgmr.msrb.gmra.mxu0 %v4415_v37  ;;  %2061 = vmatpush.msra.mxu2 %v4104_v52  ;;  %v4436_v52 = vld [vmem:[#allocation12 + $0x120] sm:$0xff] }
 0x722   :  { %2132 = vmatpush.msrb.mxu3 %v4421_v48  ;;  %2152 = vmatpush.msrb.mxu0 %v4034_v20  ;;  %v4441_v20 = vld [vmem:[#allocation12 + $0x108] sm:$0xff] }
 0x723   :  { %2062 = vmatpush.msra.mxu2 %v4155_v26 }
 0x724   :  { %2133 = vmatpush.msrb.mxu3 %v4426_v24  ;;  %2153 = vmatpush.msrb.mxu0 %v4040_v45  ;;  %v4446_v45 = vld [vmem:[#allocation12 + $0xf0] sm:$0xff] }
 0x725   :  { %2063 = vmatpush.msra.mxu2 %v4157_v21 }
 0x726   :  { %2134 = vmatpush.msrb.mxu3 %v4431_v61  ;;  %2154 = vmatpush.msrb.mxu0 %v4044_v23  ;;  %v4451_v23 = vld [vmem:[#allocation12 + $0xd8] sm:$0xff] }
 0x727   :  { %2064 = vmatpush.msra.mxu2 %v4167_v0 }
 0x728   :  { %2135 = vmatpush.msrb.mxu3 %v4436_v52  ;;  %2155 = vmatpush.msrb.mxu0 %v4049_v27  ;;  %v4456_v27 = vld [vmem:[#allocation12 + $0xc0] sm:$0xff] }
 0x729   :  { %2065 = vmatpush.msra.mxu2 %v4169_v30 }
 0x72a   :  { %2136 = vmatpush.msrb.mxu3 %v4441_v20  ;;  %2156 = vmatpush.msrb.mxu0 %v4054_v40  ;;  %v4461_v40 = vld [vmem:[#allocation12 + $0xa8] sm:$0xff] }
 0x72b   :  { %2066 = vmatpush.msra.mxu2 %v4173_v42 }
 0x72c   :  { %2137 = vmatpush.msrb.mxu3 %v4446_v45  ;;  %2157 = vmatpush.msrb.mxu0 %v4061_v47  ;;  %v4466_v47 = vld [vmem:[#allocation12 + $0x90] sm:$0xff] }
 0x72d   :  { %2067 = vmatpush.msra.mxu2 %v4178_v49 }
 0x72e   :  { %2138 = vmatpush.msrb.mxu3 %v4451_v23  ;;  %2158 = vmatpush.msrb.mxu0 %v4065_v58  ;;  %v4471_v58 = vld [vmem:[#allocation12 + $0x78] sm:$0xff] }
 0x72f   :  { %2068 = vmatpush.msra.mxu2 %v4184_v62 }
 0x730   :  { %2139 = vmatpush.msrb.mxu3 %v4456_v27  ;;  %2159 = vmatpush.msrb.mxu0 %v4070_v13  ;;  %v4476_v13 = vld [vmem:[#allocation12 + $0x60] sm:$0xff] }
 0x731   :  { %2069 = vmatpush.msra.mxu2 %v4189_v46 }
 0x732   :  { %2140 = vmatpush.msrb.mxu3 %v4461_v40  ;;  %2160 = vmatpush.msrb.mxu0 %v4075_v29  ;;  %v4481_v29 = vld [vmem:[#allocation12 + $0x48] sm:$0xff] }
 0x733   :  { %2070 = vmatpush.msra.mxu2 %v4201_v10 }
 0x734   :  { %2141 = vmatpush.msrb.mxu3 %v4466_v47  ;;  %2161 = vmatpush.msrb.mxu0 %v4081_v28  ;;  %v4486_v28 = vld [vmem:[#allocation12 + $0x30] sm:$0xff] }
 0x735   :  { %2071 = vmatpush.msra.mxu2 %v4205_v8 }
 0x736   :  { %2142 = vmatpush.msrb.mxu3 %v4471_v58  ;;  %2162 = vmatpush.msrb.mxu0 %v4086_v36  ;;  %v4491_v36 = vld [vmem:[#allocation12 + $0x18] sm:$0xff] }
 0x737   :  { %2072 = vmatpush.msra.mxu2 %v4210_v11 }
 0x738   :  { %2143 = vmatpush.msrb.mxu3 %v4476_v13  ;;  %2163 = vmatpush.msrb.mxu0 %v4091_v44  ;;  %v4496_v44 = vld [vmem:[#allocation12] sm:$0xff] }
 0x739   :  { %2073 = vmatpush.msra.mxu2 %v4910_v39 }
 0x73a   :  { %2144 = vmatpush.msrb.mxu3 %v4481_v29  ;;  %2164 = vmatpush.msrb.mxu0 %v4096_v33  ;;  %v4927_v33 = vld [vmem:[#allocation35_spill] sm:$0xff] }
 0x73b   :  { %2074 = vmatpush.msra.mxu2 %v4911_v50  ;;  %v1399_v25 = vadd.f32 %v4927_v33, %v4925_v31 }
 0x73c   :  { %2145 = vmatpush.msrb.mxu3 %v4486_v28  ;;  %2165 = vmatpush.msrb.mxu0 %v4102_v43  ;;  %v1440_v43 = vadd.f32 %v4387_v6, %v4924_v38 }
 0x73d   :  { %2075 = vmatpush.msra.mxu2 %v4912_v5 }
 0x73e   :  { %2146 = vmatpush.msrb.mxu3 %v4491_v36  ;;  %2166 = vmatpush.msrb.mxu0 %v4913_v15 }
 0x73f   :  { %2076 = vmatpush.msra.mxu2 %v4914_v51 }
 0x740   :  { %2147 = vmatpush.msrb.mxu3 %v4496_v44  ;;  %2167 = vmatpush.msrb.mxu0 %v4916_v32 }
 0x79e   :  { %v1856_v60 = vpop.f32.mrf.mxu0 }
 0x7a3   :  { %v1816_v53 = vpop.f32.mrf.mxu2  ;;  %v1836_v16 = vpop.f32.mrf.mxu3 }
 0x7a4   :  { %v1859_v57 = vadd.f32 %v1816_v53, %v1399_v25  ;;  %v1860_v4 = vadd.f32 %v1836_v16, %v1440_v43  ;;  %v1899_v43 = vadd.f32 %v4326_v54, %v1856_v60 }
 0x7a6   :  { %v2585_v2 = vmul.f32 -1.442695, %v1859_v57  ;;  %v2586_v15 = vmul.f32 -1.442695, %v1860_v4  ;;  %v1481_v4 = vadd.f32 %v4385_v22, %v4328_v35  ;;  %v4513_v22 = vld [vmem:[#allocation12 + $0x178] sm:$0xff] }
 0x7a8   :  { %2715 = vpow2.f32 %v2585_v2 }
 0x7a9   :  { %2717 = vpow2.f32 %v2586_v15 }
 0x7ae   :  { %v2716_v59 = vpop.eup %2715 }
 0x7af   :  { %v2718_v7 = vpop.eup %2717  ;;  %v1867_v9 = vadd.f32 1.0, %v2716_v59 }
 0x7b0   :  { %v1868_v1 = vadd.f32 1.0, %v2718_v7 }
 0x7b1   :  { %2719 = vrcp.f32 %v1867_v9  ;;  %v1880_v6 = vand.u32 2147483648, %v1867_v9  ;;  %v1878_v55 = vand.u32 2147483647, %v1867_v9  ;;  %vm1874_vm1 = vweird.f32 %v1867_v9 }
 0x7b2   :  { %2721 = vrcp.f32 %v1868_v1  ;;  %v1895_v2 = vand.u32 2147483648, %v1868_v1  ;;  %vm1889_vm5 = vweird.f32 %v1868_v1  ;;  %v1893_v59 = vand.u32 2147483647, %v1868_v1 }
 0x7b3   :  { %v1881_v25 = vor.u32 1.1754944e-38, %v1880_v6  ;;  %vm1879_vm3 = vcmp.eq.f32.partialorder %v1878_v55, 8.507059e+37  ;;  %v4532_v55 = vld [vmem:[#allocation12 + $0x128] sm:$0xff] }
 0x7b4   :  { %vm1894_vm7 = vcmp.eq.f32.partialorder %v1893_v59, 8.507059e+37 }
 0x7b7   :  { %v2720_v32 = vpop.eup %2719 }
 0x7b8   :  { %v2722_v56 = vpop.eup %2721  ;;  %v1870_v41 = vmul.f32 %v2720_v32, %v1867_v9  ;;  %vm1875_vm0 = vweird.f32 %v2720_v32  ;;  %v1896_v9 = vor.u32 1.1754944e-38, %v1895_v2 }
 0x7b9   :  { %v1885_v3 = vmul.f32 %v2722_v56, %v1868_v1  ;;  %vm1876_vm2 = vmor %vm1874_vm1, %vm1875_vm0  ;;  %vm1890_vm4 = vweird.f32 %v2722_v56  ;;  %v4517_v1 = vld [vmem:[#allocation12 + $0x170] sm:$0xff] }
 0x7ba   :  { %v1871_v34 = vsub.f32 1.0, %v1870_v41  ;;  %vm1891_vm6 = vmor %vm1889_vm5, %vm1890_vm4 }
 0x7bb   :  { %v1886_v12 = vsub.f32 1.0, %v1885_v3 }
 0x7bc   :  { %v1872_v63 = vmul.f32 %v2720_v32, %v1871_v34 }
 0x7bd   :  { %v1887_v14 = vmul.f32 %v2722_v56, %v1886_v12 }
 0x7be   :  { %v1873_v33 = vadd.f32 %v2720_v32, %v1872_v63 }
 0x7bf   :  { %v1888_v57 = vadd.f32 %v2722_v56, %v1887_v14 }
 0x7c0   :  { %v1877_v53 = vsel %vm1876_vm2, %v2720_v32, %v1873_v33 }
 0x7c1   :  { %v1882_v16 = vsel %vm1879_vm3, %v1881_v25, %v1877_v53  ;;  %v1892_v41 = vsel %vm1891_vm6, %v2722_v56, %v1888_v57  ;;  %v4527_v56 = vld [vmem:[#allocation12 + $0x140] sm:$0xff]  ;;  %v1443_v25 = vadd.f32 %v4391_v18, %v4924_v38 }
 0x7c2   :  { %v1900_v15 = vmul.f32 %v1899_v43, %v1882_v16  ;;  %v1897_v3 = vsel %vm1894_vm7, %v1896_v9, %v1892_v41 }
 0x7c3   :  { %v1903_v34 = vsub.f32 1.0, %v1897_v3  ;;  %v1905_v12 = vmul.f32 %v1897_v3, %v4415_v37  ;;  %v4522_v37 = vld [vmem:[#allocation12 + $0x158] sm:$0xff] }
 0x7c4   :  { %v1901_v7 = vadd.f32 %v1900_v15, %v1481_v4 }
 0x7c6   :  { %2723 = vtanh.f32 %v1901_v7 }
 0x7cc   :  { %v2724_v32 = vpop.eup %2723 }
 0x7cd   :  { %v1904_v6 = vmul.f32 %v2724_v32, %v1903_v34 }
 0x7cf   :  { %v4508_v63 = vadd.f32 %v1905_v12, %v1904_v6 }
 0x7d1   :  { %1926 = vmatmul.f32.vlgmr.msra.gmra.mxu1 %v4508_v63  ;;  %1946 = vmatmul.f32.vlgmr.msrb.gmra.mxu2 %v4508_v63 }
 0x7d2   :  { %1966 = vmatmul.f32.vlgmr.msra.gmra.mxu3 %v4508_v63  ;;  %2172 = vmatpush.msra.mxu1 %v4513_v22 }
 0x7d3   :  { %2243 = vmatpush.msrb.mxu2 %v4421_v48  ;;  %2263 = vmatpush.msra.mxu3 %v4517_v1 }
 0x7d4   :  { %2173 = vmatpush.msra.mxu1 %v4155_v26  ;;  %v4537_v26 = vld [vmem:[#allocation12 + $0x110] sm:$0xff] }
 0x7d5   :  { %2244 = vmatpush.msrb.mxu2 %v4426_v24  ;;  %2264 = vmatpush.msra.mxu3 %v4522_v37 }
 0x7d6   :  { %2174 = vmatpush.msra.mxu1 %v4157_v21  ;;  %v4542_v21 = vld [vmem:[#allocation12 + $0xf8] sm:$0xff] }
 0x7d7   :  { %2245 = vmatpush.msrb.mxu2 %v4431_v61  ;;  %2265 = vmatpush.msra.mxu3 %v4527_v56 }
 0x7d8   :  { %2175 = vmatpush.msra.mxu1 %v4167_v0  ;;  %v4547_v0 = vld [vmem:[#allocation12 + $0xe0] sm:$0xff] }
 0x7d9   :  { %2246 = vmatpush.msrb.mxu2 %v4436_v52  ;;  %2266 = vmatpush.msra.mxu3 %v4532_v55 }
 0x7da   :  { %2176 = vmatpush.msra.mxu1 %v4169_v30  ;;  %v4552_v30 = vld [vmem:[#allocation12 + $0xc8] sm:$0xff] }
 0x7db   :  { %2247 = vmatpush.msrb.mxu2 %v4441_v20  ;;  %2267 = vmatpush.msra.mxu3 %v4537_v26 }
 0x7dc   :  { %2177 = vmatpush.msra.mxu1 %v4173_v42  ;;  %v4557_v42 = vld [vmem:[#allocation12 + $0xb0] sm:$0xff] }
 0x7dd   :  { %2248 = vmatpush.msrb.mxu2 %v4446_v45  ;;  %2268 = vmatpush.msra.mxu3 %v4542_v21 }
 0x7de   :  { %2178 = vmatpush.msra.mxu1 %v4178_v49  ;;  %v4562_v49 = vld [vmem:[#allocation12 + $0x98] sm:$0xff] }
 0x7df   :  { %2249 = vmatpush.msrb.mxu2 %v4451_v23  ;;  %2269 = vmatpush.msra.mxu3 %v4547_v0 }
 0x7e0   :  { %2179 = vmatpush.msra.mxu1 %v4184_v62  ;;  %v4567_v62 = vld [vmem:[#allocation12 + $0x80] sm:$0xff] }
 0x7e1   :  { %2250 = vmatpush.msrb.mxu2 %v4456_v27  ;;  %2270 = vmatpush.msra.mxu3 %v4552_v30 }
 0x7e2   :  { %2180 = vmatpush.msra.mxu1 %v4189_v46  ;;  %v4572_v46 = vld [vmem:[#allocation12 + $0x68] sm:$0xff] }
 0x7e3   :  { %2251 = vmatpush.msrb.mxu2 %v4461_v40  ;;  %2271 = vmatpush.msra.mxu3 %v4557_v42 }
 0x7e4   :  { %2181 = vmatpush.msra.mxu1 %v4201_v10  ;;  %v4577_v10 = vld [vmem:[#allocation12 + $0x50] sm:$0xff] }
 0x7e5   :  { %2252 = vmatpush.msrb.mxu2 %v4466_v47  ;;  %2272 = vmatpush.msra.mxu3 %v4562_v49 }
 0x7e6   :  { %2182 = vmatpush.msra.mxu1 %v4205_v8  ;;  %v4582_v8 = vld [vmem:[#allocation12 + $0x38] sm:$0xff] }
 0x7e7   :  { %2253 = vmatpush.msrb.mxu2 %v4471_v58  ;;  %2273 = vmatpush.msra.mxu3 %v4567_v62 }
 0x7e8   :  { %2183 = vmatpush.msra.mxu1 %v4210_v11  ;;  %v4587_v11 = vld [vmem:[#allocation12 + $0x20] sm:$0xff] }
 0x7e9   :  { %2254 = vmatpush.msrb.mxu2 %v4476_v13  ;;  %2274 = vmatpush.msra.mxu3 %v4572_v46 }
 0x7ea   :  { %2184 = vmatpush.msra.mxu1 %v4910_v39  ;;  %v4592_v39 = vld [vmem:[#allocation12 + $0x8] sm:$0xff] }
 0x7eb   :  { %2255 = vmatpush.msrb.mxu2 %v4481_v29  ;;  %2275 = vmatpush.msra.mxu3 %v4577_v10 }
 0x7ec   :  { %2185 = vmatpush.msra.mxu1 %v4911_v50  ;;  %v4928_v50 = vld [vmem:[#allocation43_spill] sm:$0xff] }
 0x7ed   :  { %2256 = vmatpush.msrb.mxu2 %v4486_v28  ;;  %2276 = vmatpush.msra.mxu3 %v4582_v8  ;;  %v1402_v60 = vadd.f32 %v4928_v50, %v4925_v31 }
 0x7ee   :  { %2186 = vmatpush.msra.mxu1 %v4912_v5 }
 0x7ef   :  { %2257 = vmatpush.msrb.mxu2 %v4491_v36  ;;  %2277 = vmatpush.msra.mxu3 %v4587_v11 }
 0x7f0   :  { %2187 = vmatpush.msra.mxu1 %v4914_v51 }
 0x7f1   :  { %2258 = vmatpush.msrb.mxu2 %v4496_v44  ;;  %2278 = vmatpush.msra.mxu3 %v4592_v39 }
 0x84e   :  { %v1927_v14 = vpop.f32.mrf.mxu1 }
 0x84f   :  { %v1970_v33 = vadd.f32 %v1927_v14, %v1402_v60 }
 0x851   :  { %v2587_v5 = vmul.f32 -1.442695, %v1970_v33  ;;  %v1484_v33 = vadd.f32 %v4389_v19, %v4328_v35 }
 0x853   :  { %2725 = vpow2.f32 %v2587_v5 }
 0x854   :  { %v1947_v43 = vpop.f32.mrf.mxu2 }
 0x855   :  { %v1971_v53 = vadd.f32 %v1947_v43, %v1443_v25  ;;  %v1967_v18 = vpop.f32.mrf.mxu3 }
 0x856   :  { %v2010_v14 = vadd.f32 %v4326_v54, %v1967_v18 }
 0x857   :  { %v2588_v16 = vmul.f32 -1.442695, %v1971_v53 }
 0x859   :  { %v2726_v51 = vpop.eup %2725  ;;  %2727 = vpow2.f32 %v2588_v16 }
 0x85a   :  { %v1978_v57 = vadd.f32 1.0, %v2726_v51 }
 0x85c   :  { %2729 = vrcp.f32 %v1978_v57  ;;  %v1991_v41 = vand.u32 2147483648, %v1978_v57  ;;  %v1989_v3 = vand.u32 2147483647, %v1978_v57  ;;  %vm1985_vm9 = vweird.f32 %v1978_v57 }
 0x85e   :  { %v1992_v12 = vor.u32 1.1754944e-38, %v1991_v41  ;;  %vm1990_vm11 = vcmp.eq.f32.partialorder %v1989_v3, 8.507059e+37 }
 0x85f   :  { %v2728_v4 = vpop.eup %2727 }
 0x860   :  { %v1979_v2 = vadd.f32 1.0, %v2728_v4 }
 0x862   :  { %v2730_v15 = vpop.eup %2729  ;;  %2731 = vrcp.f32 %v1979_v2  ;;  %v2006_v43 = vand.u32 2147483648, %v1979_v2  ;;  %v2004_v16 = vand.u32 2147483647, %v1979_v2  ;;  %vm2000_vm13 = vweird.f32 %v1979_v2 }
 0x863   :  { %v1981_v59 = vmul.f32 %v2730_v15, %v1978_v57  ;;  %vm1986_vm8 = vweird.f32 %v2730_v15 }
 0x864   :  { %vm1987_vm10 = vmor %vm1985_vm9, %vm1986_vm8  ;;  %v2007_v57 = vor.u32 1.1754944e-38, %v2006_v43  ;;  %vm2005_vm15 = vcmp.eq.f32.partialorder %v2004_v16, 8.507059e+37 }
 0x865   :  { %v1982_v7 = vsub.f32 1.0, %v1981_v59 }
 0x867   :  { %v1983_v9 = vmul.f32 %v2730_v15, %v1982_v7 }
 0x868   :  { %v2732_v34 = vpop.eup %2731 }
 0x869   :  { %v1996_v32 = vmul.f32 %v2732_v34, %v1979_v2  ;;  %v1984_v6 = vadd.f32 %v2730_v15, %v1983_v9  ;;  %vm2001_vm12 = vweird.f32 %v2732_v34  ;;  %v4611_v2 = vld [vmem:[#allocation12 + $0x160] sm:$0xff] }
 0x86a   :  { %vm2002_vm14 = vmor %vm2000_vm13, %vm2001_vm12 }
 0x86b   :  { %v1997_v50 = vsub.f32 1.0, %v1996_v32  ;;  %v1988_v60 = vsel %vm1987_vm10, %v2730_v15, %v1984_v6 }
 0x86c   :  { %v1993_v5 = vsel %vm1990_vm11, %v1992_v12, %v1988_v60 }
 0x86d   :  { %v1998_v25 = vmul.f32 %v2732_v34, %v1997_v50  ;;  %v2011_v53 = vmul.f32 %v2010_v14, %v1993_v5 }
 0x86f   :  { %v1999_v51 = vadd.f32 %v2732_v34, %v1998_v25  ;;  %v2012_v4 = vadd.f32 %v2011_v53, %v1484_v33  ;;  %v4930_v25 = vld [vmem:[#allocation25_spill] sm:$0xff] }
 0x870   :  { %v1487_v43 = vadd.f32 %v4930_v25, %v4328_v35 }
 0x871   :  { %v2003_v59 = vsel %vm2002_vm14, %v2732_v34, %v1999_v51  ;;  %2733 = vtanh.f32 %v2012_v4  ;;  %v4621_v34 = vld [vmem:[#allocation12 + $0x130] sm:$0xff] }
 0x872   :  { %v2008_v15 = vsel %vm2005_vm15, %v2007_v57, %v2003_v59 }
 0x873   :  { %v2014_v7 = vsub.f32 1.0, %v2008_v15  ;;  %v2016_v19 = vmul.f32 %v2008_v15, %v4508_v63  ;;  %v4616_v63 = vld [vmem:[#allocation12 + $0x148] sm:$0xff] }
 0x877   :  { %v2734_v41 = vpop.eup %2733 }
 0x878   :  { %v2015_v9 = vmul.f32 %v2734_v41, %v2014_v7 }
 0x87a   :  { %v4603_v3 = vadd.f32 %v2016_v19, %v2015_v9 }
 0x87c   :  { %2037 = vmatmul.f32.vlgmr.msra.gmra.mxu0 %v4603_v3  ;;  %2057 = vmatmul.f32.vlgmr.msrb.gmra.mxu1 %v4603_v3 }
 0x87d   :  { %2077 = vmatmul.f32.vlgmr.msra.gmra.mxu2 %v4603_v3  ;;  %2283 = vmatpush.msra.mxu0 %v4513_v22 }
 0x87e   :  { %2354 = vmatpush.msrb.mxu1 %v4421_v48  ;;  %2374 = vmatpush.msra.mxu2 %v4517_v1  ;;  %v4626_v48 = vld [vmem:[#allocation12 + $0x118] sm:$0xff]  ;;  %v1446_v1 = vadd.f32 %v4395_v17, %v4924_v38 }
 0x87f   :  { %2284 = vmatpush.msra.mxu0 %v4611_v2 }
 0x880   :  { %2355 = vmatpush.msrb.mxu1 %v4426_v24  ;;  %2375 = vmatpush.msra.mxu2 %v4522_v37  ;;  %v4631_v24 = vld [vmem:[#allocation12 + $0x100] sm:$0xff] }
 0x881   :  { %2285 = vmatpush.msra.mxu0 %v4616_v63 }
 0x882   :  { %2356 = vmatpush.msrb.mxu1 %v4431_v61  ;;  %2376 = vmatpush.msra.mxu2 %v4527_v56  ;;  %v4636_v61 = vld [vmem:[#allocation12 + $0xe8] sm:$0xff] }
 0x883   :  { %2286 = vmatpush.msra.mxu0 %v4621_v34 }
 0x884   :  { %2357 = vmatpush.msrb.mxu1 %v4436_v52  ;;  %2377 = vmatpush.msra.mxu2 %v4532_v55  ;;  %v4641_v52 = vld [vmem:[#allocation12 + $0xd0] sm:$0xff] }
 0x885   :  { %2287 = vmatpush.msra.mxu0 %v4626_v48 }
 0x886   :  { %2358 = vmatpush.msrb.mxu1 %v4441_v20  ;;  %2378 = vmatpush.msra.mxu2 %v4537_v26  ;;  %v4646_v20 = vld [vmem:[#allocation12 + $0xb8] sm:$0xff] }
 0x887   :  { %2288 = vmatpush.msra.mxu0 %v4631_v24 }
 0x888   :  { %2359 = vmatpush.msrb.mxu1 %v4446_v45  ;;  %2379 = vmatpush.msra.mxu2 %v4542_v21  ;;  %v4651_v45 = vld [vmem:[#allocation12 + $0xa0] sm:$0xff] }
 0x889   :  { %2289 = vmatpush.msra.mxu0 %v4636_v61 }
 0x88a   :  { %2360 = vmatpush.msrb.mxu1 %v4451_v23  ;;  %2380 = vmatpush.msra.mxu2 %v4547_v0  ;;  %v4656_v23 = vld [vmem:[#allocation12 + $0x88] sm:$0xff] }
 0x88b   :  { %2290 = vmatpush.msra.mxu0 %v4641_v52 }
 0x88c   :  { %2361 = vmatpush.msrb.mxu1 %v4456_v27  ;;  %2381 = vmatpush.msra.mxu2 %v4552_v30  ;;  %v4661_v27 = vld [vmem:[#allocation12 + $0x70] sm:$0xff] }
 0x88d   :  { %2291 = vmatpush.msra.mxu0 %v4646_v20 }
 0x88e   :  { %2362 = vmatpush.msrb.mxu1 %v4461_v40  ;;  %2382 = vmatpush.msra.mxu2 %v4557_v42  ;;  %v4666_v40 = vld [vmem:[#allocation12 + $0x58] sm:$0xff] }
 0x88f   :  { %2292 = vmatpush.msra.mxu0 %v4651_v45 }
 0x890   :  { %2363 = vmatpush.msrb.mxu1 %v4466_v47  ;;  %2383 = vmatpush.msra.mxu2 %v4562_v49  ;;  %v4671_v47 = vld [vmem:[#allocation12 + $0x40] sm:$0xff] }
 0x891   :  { %2293 = vmatpush.msra.mxu0 %v4656_v23 }
 0x892   :  { %2364 = vmatpush.msrb.mxu1 %v4471_v58  ;;  %2384 = vmatpush.msra.mxu2 %v4567_v62  ;;  %v4676_v58 = vld [vmem:[#allocation12 + $0x28] sm:$0xff] }
 0x893   :  { %2294 = vmatpush.msra.mxu0 %v4661_v27 }
 0x894   :  { %2365 = vmatpush.msrb.mxu1 %v4476_v13  ;;  %2385 = vmatpush.msra.mxu2 %v4572_v46  ;;  %v4681_v13 = vld [vmem:[#allocation12 + $0x10] sm:$0xff] }
 0x895   :  { %2295 = vmatpush.msra.mxu0 %v4666_v40 }
 0x896   :  { %2366 = vmatpush.msrb.mxu1 %v4481_v29  ;;  %2386 = vmatpush.msra.mxu2 %v4577_v10  ;;  %v4929_v29 = vld [vmem:[#allocation37_spill] sm:$0xff] }
 0x897   :  { %2296 = vmatpush.msra.mxu0 %v4671_v47 }
 0x898   :  { %2367 = vmatpush.msrb.mxu1 %v4486_v28  ;;  %2387 = vmatpush.msra.mxu2 %v4582_v8  ;;  %v1405_v28 = vadd.f32 %v4929_v29, %v4925_v31 }
 0x899   :  { %2297 = vmatpush.msra.mxu0 %v4676_v58 }
 0x89a   :  { %2368 = vmatpush.msrb.mxu1 %v4491_v36  ;;  %2388 = vmatpush.msra.mxu2 %v4587_v11 }
 0x89b   :  { %2298 = vmatpush.msra.mxu0 %v4681_v13 }
 0x89c   :  { %2369 = vmatpush.msrb.mxu1 %v4496_v44  ;;  %2389 = vmatpush.msra.mxu2 %v4592_v39 }
 0x8f9   :  { %v2038_v37 = vpop.f32.mrf.mxu0  ;;  %v2058_v56 = vpop.f32.mrf.mxu1 }
 0x8fa   :  { %v2081_v55 = vadd.f32 %v2038_v37, %v1405_v28  ;;  %v2082_v36 = vadd.f32 %v2058_v56, %v1446_v1 }
 0x8fc   :  { %v2589_v26 = vmul.f32 -1.442695, %v2081_v55  ;;  %v2590_v21 = vmul.f32 -1.442695, %v2082_v36 }
 0x8fe   :  { %2735 = vpow2.f32 %v2589_v26 }
 0x8ff   :  { %2737 = vpow2.f32 %v2590_v21 }
 0x900   :  { %v2078_v6 = vpop.f32.mrf.mxu2 }
 0x901   :  { %v2121_v14 = vadd.f32 %v4326_v54, %v2078_v6 }
 0x904   :  { %v2736_v0 = vpop.eup %2735 }
 0x905   :  { %v2738_v30 = vpop.eup %2737  ;;  %v2089_v42 = vadd.f32 1.0, %v2736_v0 }
 0x906   :  { %v2090_v44 = vadd.f32 1.0, %v2738_v30  ;;  %v4722_v30 = vld [vmem:[%s4765_s8] ss:$0 sm:$0xff] }
 0x907   :  { %2739 = vrcp.f32 %v2089_v42  ;;  %v2102_v11 = vand.u32 2147483648, %v2089_v42  ;;  %v2100_v18 = vand.u32 2147483647, %v2089_v42  ;;  %vm2096_vm1 = vweird.f32 %v2089_v42 }
 0x908   :  { %2741 = vrcp.f32 %v2090_v44  ;;  %v2117_v16 = vand.u32 2147483648, %v2090_v44  ;;  %vm2111_vm5 = vweird.f32 %v2090_v44  ;;  %v2115_v51 = vand.u32 2147483647, %v2090_v44 }
 0x909   :  { %v2103_v50 = vor.u32 1.1754944e-38, %v2102_v11  ;;  %vm2101_vm3 = vcmp.eq.f32.partialorder %v2100_v18, 8.507059e+37 }
 0x90a   :  { %v2118_v59 = vor.u32 1.1754944e-38, %v2117_v16  ;;  %vm2116_vm7 = vcmp.eq.f32.partialorder %v2115_v51, 8.507059e+37 }
 0x90d   :  { %v2740_v49 = vpop.eup %2739 }
 0x90e   :  { %v2742_v62 = vpop.eup %2741  ;;  %v2092_v46 = vmul.f32 %v2740_v49, %v2089_v42  ;;  %vm2097_vm0 = vweird.f32 %v2740_v49 }
 0x90f   :  { %v2107_v10 = vmul.f32 %v2742_v62, %v2090_v44  ;;  %vm2098_vm2 = vmor %vm2096_vm1, %vm2097_vm0  ;;  %vm2112_vm4 = vweird.f32 %v2742_v62 }
 0x910   :  { %v2093_v8 = vsub.f32 1.0, %v2092_v46  ;;  %vm2113_vm6 = vmor %vm2111_vm5, %vm2112_vm4  ;;  %v4933_v46 = vld [vmem:[#allocation24_spill] sm:$0xff] }
 0x911   :  { %v2108_v17 = vsub.f32 1.0, %v2107_v10  ;;  %v1490_v10 = vadd.f32 %v4933_v46, %v4328_v35  ;;  %v2476_v46 = vld [vmem:[#allocation14 + $0x70] sm:$0xff] }
 0x912   :  { %v2094_v39 = vmul.f32 %v2740_v49, %v2093_v8 }
 0x913   :  { %v2109_v32 = vmul.f32 %v2742_v62, %v2108_v17 }
 0x914   :  { %v2095_v12 = vadd.f32 %v2740_v49, %v2094_v39 }
 0x915   :  { %v2110_v5 = vadd.f32 %v2742_v62, %v2109_v32 }
 0x916   :  { %v2099_v60 = vsel %vm2098_vm2, %v2740_v49, %v2095_v12 }
 0x917   :  { %v2104_v33 = vsel %vm2101_vm3, %v2103_v50, %v2099_v60  ;;  %v2114_v57 = vsel %vm2113_vm6, %v2742_v62, %v2110_v5  ;;  %v4934_v5 = vld [vmem:[#allocation45_spill] sm:$0xff] }
 0x918   :  { %v2122_v53 = vmul.f32 %v2121_v14, %v2104_v33  ;;  %v2119_v15 = vsel %vm2116_vm7, %v2118_v59, %v2114_v57  ;;  %v1411_v25 = vadd.f32 %v4934_v5, %v4925_v31  ;;  %v4938_v5 = vld [vmem:[#allocation42_spill] sm:$0xff] }
 0x919   :  { %v2125_v7 = vsub.f32 1.0, %v2119_v15  ;;  %v2127_v9 = vmul.f32 %v2119_v15, %v4603_v3 }
 0x91a   :  { %v2123_v4 = vadd.f32 %v2122_v53, %v1487_v43  ;;  %v4935_v43 = vld [vmem:[#allocation27_spill] sm:$0xff] }
 0x91b   :  { %v1452_v53 = vadd.f32 %v4935_v43, %v4924_v38  ;;  %v2467_v43 = vld [vmem:[#allocation14 + $0x28] sm:$0xff] }
 0x91c   :  { %2743 = vtanh.f32 %v2123_v4 }
 0x922   :  { %v2744_v41 = vpop.eup %2743 }
 0x923   :  { %v2126_v54 = vmul.f32 %v2744_v41, %v2125_v7 }
 0x925   :  { %v4694_v19 = vadd.f32 %v2127_v9, %v2126_v54 }
 0x927   :  { %2148 = vmatmul.f32.vlgmr.msrb.gmra.mxu3 %v4694_v19  ;;  %2168 = vmatmul.f32.vlgmr.msrb.gmra.mxu0 %v4694_v19 }
 0x928   :  { %2188 = vmatmul.f32.vlgmr.msra.gmra.mxu1 %v4694_v19  ;;  %2394 = vmatpush.msrb.mxu3 %v4513_v22  ;;  %v4931_v22 = vld [vmem:[#allocation38_spill] sm:$0xff] }
 0x929   :  { %v1449_v3 = vadd.f32 %v4931_v22, %v4924_v38 }
 0x92a   :  { %2395 = vmatpush.msrb.mxu3 %v4611_v2 }
 0x92c   :  { %2396 = vmatpush.msrb.mxu3 %v4616_v63 }
 0x92e   :  { %2397 = vmatpush.msrb.mxu3 %v4621_v34 }
 0x930   :  { %2398 = vmatpush.msrb.mxu3 %v4626_v48  ;;  %v4932_v48 = vld [vmem:[#allocation28_spill] sm:$0xff] }
 0x932   :  { %2399 = vmatpush.msrb.mxu3 %v4631_v24  ;;  %v1408_v24 = vadd.f32 %v4932_v48, %v4925_v31 }
 0x934   :  { %2400 = vmatpush.msrb.mxu3 %v4636_v61 }
 0x936   :  { %2401 = vmatpush.msrb.mxu3 %v4641_v52 }
 0x938   :  { %2402 = vmatpush.msrb.mxu3 %v4646_v20 }
 0x93a   :  { %2403 = vmatpush.msrb.mxu3 %v4651_v45 }
 0x93c   :  { %2404 = vmatpush.msrb.mxu3 %v4656_v23 }
 0x93e   :  { %2405 = vmatpush.msrb.mxu3 %v4661_v27 }
 0x940   :  { %2406 = vmatpush.msrb.mxu3 %v4666_v40 }
 0x942   :  { %2407 = vmatpush.msrb.mxu3 %v4671_v47 }
 0x944   :  { %2408 = vmatpush.msrb.mxu3 %v4676_v58 }
 0x946   :  { %2409 = vmatpush.msrb.mxu3 %v4681_v13 }
 0x9a4   :  { %v2169_v2 = vpop.f32.mrf.mxu0 }
 0x9a5   :  { %v2193_v63 = vadd.f32 %v2169_v2, %v1449_v3  ;;  %v2189_v26 = vpop.f32.mrf.mxu1 }
 0x9a6   :  { %v2232_v42 = vadd.f32 %v4722_v30, %v2189_v26 }
 0x9a7   :  { %v2592_v34 = vmul.f32 -1.442695, %v2193_v63 }
 0x9a9   :  { %2745 = vpow2.f32 %v2592_v34 }
 0x9aa   :  { %v2149_v61 = vpop.f32.mrf.mxu3 }
 0x9ab   :  { %v2192_v52 = vadd.f32 %v2149_v61, %v1408_v24 }
 0x9ad   :  { %v2591_v20 = vmul.f32 -1.442695, %v2192_v52 }
 0x9af   :  { %v2746_v45 = vpop.eup %2745  ;;  %2747 = vpow2.f32 %v2591_v20 }
 0x9b0   :  { %v2201_v23 = vadd.f32 1.0, %v2746_v45 }
 0x9b2   :  { %2749 = vrcp.f32 %v2201_v23  ;;  %v2228_v8 = vand.u32 2147483648, %v2201_v23  ;;  %vm2222_vm13 = vweird.f32 %v2201_v23  ;;  %v2226_v11 = vand.u32 2147483647, %v2201_v23 }
 0x9b4   :  { %v2229_v32 = vor.u32 1.1754944e-38, %v2228_v8  ;;  %vm2227_vm15 = vcmp.eq.f32.partialorder %v2226_v11, 8.507059e+37  ;;  %v2474_v8 = vld [vmem:[#allocation14 + $0x60] sm:$0xff]  ;;  %v2472_v11 = vld [vmem:[#allocation14 + $0x50] sm:$0xff] }
 0x9b5   :  { %v2748_v27 = vpop.eup %2747 }
 0x9b6   :  { %v2200_v40 = vadd.f32 1.0, %v2748_v27 }
 0x9b8   :  { %2751 = vrcp.f32 %v2200_v40  ;;  %v2750_v47 = vpop.eup %2749  ;;  %v2213_v37 = vand.u32 2147483648, %v2200_v40  ;;  %v2211_v55 = vand.u32 2147483647, %v2200_v40  ;;  %vm2207_vm9 = vweird.f32 %v2200_v40 }
 0x9b9   :  { %v2218_v58 = vmul.f32 %v2750_v47, %v2201_v23  ;;  %vm2223_vm12 = vweird.f32 %v2750_v47 }
 0x9ba   :  { %v2214_v0 = vor.u32 1.1754944e-38, %v2213_v37  ;;  %vm2212_vm11 = vcmp.eq.f32.partialorder %v2211_v55, 8.507059e+37  ;;  %vm2224_vm14 = vmor %vm2222_vm13, %vm2223_vm12 }
 0x9bb   :  { %v2219_v28 = vsub.f32 1.0, %v2218_v58 }
 0x9bd   :  { %v2220_v36 = vmul.f32 %v2750_v47, %v2219_v28 }
 0x9be   :  { %v2752_v13 = vpop.eup %2751 }
 0x9bf   :  { %v2203_v29 = vmul.f32 %v2752_v13, %v2200_v40  ;;  %vm2208_vm8 = vweird.f32 %v2752_v13  ;;  %v2221_v49 = vadd.f32 %v2750_v47, %v2220_v36 }
 0x9c0   :  { %vm2209_vm10 = vmor %vm2207_vm9, %vm2208_vm8 }
 0x9c1   :  { %v2204_v1 = vsub.f32 1.0, %v2203_v29  ;;  %v2225_v18 = vsel %vm2224_vm14, %v2750_v47, %v2221_v49 }
 0x9c2   :  { %v2230_v6 = vsel %vm2227_vm15, %v2229_v32, %v2225_v18  ;;  %v4937_v18 = vld [vmem:[#allocation44_spill] sm:$0xff] }
 0x9c3   :  { %v2205_v56 = vmul.f32 %v2752_v13, %v2204_v1  ;;  %v2236_v12 = vsub.f32 1.0, %v2230_v6  ;;  %v2238_v14 = vmul.f32 %v2230_v6, %v4694_v19  ;;  %v1414_v32 = vadd.f32 %v4937_v18, %v4925_v31  ;;  %v2470_v6 = vld [vmem:[#allocation14 + $0x40] sm:$0xff] }
 0x9c5   :  { %v2206_v21 = vadd.f32 %v2752_v13, %v2205_v56 }
 0x9c7   :  { %v2210_v44 = vsel %vm2209_vm10, %v2752_v13, %v2206_v21  ;;  %v4936_v13 = vld [vmem:[#allocation46_spill] sm:$0xff] }
 0x9c8   :  { %v2215_v62 = vsel %vm2212_vm11, %v2214_v0, %v2210_v44  ;;  %v1493_v29 = vadd.f32 %v4936_v13, %v4328_v35 }
 0x9c9   :  { %v2233_v17 = vmul.f32 %v2232_v42, %v2215_v62  ;;  %v2477_v62 = vld [vmem:[#allocation14 + $0x78] sm:$0xff] }
 0x9ca   :  { %2482 = vmatpush.msrb.mxu0 %v2477_v62  ;;  %v2508_v62 = vld [vmem:[#allocation15 + $0x28] sm:$0xff] }
 0x9cb   :  { %v2234_v39 = vadd.f32 %v2233_v17, %v1490_v10  ;;  %v2475_v10 = vld [vmem:[#allocation14 + $0x68] sm:$0xff]  ;;  %v2473_v17 = vld [vmem:[#allocation14 + $0x58] sm:$0xff] }
 0x9cc   :  { %2483 = vmatpush.msrb.mxu0 %v2476_v46 }
 0x9cd   :  { %2753 = vtanh.f32 %v2234_v39  ;;  %v2471_v39 = vld [vmem:[#allocation14 + $0x48] sm:$0xff] }
 0x9ce   :  { %2484 = vmatpush.msrb.mxu0 %v2475_v10 }
 0x9d0   :  { %2485 = vmatpush.msrb.mxu0 %v2474_v8  ;;  %v2507_v8 = vld [vmem:[#allocation15 + $0x20] sm:$0xff] }
 0x9d2   :  { %2486 = vmatpush.msrb.mxu0 %v2473_v17 }
 0x9d3   :  { %v2754_v50 = vpop.eup %2753 }
 0x9d4   :  { %v2237_v60 = vmul.f32 %v2754_v50, %v2236_v12  ;;  %2487 = vmatpush.msrb.mxu0 %v2472_v11 }
 0x9d6   :  { %v2239_v33 = vadd.f32 %v2238_v14, %v2237_v60  ;;  %2488 = vmatpush.msrb.mxu0 %v2471_v39  ;;  %v2469_v60 = vld [vmem:[#allocation14 + $0x38] sm:$0xff] }
 0x9d8   :  { %2259 = vmatmul.f32.vlgmr.msrb.gmra.mxu2 %v2239_v33  ;;  %2279 = vmatmul.f32.vlgmr.msra.gmra.mxu3 %v2239_v33 }
 0x9d9   :  { %2299 = vmatmul.f32.vlgmr.msra.gmra.mxu0 %v2239_v33 }
 0x9da   :  { %2489 = vmatpush.msrb.mxu0 %v2470_v6 }
 0x9dc   :  { %2490 = vmatpush.msrb.mxu0 %v2469_v60  ;;  %v2504_v60 = vld [vmem:[#allocation15 + $0x8] sm:$0xff] }
 0xa56   :  { %v2300_v52 = vpop.f32.mrf.mxu0 }
 0xa57   :  { %v2343_v27 = vadd.f32 %v4722_v30, %v2300_v52  ;;  %v2512_v52 = vld [vmem:[#allocation15 + $0x48] sm:$0xff] }
 0xa5b   :  { %v2260_v16 = vpop.f32.mrf.mxu2  ;;  %v2280_v51 = vpop.f32.mrf.mxu3 }
 0xa5c   :  { %v2303_v4 = vadd.f32 %v2260_v16, %v1411_v25  ;;  %v2304_v57 = vadd.f32 %v2280_v51, %v1452_v53  ;;  %v1455_v25 = vadd.f32 %v4938_v5, %v4924_v38  ;;  %v2466_v51 = vld [vmem:[#allocation14 + $0x20] sm:$0xff]  ;;  %v2518_v38 = vld [vmem:[#allocation15 + $0x78] sm:$0xff] }
 0xa5d   :  { %2523 = vmatpush.msra.mxu1 %v2518_v38 }
 0xa5e   :  { %v2593_v59 = vmul.f32 -1.442695, %v2303_v4  ;;  %v2594_v15 = vmul.f32 -1.442695, %v2304_v57  ;;  %v2465_v4 = vld [vmem:[#allocation14 + $0x18] sm:$0xff]  ;;  %v2464_v57 = vld [vmem:[#allocation14 + $0x10] sm:$0xff] }
 0xa60   :  { %2755 = vpow2.f32 %v2593_v59 }
 0xa61   :  { %2757 = vpow2.f32 %v2594_v15  ;;  %v2463_v15 = vld [vmem:[#allocation14 + $0x8] sm:$0xff] }
 0xa66   :  { %v2756_v7 = vpop.eup %2755 }
 0xa67   :  { %v2758_v41 = vpop.eup %2757  ;;  %v2311_v54 = vadd.f32 1.0, %v2756_v7 }
 0xa68   :  { %v2312_v9 = vadd.f32 1.0, %v2758_v41  ;;  %v2462_v41 = vld [vmem:[#allocation14] sm:$0xff] }
 0xa69   :  { %2759 = vrcp.f32 %v2311_v54  ;;  %v2324_v34 = vand.u32 2147483648, %v2311_v54  ;;  %v2322_v61 = vand.u32 2147483647, %v2311_v54  ;;  %vm2318_vm1 = vweird.f32 %v2311_v54 }
 0xa6a   :  { %2761 = vrcp.f32 %v2312_v9  ;;  %v2339_v28 = vand.u32 2147483648, %v2312_v9  ;;  %vm2333_vm5 = vweird.f32 %v2312_v9  ;;  %v2337_v37 = vand.u32 2147483647, %v2312_v9 }
 0xa6b   :  { %v2325_v23 = vor.u32 1.1754944e-38, %v2324_v34  ;;  %vm2323_vm3 = vcmp.eq.f32.partialorder %v2322_v61, 8.507059e+37 }
 0xa6c   :  { %v2340_v36 = vor.u32 1.1754944e-38, %v2339_v28  ;;  %vm2338_vm7 = vcmp.eq.f32.partialorder %v2337_v37, 8.507059e+37 }
 0xa6f   :  { %v2760_v19 = vpop.eup %2759 }
 0xa70   :  { %v2762_v22 = vpop.eup %2761  ;;  %v2314_v3 = vmul.f32 %v2760_v19, %v2311_v54  ;;  %vm2319_vm0 = vweird.f32 %v2760_v19  ;;  %v2517_v54 = vld [vmem:[#allocation15 + $0x70] sm:$0xff] }
 0xa71   :  { %v2329_v2 = vmul.f32 %v2762_v22, %v2312_v9  ;;  %vm2320_vm2 = vmor %vm2318_vm1, %vm2319_vm0  ;;  %vm2334_vm4 = vweird.f32 %v2762_v22  ;;  %v2516_v9 = vld [vmem:[#allocation15 + $0x68] sm:$0xff]  ;;  %2524 = vmatpush.msra.mxu1 %v2517_v54 }
 0xa72   :  { %v2315_v63 = vsub.f32 1.0, %v2314_v3  ;;  %vm2335_vm6 = vmor %vm2333_vm5, %vm2334_vm4  ;;  %v2515_v3 = vld [vmem:[#allocation15 + $0x60] sm:$0xff] }
 0xa73   :  { %v2330_v48 = vsub.f32 1.0, %v2329_v2  ;;  %2525 = vmatpush.msra.mxu1 %v2516_v9 }
 0xa74   :  { %v2316_v24 = vmul.f32 %v2760_v19, %v2315_v63  ;;  %v2514_v63 = vld [vmem:[#allocation15 + $0x58] sm:$0xff] }
 0xa75   :  { %v2331_v20 = vmul.f32 %v2762_v22, %v2330_v48  ;;  %2526 = vmatpush.msra.mxu1 %v2515_v3  ;;  %v2513_v48 = vld [vmem:[#allocation15 + $0x50] sm:$0xff] }
 0xa76   :  { %v2317_v45 = vadd.f32 %v2760_v19, %v2316_v24 }
 0xa77   :  { %v2332_v58 = vadd.f32 %v2762_v22, %v2331_v20  ;;  %2527 = vmatpush.msra.mxu1 %v2514_v63 }
 0xa78   :  { %v2321_v40 = vsel %vm2320_vm2, %v2760_v19, %v2317_v45 }
 0xa79   :  { %v2326_v47 = vsel %vm2323_vm3, %v2325_v23, %v2321_v40  ;;  %v2336_v55 = vsel %vm2335_vm6, %v2762_v22, %v2332_v58  ;;  %2528 = vmatpush.msra.mxu1 %v2513_v48  ;;  %v2511_v40 = vld [vmem:[#allocation15 + $0x40] sm:$0xff] }
 0xa7a   :  { %v2344_v1 = vmul.f32 %v2343_v27, %v2326_v47  ;;  %v2341_v26 = vsel %vm2338_vm7, %v2340_v36, %v2336_v55 }
 0xa7b   :  { %v2347_v21 = vsub.f32 1.0, %v2341_v26  ;;  %v2349_v44 = vmul.f32 %v2341_v26, %v2239_v33  ;;  %v2468_v33 = vld [vmem:[#allocation14 + $0x30] sm:$0xff]  ;;  %2529 = vmatpush.msra.mxu1 %v2512_v52 }
 0xa7c   :  { %v2345_v56 = vadd.f32 %v2344_v1, %v1493_v29  ;;  %2491 = vmatpush.msrb.mxu0 %v2468_v33  ;;  %v2510_v29 = vld [vmem:[#allocation15 + $0x38] sm:$0xff]  ;;  %v2509_v26 = vld [vmem:[#allocation15 + $0x30] sm:$0xff] }
 0xa7d   :  { %2530 = vmatpush.msra.mxu1 %v2511_v40  ;;  %v2613_v33 = vld [vmem:[%s4767_s10] ss:$0 sm:$0xff] }
 0xa7e   :  { %2763 = vtanh.f32 %v2345_v56  ;;  %2492 = vmatpush.msrb.mxu0 %v2467_v43  ;;  %v4939_v56 = vld [vmem:[#allocation40_spill] sm:$0xff] }
 0xa7f   :  { %v1496_v55 = vadd.f32 %v4939_v56, %v4328_v35  ;;  %2531 = vmatpush.msra.mxu1 %v2510_v29  ;;  %v2506_v35 = vld [vmem:[#allocation15 + $0x18] sm:$0xff] }
 0xa80   :  { %2493 = vmatpush.msrb.mxu0 %v2466_v51 }
 0xa81   :  { %2532 = vmatpush.msra.mxu1 %v2509_v26 }
 0xa82   :  { %2494 = vmatpush.msrb.mxu0 %v2465_v4 }
 0xa83   :  { %2533 = vmatpush.msra.mxu1 %v2508_v62 }
 0xa84   :  { %v2764_v0 = vpop.eup %2763  ;;  %2495 = vmatpush.msrb.mxu0 %v2464_v57 }
 0xa85   :  { %v2348_v42 = vmul.f32 %v2764_v0, %v2347_v21  ;;  %2534 = vmatpush.msra.mxu1 %v2507_v8 }
 0xa86   :  { %2496 = vmatpush.msrb.mxu0 %v2463_v15 }
 0xa87   :  { %v4735_v49 = vadd.f32 %v2349_v44, %v2348_v42  ;;  %2535 = vmatpush.msra.mxu1 %v2506_v35 }
 0xa88   :  { %2497 = vmatpush.msrb.mxu0 %v2462_v41 }
 0xa89   :  { %2370 = vmatmul.f32.vlgmr.msrb.gmra.mxu1 %v4735_v49  ;;  %2390 = vmatmul.f32.vlgmr.msra.gmra.mxu2 %v4735_v49 }
 0xa8a   :  { %2410 = vmatmul.f32.vlgmr.msrb.gmra.mxu3 %v4735_v49 }
 0xb06   :  { %v2371_v12 = vpop.f32.mrf.mxu1 }
 0xb07   :  { %v2414_v50 = vadd.f32 %v2371_v12, %v1414_v32 }
 0xb09   :  { %v2595_v14 = vmul.f32 -1.442695, %v2414_v50  ;;  %v2505_v50 = vld [vmem:[#allocation15 + $0x10] sm:$0xff] }
 0xb0a   :  { %2536 = vmatpush.msra.mxu1 %v2505_v50 }
 0xb0b   :  { %2765 = vpow2.f32 %v2595_v14  ;;  %v2503_v14 = vld [vmem:[#allocation15] sm:$0xff] }
 0xb0c   :  { %v2391_v53 = vpop.f32.mrf.mxu2  ;;  %2537 = vmatpush.msra.mxu1 %v2504_v60 }
 0xb0d   :  { %v2415_v16 = vadd.f32 %v2391_v53, %v1455_v25  ;;  %v2411_v27 = vpop.f32.mrf.mxu3 }
 0xb0e   :  { %v2454_v37 = vadd.f32 %v4722_v30, %v2411_v27  ;;  %2538 = vmatpush.msra.mxu1 %v2503_v14 }
 0xb0f   :  { %v2596_v31 = vmul.f32 -1.442695, %v2415_v16 }
 0xb11   :  { %v2766_v59 = vpop.eup %2765  ;;  %2767 = vpow2.f32 %v2596_v31 }
 0xb12   :  { %v2422_v7 = vadd.f32 1.0, %v2766_v59 }
 0xb14   :  { %2769 = vrcp.f32 %v2422_v7  ;;  %v2435_v61 = vand.u32 2147483648, %v2422_v7  ;;  %v2433_v45 = vand.u32 2147483647, %v2422_v7  ;;  %vm2429_vm9 = vweird.f32 %v2422_v7 }
 0xb16   :  { %v2436_v13 = vor.u32 1.1754944e-38, %v2435_v61  ;;  %vm2434_vm11 = vcmp.eq.f32.partialorder %v2433_v45, 8.507059e+37 }
 0xb17   :  { %v2768_v19 = vpop.eup %2767 }
 0xb18   :  { %v2423_v22 = vadd.f32 1.0, %v2768_v19 }
 0xb1a   :  { %v2770_v2 = vpop.eup %2769  ;;  %2771 = vrcp.f32 %v2423_v22  ;;  %v2450_v0 = vand.u32 2147483648, %v2423_v22  ;;  %v2448_v44 = vand.u32 2147483647, %v2423_v22  ;;  %vm2444_vm13 = vweird.f32 %v2423_v22 }
 0xb1b   :  { %v2425_v34 = vmul.f32 %v2770_v2, %v2422_v7  ;;  %vm2430_vm8 = vweird.f32 %v2770_v2 }
 0xb1c   :  { %vm2431_vm10 = vmor %vm2429_vm9, %vm2430_vm8  ;;  %v2451_v30 = vor.u32 1.1754944e-38, %v2450_v0  ;;  %vm2449_vm15 = vcmp.eq.f32.partialorder %v2448_v44, 8.507059e+37 }
 0xb1d   :  { %v2426_v24 = vsub.f32 1.0, %v2425_v34 }
 0xb1f   :  { %v2427_v20 = vmul.f32 %v2770_v2, %v2426_v24 }
 0xb20   :  { %v2772_v23 = vpop.eup %2771 }
 0xb21   :  { %v2440_v47 = vmul.f32 %v2772_v23, %v2423_v22  ;;  %v2428_v58 = vadd.f32 %v2770_v2, %v2427_v20  ;;  %vm2445_vm12 = vweird.f32 %v2772_v23 }
 0xb22   :  { %vm2446_vm14 = vmor %vm2444_vm13, %vm2445_vm12 }
 0xb23   :  { %v2441_v28 = vsub.f32 1.0, %v2440_v47  ;;  %v2432_v1 = vsel %vm2431_vm10, %v2770_v2, %v2428_v58 }
 0xb24   :  { %v2437_v36 = vsel %vm2434_vm11, %v2436_v13, %v2432_v1 }
 0xb25   :  { %v2442_v21 = vmul.f32 %v2772_v23, %v2441_v28  ;;  %v2455_v42 = vmul.f32 %v2454_v37, %v2437_v36 }
 0xb27   :  { %v2443_v46 = vadd.f32 %v2772_v23, %v2442_v21  ;;  %v2456_v10 = vadd.f32 %v2455_v42, %v1496_v55 }
 0xb29   :  { %v2447_v17 = vsel %vm2446_vm14, %v2772_v23, %v2443_v46  ;;  %2773 = vtanh.f32 %v2456_v10 }
 0xb2a   :  { %v2452_v11 = vsel %vm2449_vm15, %v2451_v30, %v2447_v17 }
 0xb2b   :  { %v2458_v39 = vsub.f32 1.0, %v2452_v11  ;;  %v2460_v6 = vmul.f32 %v2452_v11, %v4735_v49  ;;  %v2614_v49 = vld [vmem:[%s4769_s12] ss:$0 sm:$0xff] }
 0xb2f   :  { %v2774_v18 = vpop.eup %2773 }
 0xb30   :  { %v2459_v32 = vmul.f32 %v2774_v18, %v2458_v39 }
 0xb32   :  { %v2461_v12 = vadd.f32 %v2460_v6, %v2459_v32 }
 0xb34   :  { %2498 = vmatmul.f32.vlgmr.msrb.gmra.mxu0 %v2461_v12 }
 0xbb1   :  { %v2499_v5 = vpop.f32.mrf.mxu0 }
 0xbb2   :  { %v2500_v25 = vadd.f32 %v2613_v33, %v2499_v5 }
 0xbb4   :  { %v2502_v43 = vmax.f32 %v2500_v25, 0.0 }
 0xbb6   :  { %2539 = vmatmul.f32.vlgmr.msra.gmra.mxu1 %v2502_v43 }
 0xc33   :  { %v2540_v53 = vpop.f32.mrf.mxu1 }
 0xc34   :  { %v2541_v16 = vadd.f32 %v2614_v49, %v2540_v53 }
 0xc36   :  { %2543 = vst [vmem:[#allocation17] sm:$0xff] %v2541_v16 }
 0xc37   :  { %2554 = dma.vmem_to_hbm [thread:$0]  %s2550_s20, 128, %s2552_s22, [#allocation5]  }
 0xc38   :  { %3099 = dma.done.wait [#allocation5], 128  }
 0xc39   :  { %3100 = vsyncadd [#allocation5], 4294967168 }
 0xc3a   :  { %2559 = vsyncpa [#allocation4], 1 }
 0xc3b   :  { %2560 = vsyncpa [#allocation7], 1 }
 0xc3c   :  { %2561 = vsyncpa [#allocation10], 1 }
 0xc3d   :  { %2562 = vsyncpa [#allocation13], 1 }
 0xc3e   :  { %2563 = vsyncpa [#allocation16], 1 }
 0xc3f   :  { %2564 = vsyncpa [#allocation5], 1 }

</bundles_post_ra>
